<compile_context>
chip_gen: v6e
topology: v6e:2x2x1
jax: 0.10.0
libtpu: 0.0.40
codegen_flags: <defaults>
</compile_context>

<pallas_src>
import functools

import jax
import jax.numpy as jnp
from jax.experimental import pallas as pl
from jax.experimental.pallas import tpu as pltpu

LINEAR_PAD = 8  # pad num_classes to a sublane-friendly width; sliced back in the wrapper


# ----------------------------- Pallas kernels ------------------------------

def _conv_pair_kernel(ph_ref, wh_ref, sh_ref, ps_ref, ws_ref, ss_ref,
                      yh_ref, ys_ref):
    """One Syn_layer: both im2col'd conv matmuls + folded-BN shift + ReLU."""
    acc_h = jnp.dot(ph_ref[...], wh_ref[...], preferred_element_type=jnp.float32)
    yh_ref[...] = jnp.maximum(acc_h + sh_ref[...], 0.0).astype(yh_ref.dtype)
    acc_s = jnp.dot(ps_ref[...], ws_ref[...], preferred_element_type=jnp.float32)
    ys_ref[...] = jnp.maximum(acc_s + ss_ref[...], 0.0).astype(ys_ref.dtype)


def _conv_pair_fusion_kernel(ph_ref, wh_ref, sh_ref, ps_ref, ws_ref, ss_ref,
                             wlh_ref, wls_ref, bl_ref,
                             yh_ref, ys_ref, out_ref):
    """Last Syn_layer + the fusion nn.Linear, all in one kernel.

    The conv output rows are ordered (spatial..., batch) so that for every spatial
    position r the B batch rows form a contiguous block; the Linear is then a sum of
    small (B, C) @ (C, n_cls) matmuls over spatial positions, avoiding any in-kernel
    flatten / transpose of the fused feature map.
    """
    acc_h = jnp.dot(ph_ref[...], wh_ref[...], preferred_element_type=jnp.float32)
    yh_ref[...] = jnp.maximum(acc_h + sh_ref[...], 0.0).astype(yh_ref.dtype)
    acc_s = jnp.dot(ps_ref[...], ws_ref[...], preferred_element_type=jnp.float32)
    ys_ref[...] = jnp.maximum(acc_s + ss_ref[...], 0.0).astype(ys_ref.dtype)

    batch, npad = out_ref.shape
    acc = jnp.zeros((batch, npad), jnp.float32)
    for r in range(wlh_ref.shape[0]):          # hsi spatial positions (n, h, w)
        blk = yh_ref[pl.ds(r * batch, batch), :]
        acc = acc + jnp.dot(blk, wlh_ref[r], preferred_element_type=jnp.float32)
    for r in range(wls_ref.shape[0]):          # sar spatial positions (h, w)
        blk = ys_ref[pl.ds(r * batch, batch), :]
        acc = acc + jnp.dot(blk, wls_ref[r], preferred_element_type=jnp.float32)
    out_ref[...] = acc + bl_ref[...]


def _vmem_specs(n):
    return [pl.BlockSpec(memory_space=pltpu.MemorySpace.VMEM)] * n


def conv_pair_call(ph, wh, sh, ps, ws, ss):
    mh, nh = ph.shape[0], wh.shape[1]
    ms, ns = ps.shape[0], ws.shape[1]
    return pl.pallas_call(
        _conv_pair_kernel,
        out_shape=(jax.ShapeDtypeStruct((mh, nh), jnp.bfloat16),
                   jax.ShapeDtypeStruct((ms, ns), jnp.bfloat16)),
        in_specs=_vmem_specs(6),
        out_specs=(pl.BlockSpec(memory_space=pltpu.MemorySpace.VMEM),) * 2,
    )(ph, wh, sh, ps, ws, ss)


def conv_pair_fusion_call(ph, wh, sh, ps, ws, ss, wlh, wls, bl, batch):
    mh, nh = ph.shape[0], wh.shape[1]
    ms, ns = ps.shape[0], ws.shape[1]
    npad = bl.shape[1]
    return pl.pallas_call(
        _conv_pair_fusion_kernel,
        out_shape=(jax.ShapeDtypeStruct((mh, nh), jnp.float32),
                   jax.ShapeDtypeStruct((ms, ns), jnp.float32),
                   jax.ShapeDtypeStruct((batch, npad), jnp.float32)),
        in_specs=_vmem_specs(9),
        out_specs=(pl.BlockSpec(memory_space=pltpu.MemorySpace.VMEM),) * 3,
    )(ph, wh, sh, ps, ws, ss, wlh, wls, bl)


# ----------------------- Patch extraction (XLA glue, tiny) ------------------

def extract_patches_3d(x, kd, kh, kw, batch_major):
    # x: (B, D, H, W, C) channels-last -> (rows, kd*kh*kw*C); cols ordered (dz, dy, dx, c)
    b, d, h, w, c = x.shape
    do, ho, wo = d - kd + 1, h - kh + 1, w - kw + 1
    cols = [x[:, dz:dz + do, dy:dy + ho, dx:dx + wo, :]
            for dz in range(kd) for dy in range(kh) for dx in range(kw)]
    p = jnp.concatenate(cols, axis=-1)                      # (B, Do, Ho, Wo, K)
    k = kd * kh * kw * c
    if batch_major:
        return p.reshape(b * do * ho * wo, k), (do, ho, wo)
    return p.transpose(1, 2, 3, 0, 4).reshape(do * ho * wo * b, k), (do, ho, wo)


def extract_patches_2d(x, kh, kw, batch_major):
    # x: (B, H, W, C) channels-last -> (rows, kh*kw*C); cols ordered (dy, dx, c)
    b, h, w, c = x.shape
    ho, wo = h - kh + 1, w - kw + 1
    cols = [x[:, dy:dy + ho, dx:dx + wo, :] for dy in range(kh) for dx in range(kw)]
    p = jnp.concatenate(cols, axis=-1)                      # (B, Ho, Wo, K)
    k = kh * kw * c
    if batch_major:
        return p.reshape(b * ho * wo, k), (ho, wo)
    return p.transpose(1, 2, 0, 3).reshape(ho * wo * b, k), (ho, wo)


# ----------------------------- Parameter setup ------------------------------

class ParamGen:
    def __init__(self, seed=0):
        self.key = jax.random.PRNGKey(seed)
        self.count = 0

    def normal(self, shape, stddev=0.05):
        self.count += 1
        k = jax.random.fold_in(self.key, self.count)
        return stddev * jax.random.normal(k, shape, dtype=jnp.float32)


def fold_bn(gamma, beta, mean, var, conv_bias, eps=1e-5):
    scale = gamma / jnp.sqrt(var + eps)
    shift = beta + scale * (conv_bias - mean)
    return scale, shift


def make_conv_bn_params(pg, cout, cin, ksize):
    w = pg.normal((cout, cin) + tuple(ksize))
    b = pg.normal((cout,))
    gamma = 1.0 + pg.normal((cout,), 0.1)
    beta = pg.normal((cout,), 0.1)
    mean = jnp.zeros((cout,), jnp.float32)   # eval-mode running stats
    var = jnp.ones((cout,), jnp.float32)
    scale, shift = fold_bn(gamma, beta, mean, var, b)
    return {"w": w, "scale": scale, "shift": shift}


def build_net_params(cfg, pg):
    cha_h = [8, 16, 24, 32]
    cha_x = [64, 128, 192, 256]
    pca_num = cfg["pca_num"]
    img_size = cfg["window_size"]
    sar_num = cfg["slar_channel_num"]
    layer_num = cfg["num_layer"]

    layers = []
    for i in range(layer_num):
        n = 9 - i * 2
        if i == 0:
            hc1, hc2, sc1, sc2 = 1, cha_h[i], sar_num, cha_x[i]
        else:
            hc1, hc2, sc1, sc2 = cha_h[i - 1], cha_h[i], cha_x[i - 1], cha_x[i]
        layers.append({"hsi_conv": make_conv_bn_params(pg, hc2, hc1, (n, 3, 3)),
                       "sar_conv": make_conv_bn_params(pg, sc2, sc1, (3, 3))})
        pca_num = pca_num - (9 - 2 * (i + 1) + 1)
        img_size = img_size - 2

    lin_in = (cha_x[layer_num - 1] + cha_h[layer_num - 1] * pca_num) * img_size ** 2
    lin_out = cfg["num_classes"]
    # PyTorch nn.Linear layout: weight (out_features, in_features), y = x @ W.T + b
    fusion_w = pg.normal((lin_out, lin_in), 0.02)
    fusion_b = pg.normal((lin_out,), 0.02)
    return {"layers": layers, "fusion_w": fusion_w, "fusion_b": fusion_b,
            "final_pca": pca_num, "final_img": img_size,
            "cha_h": cha_h[layer_num - 1], "cha_x": cha_x[layer_num - 1]}


# -------------------- Kernel-ready parameter preparation --------------------

def _prep_conv3d(p):
    w, scale, shift = p["w"], p["scale"], p["shift"]
    co, ci, kd, kh, kw = w.shape
    wmat = jnp.transpose(w, (2, 3, 4, 1, 0)).reshape(kd * kh * kw * ci, co)
    wmat = wmat * scale[None, :]                  # fold BN scale into weight columns
    return wmat.astype(jnp.bfloat16), shift.reshape(1, co).astype(jnp.float32)


def _prep_conv2d(p):
    w, scale, shift = p["w"], p["scale"], p["shift"]
    co, ci, kh, kw = w.shape
    wmat = jnp.transpose(w, (2, 3, 1, 0)).reshape(kh * kw * ci, co)
    wmat = wmat * scale[None, :]
    return wmat.astype(jnp.bfloat16), shift.reshape(1, co).astype(jnp.float32)


def _prep_linear(wl, bl, c_h, n_d, c_s, hs, npad):
    # wl: (num_classes, (c_h*n_d + c_s)*hs*hs); input index = flatten of PyTorch NCHW
    # fusion_feat_m (hsi channel index = c*n_d + n, followed by sar channels).
    ncls = wl.shape[0]
    w = wl.reshape(ncls, c_h * n_d + c_s, hs, hs)
    wh = w[:, :c_h * n_d].reshape(ncls, c_h, n_d, hs, hs)          # (k, c, n, h, w)
    ws = w[:, c_h * n_d:]                                          # (k, c, h, w)
    wlh = jnp.transpose(wh, (2, 3, 4, 1, 0)).reshape(n_d * hs * hs, c_h, ncls)
    wls = jnp.transpose(ws, (2, 3, 1, 0)).reshape(hs * hs, c_s, ncls)
    pad = npad - ncls
    wlh = jnp.pad(wlh, ((0, 0), (0, 0), (0, pad)))
    wls = jnp.pad(wls, ((0, 0), (0, 0), (0, pad)))
    blp = jnp.pad(bl, (0, pad)).reshape(1, npad)
    return (wlh.astype(jnp.float32), wls.astype(jnp.float32), blp.astype(jnp.float32))


def prepare_kernel_params(params):
    layers = []
    for p in params["layers"]:
        wh, sh = _prep_conv3d(p["hsi_conv"])
        ws, ss = _prep_conv2d(p["sar_conv"])
        layers.append({"wh": wh, "sh": sh, "ws": ws, "ss": ss})
    wlh, wls, blp = _prep_linear(params["fusion_w"], params["fusion_b"],
                                 params["cha_h"], params["final_pca"],
                                 params["cha_x"], params["final_img"], LINEAR_PAD)
    return {"layers": layers, "wlh": wlh, "wls": wls, "bl": blp}


# ----------------------------- Forward (Net) --------------------------------

def net_forward(kp, hsi, sar, *, num_classes):
    # hsi: (B, 1, D, H, W) NCDHW ; sar: (B, C, H, W) NCHW (PyTorch layouts).
    batch = hsi.shape[0]
    x_h = jnp.transpose(hsi, (0, 2, 3, 4, 1)).astype(jnp.bfloat16)  # channels-last
    x_s = jnp.transpose(sar, (0, 2, 3, 1)).astype(jnp.bfloat16)

    n_layers = len(kp["layers"])
    c_h = x_h.shape[-1]
    yh = ys = out_pad = None
    do = ho = wo = c_s = None
    for i, lay in enumerate(kp["layers"]):
        is_last = i == n_layers - 1
        kd = lay["wh"].shape[0] // (9 * c_h)          # hsi depth-kernel of this layer
        ph, (do, ho, wo) = extract_patches_3d(x_h, kd, 3, 3, batch_major=not is_last)
        ps, _ = extract_patches_2d(x_s, 3, 3, batch_major=not is_last)
        c_h = lay["wh"].shape[1]
        c_s = lay["ws"].shape[1]
        if not is_last:
            yh, ys = conv_pair_call(ph, lay["wh"], lay["sh"],
                                    ps, lay["ws"], lay["ss"])
            # TODO(synk): MSBlock (MBh, MBx), SpecMambaBlock (SpBh) and FSSBlock were
            # not provided in the reference source; applied as shape-preserving identity.
            x_h = yh.reshape(batch, do, ho, wo, c_h)
            x_s = ys.reshape(batch, ho, wo, c_s)
        else:
            yh, ys, out_pad = conv_pair_fusion_call(
                ph, lay["wh"], lay["sh"], ps, lay["ws"], lay["ss"],
                kp["wlh"], kp["wls"], kp["bl"], batch)

    # Restore PyTorch NCHW ordering exactly once, for the returned fused feature map.
    # Last-layer conv rows are ordered (spatial..., batch).
    hsi_part = yh.reshape(do, ho, wo, batch, c_h)                  # (N, H, W, B, C)
    hsi_part = hsi_part.transpose(3, 4, 0, 1, 2).reshape(batch, c_h * do, ho, wo)
    sar_part = ys.reshape(ho, wo, batch, c_s).transpose(2, 3, 0, 1)
    fusion_feat_m = jnp.concatenate((hsi_part, sar_part), axis=1)  # (B, C*N + Cs, H, W)
    output_fusion = out_pad[:, :num_classes]
    return fusion_feat_m, output_fusion


# ----------------------------- Main ------------------------------------------

if __name__ == "__main__":
    # Synthetic "dataset_info.yaml" entry (small shapes).
    cfg = {
        "num_classes": 7,
        "d_state": 8,          # unused: Mamba blocks are identity placeholders
        "window_size": 8,
        "expand": 1,           # unused
        "pca_num": 16,
        "slar_channel_num": 4,
        "num_layer": 2,
    }

    pg = ParamGen(seed=0)
    params = build_net_params(cfg, pg)
    kparams = prepare_kernel_params(params)

    key = jax.random.PRNGKey(0)
    k1, k2 = jax.random.split(key)
    # hsi: (B, 1, pca_num, window, window) NCDHW ; sar: (B, sar_channels, window, window) NCHW
    hsi = jax.random.normal(
        k1, (2, 1, cfg["pca_num"], cfg["window_size"], cfg["window_size"]),
        dtype=jnp.float32)
    sar = jax.random.normal(
        k2, (2, cfg["slar_channel_num"], cfg["window_size"], cfg["window_size"]),
        dtype=jnp.float32)

    forward = jax.jit(functools.partial(net_forward, num_classes=cfg["num_classes"]))
    fusion_feat_m, output_fusion = forward(kparams, hsi, sar)
    jax.block_until_ready((fusion_feat_m, output_fusion))

    # Shape sanity checks (2 layers: pca 16 -> 8 -> 2, spatial 8 -> 6 -> 4)
    assert fusion_feat_m.shape == (2, 128 + 16 * 2, 4, 4), fusion_feat_m.shape
    assert output_fusion.shape == (2, cfg["num_classes"]), output_fusion.shape

    print("KERNEL_OK")
</pallas_src>

<mosaic_0001>
module attributes {stable_mosaic.version = 11 : i64} {
  func.func @_conv_pair_kernel(%arg0: memref<576x81xbf16, #tpu.memory_space<vmem>>, %arg1: memref<81x8xbf16, #tpu.memory_space<vmem>>, %arg2: memref<1x8xf32, #tpu.memory_space<vmem>>, %arg3: memref<72x36xbf16, #tpu.memory_space<vmem>>, %arg4: memref<36x64xbf16, #tpu.memory_space<vmem>>, %arg5: memref<1x64xf32, #tpu.memory_space<vmem>>, %arg6: memref<576x8xbf16, #tpu.memory_space<vmem>>, %arg7: memref<72x64xbf16, #tpu.memory_space<vmem>>) attributes {dimension_semantics = [], scalar_prefetch = 0 : i64, scratch_operands = 0 : i64, tpu.core_type = #tpu.core_type<tc>} {
    %c0 = arith.constant 0 : index
    %c0_0 = arith.constant 0 : index
    %0 = vector.load %arg0[%c0, %c0_0] : memref<576x81xbf16, #tpu.memory_space<vmem>>, vector<576x81xbf16>
    %c0_1 = arith.constant 0 : index
    %c0_2 = arith.constant 0 : index
    %1 = vector.load %arg1[%c0_1, %c0_2] : memref<81x8xbf16, #tpu.memory_space<vmem>>, vector<81x8xbf16>
    %cst = arith.constant dense<0.000000e+00> : vector<576x8xf32>
    %2 = tpu.matmul %0, %1, %cst {dimension_numbers = #tpu.dot_dimension_numbers<[1], [0], [0], [1], [0, 0, 1, 1], [], []>} : vector<576x81xbf16>, vector<81x8xbf16>, vector<576x8xf32> -> vector<576x8xf32>
    %c0_3 = arith.constant 0 : index
    %c0_4 = arith.constant 0 : index
    %3 = vector.load %arg2[%c0_3, %c0_4] : memref<1x8xf32, #tpu.memory_space<vmem>>, vector<1x8xf32>
    %4 = vector.broadcast %3 : vector<1x8xf32> to vector<576x8xf32>
    %5 = arith.addf %2, %4 : vector<576x8xf32>
    %cst_5 = arith.constant 0.000000e+00 : f32
    %6 = vector.broadcast %cst_5 : f32 to vector<576x8xf32>
    %7 = arith.maximumf %5, %6 : vector<576x8xf32>
    %8 = arith.truncf %7 : vector<576x8xf32> to vector<576x8xbf16>
    %c0_6 = arith.constant 0 : index
    %c0_7 = arith.constant 0 : index
    %9 = vector.load %arg6[%c0_6, %c0_7] : memref<576x8xbf16, #tpu.memory_space<vmem>>, vector<576x8xbf16>
    tpu.vector_store %arg6[%c0_6, %c0_7], %8 {strides = array<i32>} : memref<576x8xbf16, #tpu.memory_space<vmem>>, vector<576x8xbf16>,
    %c0_8 = arith.constant 0 : index
    %c0_9 = arith.constant 0 : index
    %10 = vector.load %arg3[%c0_8, %c0_9] : memref<72x36xbf16, #tpu.memory_space<vmem>>, vector<72x36xbf16>
    %c0_10 = arith.constant 0 : index
    %c0_11 = arith.constant 0 : index
    %11 = vector.load %arg4[%c0_10, %c0_11] : memref<36x64xbf16, #tpu.memory_space<vmem>>, vector<36x64xbf16>
    %cst_12 = arith.constant dense<0.000000e+00> : vector<72x64xf32>
    %12 = tpu.matmul %10, %11, %cst_12 {dimension_numbers = #tpu.dot_dimension_numbers<[1], [0], [0], [1], [0, 0, 1, 1], [], []>} : vector<72x36xbf16>, vector<36x64xbf16>, vector<72x64xf32> -> vector<72x64xf32>
    %c0_13 = arith.constant 0 : index
    %c0_14 = arith.constant 0 : index
    %13 = vector.load %arg5[%c0_13, %c0_14] : memref<1x64xf32, #tpu.memory_space<vmem>>, vector<1x64xf32>
    %14 = vector.broadcast %13 : vector<1x64xf32> to vector<72x64xf32>
    %15 = arith.addf %12, %14 : vector<72x64xf32>
    %cst_15 = arith.constant 0.000000e+00 : f32
    %16 = vector.broadcast %cst_15 : f32 to vector<72x64xf32>
    %17 = arith.maximumf %15, %16 : vector<72x64xf32>
    %18 = arith.truncf %17 : vector<72x64xf32> to vector<72x64xbf16>
    %c0_16 = arith.constant 0 : index
    %c0_17 = arith.constant 0 : index
    %19 = vector.load %arg7[%c0_16, %c0_17] : memref<72x64xbf16, #tpu.memory_space<vmem>>, vector<72x64xbf16>
    tpu.vector_store %arg7[%c0_16, %c0_17], %18 {strides = array<i32>} : memref<72x64xbf16, #tpu.memory_space<vmem>>, vector<72x64xbf16>,
    return
  }
}

module attributes {stable_mosaic.version = 11 : i64} {
  func.func @_conv_pair_fusion_kernel(%arg0: memref<64x504xbf16, #tpu.memory_space<vmem>>, %arg1: memref<504x16xbf16, #tpu.memory_space<vmem>>, %arg2: memref<1x16xf32, #tpu.memory_space<vmem>>, %arg3: memref<32x576xbf16, #tpu.memory_space<vmem>>, %arg4: memref<576x128xbf16, #tpu.memory_space<vmem>>, %arg5: memref<1x128xf32, #tpu.memory_space<vmem>>, %arg6: memref<32x16x8xf32, #tpu.memory_space<vmem>>, %arg7: memref<16x128x8xf32, #tpu.memory_space<vmem>>, %arg8: memref<1x8xf32, #tpu.memory_space<vmem>>, %arg9: memref<64x16xf32, #tpu.memory_space<vmem>>, %arg10: memref<32x128xf32, #tpu.memory_space<vmem>>, %arg11: memref<2x8xf32, #tpu.memory_space<vmem>>) attributes {dimension_semantics = [], scalar_prefetch = 0 : i64, scratch_operands = 0 : i64, tpu.core_type = #tpu.core_type<tc>} {
    %c0 = arith.constant 0 : index
    %c0_0 = arith.constant 0 : index
    %0 = vector.load %arg0[%c0, %c0_0] : memref<64x504xbf16, #tpu.memory_space<vmem>>, vector<64x504xbf16>
    %c0_1 = arith.constant 0 : index
    %c0_2 = arith.constant 0 : index
    %1 = vector.load %arg1[%c0_1, %c0_2] : memref<504x16xbf16, #tpu.memory_space<vmem>>, vector<504x16xbf16>
    %cst = arith.constant dense<0.000000e+00> : vector<64x16xf32>
    %2 = tpu.matmul %0, %1, %cst {dimension_numbers = #tpu.dot_dimension_numbers<[1], [0], [0], [1], [0, 0, 1, 1], [], []>} : vector<64x504xbf16>, vector<504x16xbf16>, vector<64x16xf32> -> vector<64x16xf32>
    %c0_3 = arith.constant 0 : index
    %c0_4 = arith.constant 0 : index
    %3 = vector.load %arg2[%c0_3, %c0_4] : memref<1x16xf32, #tpu.memory_space<vmem>>, vector<1x16xf32>
    %4 = vector.broadcast %3 : vector<1x16xf32> to vector<64x16xf32>
    %5 = arith.addf %2, %4 : vector<64x16xf32>
    %cst_5 = arith.constant 0.000000e+00 : f32
    %6 = vector.broadcast %cst_5 : f32 to vector<64x16xf32>
    %7 = arith.maximumf %5, %6 : vector<64x16xf32>
    %c0_6 = arith.constant 0 : index
    %c0_7 = arith.constant 0 : index
    %8 = vector.load %arg9[%c0_6, %c0_7] : memref<64x16xf32, #tpu.memory_space<vmem>>, vector<64x16xf32>
    tpu.vector_store %arg9[%c0_6, %c0_7], %7 {strides = array<i32>} : memref<64x16xf32, #tpu.memory_space<vmem>>, vector<64x16xf32>,
    %c0_8 = arith.constant 0 : index
    %c0_9 = arith.constant 0 : index
    %9 = vector.load %arg3[%c0_8, %c0_9] : memref<32x576xbf16, #tpu.memory_space<vmem>>, vector<32x576xbf16>
    %c0_10 = arith.constant 0 : index
    %c0_11 = arith.constant 0 : index
    %10 = vector.load %arg4[%c0_10, %c0_11] : memref<576x128xbf16, #tpu.memory_space<vmem>>, vector<576x128xbf16>
    %cst_12 = arith.constant dense<0.000000e+00> : vector<32x128xf32>
    %11 = tpu.matmul %9, %10, %cst_12 {dimension_numbers = #tpu.dot_dimension_numbers<[1], [0], [0], [1], [0, 0, 1, 1], [], []>} : vector<32x576xbf16>, vector<576x128xbf16>, vector<32x128xf32> -> vector<32x128xf32>
    %c0_13 = arith.constant 0 : index
    %c0_14 = arith.constant 0 : index
    %12 = vector.load %arg5[%c0_13, %c0_14] : memref<1x128xf32, #tpu.memory_space<vmem>>, vector<1x128xf32>
    %13 = vector.broadcast %12 : vector<1x128xf32> to vector<32x128xf32>
    %14 = arith.addf %11, %13 : vector<32x128xf32>
    %cst_15 = arith.constant 0.000000e+00 : f32
    %15 = vector.broadcast %cst_15 : f32 to vector<32x128xf32>
    %16 = arith.maximumf %14, %15 : vector<32x128xf32>
    %c0_16 = arith.constant 0 : index
    %c0_17 = arith.constant 0 : index
    %17 = vector.load %arg10[%c0_16, %c0_17] : memref<32x128xf32, #tpu.memory_space<vmem>>, vector<32x128xf32>
    tpu.vector_store %arg10[%c0_16, %c0_17], %16 {strides = array<i32>} : memref<32x128xf32, #tpu.memory_space<vmem>>, vector<32x128xf32>,
    %cst_18 = arith.constant 0.000000e+00 : f32
    %18 = vector.broadcast %cst_18 : f32 to vector<2x8xf32>
    %c0_19 = arith.constant 0 : index
    %c0_20 = arith.constant 0 : index
    %19 = vector.load %arg9[%c0_19, %c0_20] : memref<64x16xf32, #tpu.memory_space<vmem>>, vector<2x16xf32>
    %c0_21 = arith.constant 0 : index
    %c0_22 = arith.constant 0 : index
    %c0_23 = arith.constant 0 : index
    %20 = vector.load %arg6[%c0_21, %c0_22, %c0_23] : memref<32x16x8xf32, #tpu.memory_space<vmem>>, vector<1x16x8xf32>
    %21 = vector.shape_cast %20 : vector<1x16x8xf32> to vector<16x8xf32>
    %cst_24 = arith.constant dense<0.000000e+00> : vector<2x8xf32>
    %22 = tpu.matmul %19, %21, %cst_24 {dimension_numbers = #tpu.dot_dimension_numbers<[1], [0], [0], [1], [0, 0, 1, 1], [], []>} : vector<2x16xf32>, vector<16x8xf32>, vector<2x8xf32> -> vector<2x8xf32>
    %23 = arith.addf %18, %22 : vector<2x8xf32>
    %c2 = arith.constant 2 : index
    %c0_25 = arith.constant 0 : index
    %24 = vector.load %arg9[%c2, %c0_25] : memref<64x16xf32, #tpu.memory_space<vmem>>, vector<2x16xf32>
    %c1 = arith.constant 1 : index
    %c0_26 = arith.constant 0 : index
    %c0_27 = arith.constant 0 : index
    %25 = vector.load %arg6[%c1, %c0_26, %c0_27] : memref<32x16x8xf32, #tpu.memory_space<vmem>>, vector<1x16x8xf32>
    %26 = vector.shape_cast %25 : vector<1x16x8xf32> to vector<16x8xf32>
    %cst_28 = arith.constant dense<0.000000e+00> : vector<2x8xf32>
    %27 = tpu.matmul %24, %26, %cst_28 {dimension_numbers = #tpu.dot_dimension_numbers<[1], [0], [0], [1], [0, 0, 1, 1], [], []>} : vector<2x16xf32>, vector<16x8xf32>, vector<2x8xf32> -> vector<2x8xf32>
    %28 = arith.addf %23, %27 : vector<2x8xf32>
    %c4 = arith.constant 4 : index
    %c0_29 = arith.constant 0 : index
    %29 = vector.load %arg9[%c4, %c0_29] : memref<64x16xf32, #tpu.memory_space<vmem>>, vector<2x16xf32>
    %c2_30 = arith.constant 2 : index
    %c0_31 = arith.constant 0 : index
    %c0_32 = arith.constant 0 : index
    %30 = vector.load %arg6[%c2_30, %c0_31, %c0_32] : memref<32x16x8xf32, #tpu.memory_space<vmem>>, vector<1x16x8xf32>
    %31 = vector.shape_cast %30 : vector<1x16x8xf32> to vector<16x8xf32>
    %cst_33 = arith.constant dense<0.000000e+00> : vector<2x8xf32>
    %32 = tpu.matmul %29, %31, %cst_33 {dimension_numbers = #tpu.dot_dimension_numbers<[1], [0], [0], [1], [0, 0, 1, 1], [], []>} : vector<2x16xf32>, vector<16x8xf32>, vector<2x8xf32> -> vector<2x8xf32>
    %33 = arith.addf %28, %32 : vector<2x8xf32>
    %c6 = arith.constant 6 : index
    %c0_34 = arith.constant 0 : index
    %34 = vector.load %arg9[%c6, %c0_34] : memref<64x16xf32, #tpu.memory_space<vmem>>, vector<2x16xf32>
    %c3 = arith.constant 3 : index
    %c0_35 = arith.constant 0 : index
    %c0_36 = arith.constant 0 : index
    %35 = vector.load %arg6[%c3, %c0_35, %c0_36] : memref<32x16x8xf32, #tpu.memory_space<vmem>>, vector<1x16x8xf32>
    %36 = vector.shape_cast %35 : vector<1x16x8xf32> to vector<16x8xf32>
    %cst_37 = arith.constant dense<0.000000e+00> : vector<2x8xf32>
    %37 = tpu.matmul %34, %36, %cst_37 {dimension_numbers = #tpu.dot_dimension_numbers<[1], [0], [0], [1], [0, 0, 1, 1], [], []>} : vector<2x16xf32>, vector<16x8xf32>, vector<2x8xf32> -> vector<2x8xf32>
    %38 = arith.addf %33, %37 : vector<2x8xf32>
    %c8 = arith.constant 8 : index
    %c0_38 = arith.constant 0 : index
    %39 = vector.load %arg9[%c8, %c0_38] : memref<64x16xf32, #tpu.memory_space<vmem>>, vector<2x16xf32>
    %c4_39 = arith.constant 4 : index
    %c0_40 = arith.constant 0 : index
    %c0_41 = arith.constant 0 : index
    %40 = vector.load %arg6[%c4_39, %c0_40, %c0_41] : memref<32x16x8xf32, #tpu.memory_space<vmem>>, vector<1x16x8xf32>
    %41 = vector.shape_cast %40 : vector<1x16x8xf32> to vector<16x8xf32>
    %cst_42 = arith.constant dense<0.000000e+00> : vector<2x8xf32>
    %42 = tpu.matmul %39, %41, %cst_42 {dimension_numbers = #tpu.dot_dimension_numbers<[1], [0], [0], [1], [0, 0, 1, 1], [], []>} : vector<2x16xf32>, vector<16x8xf32>, vector<2x8xf32> -> vector<2x8xf32>
    %43 = arith.addf %38, %42 : vector<2x8xf32>
    %c10 = arith.constant 10 : index
    %c0_43 = arith.constant 0 : index
    %44 = vector.load %arg9[%c10, %c0_43] : memref<64x16xf32, #tpu.memory_space<vmem>>, vector<2x16xf32>
    %c5 = arith.constant 5 : index
    %c0_44 = arith.constant 0 : index
    %c0_45 = arith.constant 0 : index
    %45 = vector.load %arg6[%c5, %c0_44, %c0_45] : memref<32x16x8xf32, #tpu.memory_space<vmem>>, vector<1x16x8xf32>
    %46 = vector.shape_cast %45 : vector<1x16x8xf32> to vector<16x8xf32>
    %cst_46 = arith.constant dense<0.000000e+00> : vector<2x8xf32>
    %47 = tpu.matmul %44, %46, %cst_46 {dimension_numbers = #tpu.dot_dimension_numbers<[1], [0], [0], [1], [0, 0, 1, 1], [], []>} : vector<2x16xf32>, vector<16x8xf32>, vector<2x8xf32> -> vector<2x8xf32>
    %48 = arith.addf %43, %47 : vector<2x8xf32>
    %c12 = arith.constant 12 : index
    %c0_47 = arith.constant 0 : index
    %49 = vector.load %arg9[%c12, %c0_47] : memref<64x16xf32, #tpu.memory_space<vmem>>, vector<2x16xf32>
    %c6_48 = arith.constant 6 : index
    %c0_49 = arith.constant 0 : index
    %c0_50 = arith.constant 0 : index
    %50 = vector.load %arg6[%c6_48, %c0_49, %c0_50] : memref<32x16x8xf32, #tpu.memory_space<vmem>>, vector<1x16x8xf32>
    %51 = vector.shape_cast %50 : vector<1x16x8xf32> to vector<16x8xf32>
    %cst_51 = arith.constant dense<0.000000e+00> : vector<2x8xf32>
    %52 = tpu.matmul %49, %51, %cst_51 {dimension_numbers = #tpu.dot_dimension_numbers<[1], [0], [0], [1], [0, 0, 1, 1], [], []>} : vector<2x16xf32>, vector<16x8xf32>, vector<2x8xf32> -> vector<2x8xf32>
    %53 = arith.addf %48, %52 : vector<2x8xf32>
    %c14 = arith.constant 14 : index
    %c0_52 = arith.constant 0 : index
    %54 = vector.load %arg9[%c14, %c0_52] : memref<64x16xf32, #tpu.memory_space<vmem>>, vector<2x16xf32>
    %c7 = arith.constant 7 : index
    %c0_53 = arith.constant 0 : index
    %c0_54 = arith.constant 0 : index
    %55 = vector.load %arg6[%c7, %c0_53, %c0_54] : memref<32x16x8xf32, #tpu.memory_space<vmem>>, vector<1x16x8xf32>
    %56 = vector.shape_cast %55 : vector<1x16x8xf32> to vector<16x8xf32>
    %cst_55 = arith.constant dense<0.000000e+00> : vector<2x8xf32>
    %57 = tpu.matmul %54, %56, %cst_55 {dimension_numbers = #tpu.dot_dimension_numbers<[1], [0], [0], [1], [0, 0, 1, 1], [], []>} : vector<2x16xf32>, vector<16x8xf32>, vector<2x8xf32> -> vector<2x8xf32>
    %58 = arith.addf %53, %57 : vector<2x8xf32>
    %c16 = arith.constant 16 : index
    %c0_56 = arith.constant 0 : index
    %59 = vector.load %arg9[%c16, %c0_56] : memref<64x16xf32, #tpu.memory_space<vmem>>, vector<2x16xf32>
    %c8_57 = arith.constant 8 : index
    %c0_58 = arith.constant 0 : index
    %c0_59 = arith.constant 0 : index
    %60 = vector.load %arg6[%c8_57, %c0_58, %c0_59] : memref<32x16x8xf32, #tpu.memory_space<vmem>>, vector<1x16x8xf32>
    %61 = vector.shape_cast %60 : vector<1x16x8xf32> to vector<16x8xf32>
    %cst_60 = arith.constant dense<0.000000e+00> : vector<2x8xf32>
    %62 = tpu.matmul %59, %61, %cst_60 {dimension_numbers = #tpu.dot_dimension_numbers<[1], [0], [0], [1], [0, 0, 1, 1], [], []>} : vector<2x16xf32>, vector<16x8xf32>, vector<2x8xf32> -> vector<2x8xf32>
    %63 = arith.addf %58, %62 : vector<2x8xf32>
    %c18 = arith.constant 18 : index
    %c0_61 = arith.constant 0 : index
    %64 = vector.load %arg9[%c18, %c0_61] : memref<64x16xf32, #tpu.memory_space<vmem>>, vector<2x16xf32>
    %c9 = arith.constant 9 : index
    %c0_62 = arith.constant 0 : index
    %c0_63 = arith.constant 0 : index
    %65 = vector.load %arg6[%c9, %c0_62, %c0_63] : memref<32x16x8xf32, #tpu.memory_space<vmem>>, vector<1x16x8xf32>
    %66 = vector.shape_cast %65 : vector<1x16x8xf32> to vector<16x8xf32>
    %cst_64 = arith.constant dense<0.000000e+00> : vector<2x8xf32>
    %67 = tpu.matmul %64, %66, %cst_64 {dimension_numbers = #tpu.dot_dimension_numbers<[1], [0], [0], [1], [0, 0, 1, 1], [], []>} : vector<2x16xf32>, vector<16x8xf32>, vector<2x8xf32> -> vector<2x8xf32>
    %68 = arith.addf %63, %67 : vector<2x8xf32>
    %c20 = arith.constant 20 : index
    %c0_65 = arith.constant 0 : index
    %69 = vector.load %arg9[%c20, %c0_65] : memref<64x16xf32, #tpu.memory_space<vmem>>, vector<2x16xf32>
    %c10_66 = arith.constant 10 : index
    %c0_67 = arith.constant 0 : index
    %c0_68 = arith.constant 0 : index
    %70 = vector.load %arg6[%c10_66, %c0_67, %c0_68] : memref<32x16x8xf32, #tpu.memory_space<vmem>>, vector<1x16x8xf32>
    %71 = vector.shape_cast %70 : vector<1x16x8xf32> to vector<16x8xf32>
    %cst_69 = arith.constant dense<0.000000e+00> : vector<2x8xf32>
    %72 = tpu.matmul %69, %71, %cst_69 {dimension_numbers = #tpu.dot_dimension_numbers<[1], [0], [0], [1], [0, 0, 1, 1], [], []>} : vector<2x16xf32>, vector<16x8xf32>, vector<2x8xf32> -> vector<2x8xf32>
    %73 = arith.addf %68, %72 : vector<2x8xf32>
    %c22 = arith.constant 22 : index
    %c0_70 = arith.constant 0 : index
    %74 = vector.load %arg9[%c22, %c0_70] : memref<64x16xf32, #tpu.memory_space<vmem>>, vector<2x16xf32>
    %c11 = arith.constant 11 : index
    %c0_71 = arith.constant 0 : index
    %c0_72 = arith.constant 0 : index
    %75 = vector.load %arg6[%c11, %c0_71, %c0_72] : memref<32x16x8xf32, #tpu.memory_space<vmem>>, vector<1x16x8xf32>
    %76 = vector.shape_cast %75 : vector<1x16x8xf32> to vector<16x8xf32>
    %cst_73 = arith.constant dense<0.000000e+00> : vector<2x8xf32>
    %77 = tpu.matmul %74, %76, %cst_73 {dimension_numbers = #tpu.dot_dimension_numbers<[1], [0], [0], [1], [0, 0, 1, 1], [], []>} : vector<2x16xf32>, vector<16x8xf32>, vector<2x8xf32> -> vector<2x8xf32>
    %78 = arith.addf %73, %77 : vector<2x8xf32>
    %c24 = arith.constant 24 : index
    %c0_74 = arith.constant 0 : index
    %79 = vector.load %arg9[%c24, %c0_74] : memref<64x16xf32, #tpu.memory_space<vmem>>, vector<2x16xf32>
    %c12_75 = arith.constant 12 : index
    %c0_76 = arith.constant 0 : index
    %c0_77 = arith.constant 0 : index
    %80 = vector.load %arg6[%c12_75, %c0_76, %c0_77] : memref<32x16x8xf32, #tpu.memory_space<vmem>>, vector<1x16x8xf32>
    %81 = vector.shape_cast %80 : vector<1x16x8xf32> to vector<16x8xf32>
    %cst_78 = arith.constant dense<0.000000e+00> : vector<2x8xf32>
    %82 = tpu.matmul %79, %81, %cst_78 {dimension_numbers = #tpu.dot_dimension_numbers<[1], [0], [0], [1], [0, 0, 1, 1], [], []>} : vector<2x16xf32>, vector<16x8xf32>, vector<2x8xf32> -> vector<2x8xf32>
    %83 = arith.addf %78, %82 : vector<2x8xf32>
    %c26 = arith.constant 26 : index
    %c0_79 = arith.constant 0 : index
    %84 = vector.load %arg9[%c26, %c0_79] : memref<64x16xf32, #tpu.memory_space<vmem>>, vector<2x16xf32>
    %c13 = arith.constant 13 : index
    %c0_80 = arith.constant 0 : index
    %c0_81 = arith.constant 0 : index
    %85 = vector.load %arg6[%c13, %c0_80, %c0_81] : memref<32x16x8xf32, #tpu.memory_space<vmem>>, vector<1x16x8xf32>
    %86 = vector.shape_cast %85 : vector<1x16x8xf32> to vector<16x8xf32>
    %cst_82 = arith.constant dense<0.000000e+00> : vector<2x8xf32>
    %87 = tpu.matmul %84, %86, %cst_82 {dimension_numbers = #tpu.dot_dimension_numbers<[1], [0], [0], [1], [0, 0, 1, 1], [], []>} : vector<2x16xf32>, vector<16x8xf32>, vector<2x8xf32> -> vector<2x8xf32>
    %88 = arith.addf %83, %87 : vector<2x8xf32>
    %c28 = arith.constant 28 : index
    %c0_83 = arith.constant 0 : index
    %89 = vector.load %arg9[%c28, %c0_83] : memref<64x16xf32, #tpu.memory_space<vmem>>, vector<2x16xf32>
    %c14_84 = arith.constant 14 : index
    %c0_85 = arith.constant 0 : index
    %c0_86 = arith.constant 0 : index
    %90 = vector.load %arg6[%c14_84, %c0_85, %c0_86] : memref<32x16x8xf32, #tpu.memory_space<vmem>>, vector<1x16x8xf32>
    %91 = vector.shape_cast %90 : vector<1x16x8xf32> to vector<16x8xf32>
    %cst_87 = arith.constant dense<0.000000e+00> : vector<2x8xf32>
    %92 = tpu.matmul %89, %91, %cst_87 {dimension_numbers = #tpu.dot_dimension_numbers<[1], [0], [0], [1], [0, 0, 1, 1], [], []>} : vector<2x16xf32>, vector<16x8xf32>, vector<2x8xf32> -> vector<2x8xf32>
    %93 = arith.addf %88, %92 : vector<2x8xf32>
    %c30 = arith.constant 30 : index
    %c0_88 = arith.constant 0 : index
    %94 = vector.load %arg9[%c30, %c0_88] : memref<64x16xf32, #tpu.memory_space<vmem>>, vector<2x16xf32>
    %c15 = arith.constant 15 : index
    %c0_89 = arith.constant 0 : index
    %c0_90 = arith.constant 0 : index
    %95 = vector.load %arg6[%c15, %c0_89, %c0_90] : memref<32x16x8xf32, #tpu.memory_space<vmem>>, vector<1x16x8xf32>
    %96 = vector.shape_cast %95 : vector<1x16x8xf32> to vector<16x8xf32>
    %cst_91 = arith.constant dense<0.000000e+00> : vector<2x8xf32>
    %97 = tpu.matmul %94, %96, %cst_91 {dimension_numbers = #tpu.dot_dimension_numbers<[1], [0], [0], [1], [0, 0, 1, 1], [], []>} : vector<2x16xf32>, vector<16x8xf32>, vector<2x8xf32> -> vector<2x8xf32>
    %98 = arith.addf %93, %97 : vector<2x8xf32>
    %c32 = arith.constant 32 : index
    %c0_92 = arith.constant 0 : index
    %99 = vector.load %arg9[%c32, %c0_92] : memref<64x16xf32, #tpu.memory_space<vmem>>, vector<2x16xf32>
    %c16_93 = arith.constant 16 : index
    %c0_94 = arith.constant 0 : index
    %c0_95 = arith.constant 0 : index
    %100 = vector.load %arg6[%c16_93, %c0_94, %c0_95] : memref<32x16x8xf32, #tpu.memory_space<vmem>>, vector<1x16x8xf32>
    %101 = vector.shape_cast %100 : vector<1x16x8xf32> to vector<16x8xf32>
    %cst_96 = arith.constant dense<0.000000e+00> : vector<2x8xf32>
    %102 = tpu.matmul %99, %101, %cst_96 {dimension_numbers = #tpu.dot_dimension_numbers<[1], [0], [0], [1], [0, 0, 1, 1], [], []>} : vector<2x16xf32>, vector<16x8xf32>, vector<2x8xf32> -> vector<2x8xf32>
    %103 = arith.addf %98, %102 : vector<2x8xf32>
    %c34 = arith.constant 34 : index
    %c0_97 = arith.constant 0 : index
    %104 = vector.load %arg9[%c34, %c0_97] : memref<64x16xf32, #tpu.memory_space<vmem>>, vector<2x16xf32>
    %c17 = arith.constant 17 : index
    %c0_98 = arith.constant 0 : index
    %c0_99 = arith.constant 0 : index
    %105 = vector.load %arg6[%c17, %c0_98, %c0_99] : memref<32x16x8xf32, #tpu.memory_space<vmem>>, vector<1x16x8xf32>
    %106 = vector.shape_cast %105 : vector<1x16x8xf32> to vector<16x8xf32>
    %cst_100 = arith.constant dense<0.000000e+00> : vector<2x8xf32>
    %107 = tpu.matmul %104, %106, %cst_100 {dimension_numbers = #tpu.dot_dimension_numbers<[1], [0], [0], [1], [0, 0, 1, 1], [], []>} : vector<2x16xf32>, vector<16x8xf32>, vector<2x8xf32> -> vector<2x8xf32>
    %108 = arith.addf %103, %107 : vector<2x8xf32>
    %c36 = arith.constant 36 : index
    %c0_101 = arith.constant 0 : index
    %109 = vector.load %arg9[%c36, %c0_101] : memref<64x16xf32, #tpu.memory_space<vmem>>, vector<2x16xf32>
    %c18_102 = arith.constant 18 : index
    %c0_103 = arith.constant 0 : index
    %c0_104 = arith.constant 0 : index
    %110 = vector.load %arg6[%c18_102, %c0_103, %c0_104] : memref<32x16x8xf32, #tpu.memory_space<vmem>>, vector<1x16x8xf32>
    %111 = vector.shape_cast %110 : vector<1x16x8xf32> to vector<16x8xf32>
    %cst_105 = arith.constant dense<0.000000e+00> : vector<2x8xf32>
    %112 = tpu.matmul %109, %111, %cst_105 {dimension_numbers = #tpu.dot_dimension_numbers<[1], [0], [0], [1], [0, 0, 1, 1], [], []>} : vector<2x16xf32>, vector<16x8xf32>, vector<2x8xf32> -> vector<2x8xf32>
    %113 = arith.addf %108, %112 : vector<2x8xf32>
    %c38 = arith.constant 38 : index
    %c0_106 = arith.constant 0 : index
    %114 = vector.load %arg9[%c38, %c0_106] : memref<64x16xf32, #tpu.memory_space<vmem>>, vector<2x16xf32>
    %c19 = arith.constant 19 : index
    %c0_107 = arith.constant 0 : index
    %c0_108 = arith.constant 0 : index
    %115 = vector.load %arg6[%c19, %c0_107, %c0_108] : memref<32x16x8xf32, #tpu.memory_space<vmem>>, vector<1x16x8xf32>
    %116 = vector.shape_cast %115 : vector<1x16x8xf32> to vector<16x8xf32>
    %cst_109 = arith.constant dense<0.000000e+00> : vector<2x8xf32>
    %117 = tpu.matmul %114, %116, %cst_109 {dimension_numbers = #tpu.dot_dimension_numbers<[1], [0], [0], [1], [0, 0, 1, 1], [], []>} : vector<2x16xf32>, vector<16x8xf32>, vector<2x8xf32> -> vector<2x8xf32>
    %118 = arith.addf %113, %117 : vector<2x8xf32>
    %c40 = arith.constant 40 : index
    %c0_110 = arith.constant 0 : index
    %119 = vector.load %arg9[%c40, %c0_110] : memref<64x16xf32, #tpu.memory_space<vmem>>, vector<2x16xf32>
    %c20_111 = arith.constant 20 : index
    %c0_112 = arith.constant 0 : index
    %c0_113 = arith.constant 0 : index
    %120 = vector.load %arg6[%c20_111, %c0_112, %c0_113] : memref<32x16x8xf32, #tpu.memory_space<vmem>>, vector<1x16x8xf32>
    %121 = vector.shape_cast %120 : vector<1x16x8xf32> to vector<16x8xf32>
    %cst_114 = arith.constant dense<0.000000e+00> : vector<2x8xf32>
    %122 = tpu.matmul %119, %121, %cst_114 {dimension_numbers = #tpu.dot_dimension_numbers<[1], [0], [0], [1], [0, 0, 1, 1], [], []>} : vector<2x16xf32>, vector<16x8xf32>, vector<2x8xf32> -> vector<2x8xf32>
    %123 = arith.addf %118, %122 : vector<2x8xf32>
    %c42 = arith.constant 42 : index
    %c0_115 = arith.constant 0 : index
    %124 = vector.load %arg9[%c42, %c0_115] : memref<64x16xf32, #tpu.memory_space<vmem>>, vector<2x16xf32>
    %c21 = arith.constant 21 : index
    %c0_116 = arith.constant 0 : index
    %c0_117 = arith.constant 0 : index
    %125 = vector.load %arg6[%c21, %c0_116, %c0_117] : memref<32x16x8xf32, #tpu.memory_space<vmem>>, vector<1x16x8xf32>
    %126 = vector.shape_cast %125 : vector<1x16x8xf32> to vector<16x8xf32>
    %cst_118 = arith.constant dense<0.000000e+00> : vector<2x8xf32>
    %127 = tpu.matmul %124, %126, %cst_118 {dimension_numbers = #tpu.dot_dimension_numbers<[1], [0], [0], [1], [0, 0, 1, 1], [], []>} : vector<2x16xf32>, vector<16x8xf32>, vector<2x8xf32> -> vector<2x8xf32>
    %128 = arith.addf %123, %127 : vector<2x8xf32>
    %c44 = arith.constant 44 : index
    %c0_119 = arith.constant 0 : index
    %129 = vector.load %arg9[%c44, %c0_119] : memref<64x16xf32, #tpu.memory_space<vmem>>, vector<2x16xf32>
    %c22_120 = arith.constant 22 : index
    %c0_121 = arith.constant 0 : index
    %c0_122 = arith.constant 0 : index
    %130 = vector.load %arg6[%c22_120, %c0_121, %c0_122] : memref<32x16x8xf32, #tpu.memory_space<vmem>>, vector<1x16x8xf32>
    %131 = vector.shape_cast %130 : vector<1x16x8xf32> to vector<16x8xf32>
    %cst_123 = arith.constant dense<0.000000e+00> : vector<2x8xf32>
    %132 = tpu.matmul %129, %131, %cst_123 {dimension_numbers = #tpu.dot_dimension_numbers<[1], [0], [0], [1], [0, 0, 1, 1], [], []>} : vector<2x16xf32>, vector<16x8xf32>, vector<2x8xf32> -> vector<2x8xf32>
    %133 = arith.addf %128, %132 : vector<2x8xf32>
    %c46 = arith.constant 46 : index
    %c0_124 = arith.constant 0 : index
    %134 = vector.load %arg9[%c46, %c0_124] : memref<64x16xf32, #tpu.memory_space<vmem>>, vector<2x16xf32>
    %c23 = arith.constant 23 : index
    %c0_125 = arith.constant 0 : index
    %c0_126 = arith.constant 0 : index
    %135 = vector.load %arg6[%c23, %c0_125, %c0_126] : memref<32x16x8xf32, #tpu.memory_space<vmem>>, vector<1x16x8xf32>
    %136 = vector.shape_cast %135 : vector<1x16x8xf32> to vector<16x8xf32>
    %cst_127 = arith.constant dense<0.000000e+00> : vector<2x8xf32>
    %137 = tpu.matmul %134, %136, %cst_127 {dimension_numbers = #tpu.dot_dimension_numbers<[1], [0], [0], [1], [0, 0, 1, 1], [], []>} : vector<2x16xf32>, vector<16x8xf32>, vector<2x8xf32> -> vector<2x8xf32>
    %138 = arith.addf %133, %137 : vector<2x8xf32>
    %c48 = arith.constant 48 : index
    %c0_128 = arith.constant 0 : index
    %139 = vector.load %arg9[%c48, %c0_128] : memref<64x16xf32, #tpu.memory_space<vmem>>, vector<2x16xf32>
    %c24_129 = arith.constant 24 : index
    %c0_130 = arith.constant 0 : index
    %c0_131 = arith.constant 0 : index
    %140 = vector.load %arg6[%c24_129, %c0_130, %c0_131] : memref<32x16x8xf32, #tpu.memory_space<vmem>>, vector<1x16x8xf32>
    %141 = vector.shape_cast %140 : vector<1x16x8xf32> to vector<16x8xf32>
    %cst_132 = arith.constant dense<0.000000e+00> : vector<2x8xf32>
    %142 = tpu.matmul %139, %141, %cst_132 {dimension_numbers = #tpu.dot_dimension_numbers<[1], [0], [0], [1], [0, 0, 1, 1], [], []>} : vector<2x16xf32>, vector<16x8xf32>, vector<2x8xf32> -> vector<2x8xf32>
    %143 = arith.addf %138, %142 : vector<2x8xf32>
    %c50 = arith.constant 50 : index
    %c0_133 = arith.constant 0 : index
    %144 = vector.load %arg9[%c50, %c0_133] : memref<64x16xf32, #tpu.memory_space<vmem>>, vector<2x16xf32>
    %c25 = arith.constant 25 : index
    %c0_134 = arith.constant 0 : index
    %c0_135 = arith.constant 0 : index
    %145 = vector.load %arg6[%c25, %c0_134, %c0_135] : memref<32x16x8xf32, #tpu.memory_space<vmem>>, vector<1x16x8xf32>
    %146 = vector.shape_cast %145 : vector<1x16x8xf32> to vector<16x8xf32>
    %cst_136 = arith.constant dense<0.000000e+00> : vector<2x8xf32>
    %147 = tpu.matmul %144, %146, %cst_136 {dimension_numbers = #tpu.dot_dimension_numbers<[1], [0], [0], [1], [0, 0, 1, 1], [], []>} : vector<2x16xf32>, vector<16x8xf32>, vector<2x8xf32> -> vector<2x8xf32>
    %148 = arith.addf %143, %147 : vector<2x8xf32>
    %c52 = arith.constant 52 : index
    %c0_137 = arith.constant 0 : index
    %149 = vector.load %arg9[%c52, %c0_137] : memref<64x16xf32, #tpu.memory_space<vmem>>, vector<2x16xf32>
    %c26_138 = arith.constant 26 : index
    %c0_139 = arith.constant 0 : index
    %c0_140 = arith.constant 0 : index
    %150 = vector.load %arg6[%c26_138, %c0_139, %c0_140] : memref<32x16x8xf32, #tpu.memory_space<vmem>>, vector<1x16x8xf32>
    %151 = vector.shape_cast %150 : vector<1x16x8xf32> to vector<16x8xf32>
    %cst_141 = arith.constant dense<0.000000e+00> : vector<2x8xf32>
    %152 = tpu.matmul %149, %151, %cst_141 {dimension_numbers = #tpu.dot_dimension_numbers<[1], [0], [0], [1], [0, 0, 1, 1], [], []>} : vector<2x16xf32>, vector<16x8xf32>, vector<2x8xf32> -> vector<2x8xf32>
    %153 = arith.addf %148, %152 : vector<2x8xf32>
    %c54 = arith.constant 54 : index
    %c0_142 = arith.constant 0 : index
    %154 = vector.load %arg9[%c54, %c0_142] : memref<64x16xf32, #tpu.memory_space<vmem>>, vector<2x16xf32>
    %c27 = arith.constant 27 : index
    %c0_143 = arith.constant 0 : index
    %c0_144 = arith.constant 0 : index
    %155 = vector.load %arg6[%c27, %c0_143, %c0_144] : memref<32x16x8xf32, #tpu.memory_space<vmem>>, vector<1x16x8xf32>
    %156 = vector.shape_cast %155 : vector<1x16x8xf32> to vector<16x8xf32>
    %cst_145 = arith.constant dense<0.000000e+00> : vector<2x8xf32>
    %157 = tpu.matmul %154, %156, %cst_145 {dimension_numbers = #tpu.dot_dimension_numbers<[1], [0], [0], [1], [0, 0, 1, 1], [], []>} : vector<2x16xf32>, vector<16x8xf32>, vector<2x8xf32> -> vector<2x8xf32>
    %158 = arith.addf %153, %157 : vector<2x8xf32>
    %c56 = arith.constant 56 : index
    %c0_146 = arith.constant 0 : index
    %159 = vector.load %arg9[%c56, %c0_146] : memref<64x16xf32, #tpu.memory_space<vmem>>, vector<2x16xf32>
    %c28_147 = arith.constant 28 : index
    %c0_148 = arith.constant 0 : index
    %c0_149 = arith.constant 0 : index
    %160 = vector.load %arg6[%c28_147, %c0_148, %c0_149] : memref<32x16x8xf32, #tpu.memory_space<vmem>>, vector<1x16x8xf32>
    %161 = vector.shape_cast %160 : vector<1x16x8xf32> to vector<16x8xf32>
    %cst_150 = arith.constant dense<0.000000e+00> : vector<2x8xf32>
    %162 = tpu.matmul %159, %161, %cst_150 {dimension_numbers = #tpu.dot_dimension_numbers<[1], [0], [0], [1], [0, 0, 1, 1], [], []>} : vector<2x16xf32>, vector<16x8xf32>, vector<2x8xf32> -> vector<2x8xf32>
    %163 = arith.addf %158, %162 : vector<2x8xf32>
    %c58 = arith.constant 58 : index
    %c0_151 = arith.constant 0 : index
    %164 = vector.load %arg9[%c58, %c0_151] : memref<64x16xf32, #tpu.memory_space<vmem>>, vector<2x16xf32>
    %c29 = arith.constant 29 : index
    %c0_152 = arith.constant 0 : index
    %c0_153 = arith.constant 0 : index
    %165 = vector.load %arg6[%c29, %c0_152, %c0_153] : memref<32x16x8xf32, #tpu.memory_space<vmem>>, vector<1x16x8xf32>
    %166 = vector.shape_cast %165 : vector<1x16x8xf32> to vector<16x8xf32>
    %cst_154 = arith.constant dense<0.000000e+00> : vector<2x8xf32>
    %167 = tpu.matmul %164, %166, %cst_154 {dimension_numbers = #tpu.dot_dimension_numbers<[1], [0], [0], [1], [0, 0, 1, 1], [], []>} : vector<2x16xf32>, vector<16x8xf32>, vector<2x8xf32> -> vector<2x8xf32>
    %168 = arith.addf %163, %167 : vector<2x8xf32>
    %c60 = arith.constant 60 : index
    %c0_155 = arith.constant 0 : index
    %169 = vector.load %arg9[%c60, %c0_155] : memref<64x16xf32, #tpu.memory_space<vmem>>, vector<2x16xf32>
    %c30_156 = arith.constant 30 : index
    %c0_157 = arith.constant 0 : index
    %c0_158 = arith.constant 0 : index
    %170 = vector.load %arg6[%c30_156, %c0_157, %c0_158] : memref<32x16x8xf32, #tpu.memory_space<vmem>>, vector<1x16x8xf32>
    %171 = vector.shape_cast %170 : vector<1x16x8xf32> to vector<16x8xf32>
    %cst_159 = arith.constant dense<0.000000e+00> : vector<2x8xf32>
    %172 = tpu.matmul %169, %171, %cst_159 {dimension_numbers = #tpu.dot_dimension_numbers<[1], [0], [0], [1], [0, 0, 1, 1], [], []>} : vector<2x16xf32>, vector<16x8xf32>, vector<2x8xf32> -> vector<2x8xf32>
    %173 = arith.addf %168, %172 : vector<2x8xf32>
    %c62 = arith.constant 62 : index
    %c0_160 = arith.constant 0 : index
    %174 = vector.load %arg9[%c62, %c0_160] : memref<64x16xf32, #tpu.memory_space<vmem>>, vector<2x16xf32>
    %c31 = arith.constant 31 : index
    %c0_161 = arith.constant 0 : index
    %c0_162 = arith.constant 0 : index
    %175 = vector.load %arg6[%c31, %c0_161, %c0_162] : memref<32x16x8xf32, #tpu.memory_space<vmem>>, vector<1x16x8xf32>
    %176 = vector.shape_cast %175 : vector<1x16x8xf32> to vector<16x8xf32>
    %cst_163 = arith.constant dense<0.000000e+00> : vector<2x8xf32>
    %177 = tpu.matmul %174, %176, %cst_163 {dimension_numbers = #tpu.dot_dimension_numbers<[1], [0], [0], [1], [0, 0, 1, 1], [], []>} : vector<2x16xf32>, vector<16x8xf32>, vector<2x8xf32> -> vector<2x8xf32>
    %178 = arith.addf %173, %177 : vector<2x8xf32>
    %c0_164 = arith.constant 0 : index
    %c0_165 = arith.constant 0 : index
    %179 = vector.load %arg10[%c0_164, %c0_165] : memref<32x128xf32, #tpu.memory_space<vmem>>, vector<2x128xf32>
    %c0_166 = arith.constant 0 : index
    %c0_167 = arith.constant 0 : index
    %c0_168 = arith.constant 0 : index
    %180 = vector.load %arg7[%c0_166, %c0_167, %c0_168] : memref<16x128x8xf32, #tpu.memory_space<vmem>>, vector<1x128x8xf32>
    %181 = vector.shape_cast %180 : vector<1x128x8xf32> to vector<128x8xf32>
    %cst_169 = arith.constant dense<0.000000e+00> : vector<2x8xf32>
    %182 = tpu.matmul %179, %181, %cst_169 {dimension_numbers = #tpu.dot_dimension_numbers<[1], [0], [0], [1], [0, 0, 1, 1], [], []>} : vector<2x128xf32>, vector<128x8xf32>, vector<2x8xf32> -> vector<2x8xf32>
    %183 = arith.addf %178, %182 : vector<2x8xf32>
    %c2_170 = arith.constant 2 : index
    %c0_171 = arith.constant 0 : index
    %184 = vector.load %arg10[%c2_170, %c0_171] : memref<32x128xf32, #tpu.memory_space<vmem>>, vector<2x128xf32>
    %c1_172 = arith.constant 1 : index
    %c0_173 = arith.constant 0 : index
    %c0_174 = arith.constant 0 : index
    %185 = vector.load %arg7[%c1_172, %c0_173, %c0_174] : memref<16x128x8xf32, #tpu.memory_space<vmem>>, vector<1x128x8xf32>
    %186 = vector.shape_cast %185 : vector<1x128x8xf32> to vector<128x8xf32>
    %cst_175 = arith.constant dense<0.000000e+00> : vector<2x8xf32>
    %187 = tpu.matmul %184, %186, %cst_175 {dimension_numbers = #tpu.dot_dimension_numbers<[1], [0], [0], [1], [0, 0, 1, 1], [], []>} : vector<2x128xf32>, vector<128x8xf32>, vector<2x8xf32> -> vector<2x8xf32>
    %188 = arith.addf %183, %187 : vector<2x8xf32>
    %c4_176 = arith.constant 4 : index
    %c0_177 = arith.constant 0 : index
    %189 = vector.load %arg10[%c4_176, %c0_177] : memref<32x128xf32, #tpu.memory_space<vmem>>, vector<2x128xf32>
    %c2_178 = arith.constant 2 : index
    %c0_179 = arith.constant 0 : index
    %c0_180 = arith.constant 0 : index
    %190 = vector.load %arg7[%c2_178, %c0_179, %c0_180] : memref<16x128x8xf32, #tpu.memory_space<vmem>>, vector<1x128x8xf32>
    %191 = vector.shape_cast %190 : vector<1x128x8xf32> to vector<128x8xf32>
    %cst_181 = arith.constant dense<0.000000e+00> : vector<2x8xf32>
    %192 = tpu.matmul %189, %191, %cst_181 {dimension_numbers = #tpu.dot_dimension_numbers<[1], [0], [0], [1], [0, 0, 1, 1], [], []>} : vector<2x128xf32>, vector<128x8xf32>, vector<2x8xf32> -> vector<2x8xf32>
    %193 = arith.addf %188, %192 : vector<2x8xf32>
    %c6_182 = arith.constant 6 : index
    %c0_183 = arith.constant 0 : index
    %194 = vector.load %arg10[%c6_182, %c0_183] : memref<32x128xf32, #tpu.memory_space<vmem>>, vector<2x128xf32>
    %c3_184 = arith.constant 3 : index
    %c0_185 = arith.constant 0 : index
    %c0_186 = arith.constant 0 : index
    %195 = vector.load %arg7[%c3_184, %c0_185, %c0_186] : memref<16x128x8xf32, #tpu.memory_space<vmem>>, vector<1x128x8xf32>
    %196 = vector.shape_cast %195 : vector<1x128x8xf32> to vector<128x8xf32>
    %cst_187 = arith.constant dense<0.000000e+00> : vector<2x8xf32>
    %197 = tpu.matmul %194, %196, %cst_187 {dimension_numbers = #tpu.dot_dimension_numbers<[1], [0], [0], [1], [0, 0, 1, 1], [], []>} : vector<2x128xf32>, vector<128x8xf32>, vector<2x8xf32> -> vector<2x8xf32>
    %198 = arith.addf %193, %197 : vector<2x8xf32>
    %c8_188 = arith.constant 8 : index
    %c0_189 = arith.constant 0 : index
    %199 = vector.load %arg10[%c8_188, %c0_189] : memref<32x128xf32, #tpu.memory_space<vmem>>, vector<2x128xf32>
    %c4_190 = arith.constant 4 : index
    %c0_191 = arith.constant 0 : index
    %c0_192 = arith.constant 0 : index
    %200 = vector.load %arg7[%c4_190, %c0_191, %c0_192] : memref<16x128x8xf32, #tpu.memory_space<vmem>>, vector<1x128x8xf32>
    %201 = vector.shape_cast %200 : vector<1x128x8xf32> to vector<128x8xf32>
    %cst_193 = arith.constant dense<0.000000e+00> : vector<2x8xf32>
    %202 = tpu.matmul %199, %201, %cst_193 {dimension_numbers = #tpu.dot_dimension_numbers<[1], [0], [0], [1], [0, 0, 1, 1], [], []>} : vector<2x128xf32>, vector<128x8xf32>, vector<2x8xf32> -> vector<2x8xf32>
    %203 = arith.addf %198, %202 : vector<2x8xf32>
    %c10_194 = arith.constant 10 : index
    %c0_195 = arith.constant 0 : index
    %204 = vector.load %arg10[%c10_194, %c0_195] : memref<32x128xf32, #tpu.memory_space<vmem>>, vector<2x128xf32>
    %c5_196 = arith.constant 5 : index
    %c0_197 = arith.constant 0 : index
    %c0_198 = arith.constant 0 : index
    %205 = vector.load %arg7[%c5_196, %c0_197, %c0_198] : memref<16x128x8xf32, #tpu.memory_space<vmem>>, vector<1x128x8xf32>
    %206 = vector.shape_cast %205 : vector<1x128x8xf32> to vector<128x8xf32>
    %cst_199 = arith.constant dense<0.000000e+00> : vector<2x8xf32>
    %207 = tpu.matmul %204, %206, %cst_199 {dimension_numbers = #tpu.dot_dimension_numbers<[1], [0], [0], [1], [0, 0, 1, 1], [], []>} : vector<2x128xf32>, vector<128x8xf32>, vector<2x8xf32> -> vector<2x8xf32>
    %208 = arith.addf %203, %207 : vector<2x8xf32>
    %c12_200 = arith.constant 12 : index
    %c0_201 = arith.constant 0 : index
    %209 = vector.load %arg10[%c12_200, %c0_201] : memref<32x128xf32, #tpu.memory_space<vmem>>, vector<2x128xf32>
    %c6_202 = arith.constant 6 : index
    %c0_203 = arith.constant 0 : index
    %c0_204 = arith.constant 0 : index
    %210 = vector.load %arg7[%c6_202, %c0_203, %c0_204] : memref<16x128x8xf32, #tpu.memory_space<vmem>>, vector<1x128x8xf32>
    %211 = vector.shape_cast %210 : vector<1x128x8xf32> to vector<128x8xf32>
    %cst_205 = arith.constant dense<0.000000e+00> : vector<2x8xf32>
    %212 = tpu.matmul %209, %211, %cst_205 {dimension_numbers = #tpu.dot_dimension_numbers<[1], [0], [0], [1], [0, 0, 1, 1], [], []>} : vector<2x128xf32>, vector<128x8xf32>, vector<2x8xf32> -> vector<2x8xf32>
    %213 = arith.addf %208, %212 : vector<2x8xf32>
    %c14_206 = arith.constant 14 : index
    %c0_207 = arith.constant 0 : index
    %214 = vector.load %arg10[%c14_206, %c0_207] : memref<32x128xf32, #tpu.memory_space<vmem>>, vector<2x128xf32>
    %c7_208 = arith.constant 7 : index
    %c0_209 = arith.constant 0 : index
    %c0_210 = arith.constant 0 : index
    %215 = vector.load %arg7[%c7_208, %c0_209, %c0_210] : memref<16x128x8xf32, #tpu.memory_space<vmem>>, vector<1x128x8xf32>
    %216 = vector.shape_cast %215 : vector<1x128x8xf32> to vector<128x8xf32>
    %cst_211 = arith.constant dense<0.000000e+00> : vector<2x8xf32>
    %217 = tpu.matmul %214, %216, %cst_211 {dimension_numbers = #tpu.dot_dimension_numbers<[1], [0], [0], [1], [0, 0, 1, 1], [], []>} : vector<2x128xf32>, vector<128x8xf32>, vector<2x8xf32> -> vector<2x8xf32>
    %218 = arith.addf %213, %217 : vector<2x8xf32>
    %c16_212 = arith.constant 16 : index
    %c0_213 = arith.constant 0 : index
    %219 = vector.load %arg10[%c16_212, %c0_213] : memref<32x128xf32, #tpu.memory_space<vmem>>, vector<2x128xf32>
    %c8_214 = arith.constant 8 : index
    %c0_215 = arith.constant 0 : index
    %c0_216 = arith.constant 0 : index
    %220 = vector.load %arg7[%c8_214, %c0_215, %c0_216] : memref<16x128x8xf32, #tpu.memory_space<vmem>>, vector<1x128x8xf32>
    %221 = vector.shape_cast %220 : vector<1x128x8xf32> to vector<128x8xf32>
    %cst_217 = arith.constant dense<0.000000e+00> : vector<2x8xf32>
    %222 = tpu.matmul %219, %221, %cst_217 {dimension_numbers = #tpu.dot_dimension_numbers<[1], [0], [0], [1], [0, 0, 1, 1], [], []>} : vector<2x128xf32>, vector<128x8xf32>, vector<2x8xf32> -> vector<2x8xf32>
    %223 = arith.addf %218, %222 : vector<2x8xf32>
    %c18_218 = arith.constant 18 : index
    %c0_219 = arith.constant 0 : index
    %224 = vector.load %arg10[%c18_218, %c0_219] : memref<32x128xf32, #tpu.memory_space<vmem>>, vector<2x128xf32>
    %c9_220 = arith.constant 9 : index
    %c0_221 = arith.constant 0 : index
    %c0_222 = arith.constant 0 : index
    %225 = vector.load %arg7[%c9_220, %c0_221, %c0_222] : memref<16x128x8xf32, #tpu.memory_space<vmem>>, vector<1x128x8xf32>
    %226 = vector.shape_cast %225 : vector<1x128x8xf32> to vector<128x8xf32>
    %cst_223 = arith.constant dense<0.000000e+00> : vector<2x8xf32>
    %227 = tpu.matmul %224, %226, %cst_223 {dimension_numbers = #tpu.dot_dimension_numbers<[1], [0], [0], [1], [0, 0, 1, 1], [], []>} : vector<2x128xf32>, vector<128x8xf32>, vector<2x8xf32> -> vector<2x8xf32>
    %228 = arith.addf %223, %227 : vector<2x8xf32>
    %c20_224 = arith.constant 20 : index
    %c0_225 = arith.constant 0 : index
    %229 = vector.load %arg10[%c20_224, %c0_225] : memref<32x128xf32, #tpu.memory_space<vmem>>, vector<2x128xf32>
    %c10_226 = arith.constant 10 : index
    %c0_227 = arith.constant 0 : index
    %c0_228 = arith.constant 0 : index
    %230 = vector.load %arg7[%c10_226, %c0_227, %c0_228] : memref<16x128x8xf32, #tpu.memory_space<vmem>>, vector<1x128x8xf32>
    %231 = vector.shape_cast %230 : vector<1x128x8xf32> to vector<128x8xf32>
    %cst_229 = arith.constant dense<0.000000e+00> : vector<2x8xf32>
    %232 = tpu.matmul %229, %231, %cst_229 {dimension_numbers = #tpu.dot_dimension_numbers<[1], [0], [0], [1], [0, 0, 1, 1], [], []>} : vector<2x128xf32>, vector<128x8xf32>, vector<2x8xf32> -> vector<2x8xf32>
    %233 = arith.addf %228, %232 : vector<2x8xf32>
    %c22_230 = arith.constant 22 : index
    %c0_231 = arith.constant 0 : index
    %234 = vector.load %arg10[%c22_230, %c0_231] : memref<32x128xf32, #tpu.memory_space<vmem>>, vector<2x128xf32>
    %c11_232 = arith.constant 11 : index
    %c0_233 = arith.constant 0 : index
    %c0_234 = arith.constant 0 : index
    %235 = vector.load %arg7[%c11_232, %c0_233, %c0_234] : memref<16x128x8xf32, #tpu.memory_space<vmem>>, vector<1x128x8xf32>
    %236 = vector.shape_cast %235 : vector<1x128x8xf32> to vector<128x8xf32>
    %cst_235 = arith.constant dense<0.000000e+00> : vector<2x8xf32>
    %237 = tpu.matmul %234, %236, %cst_235 {dimension_numbers = #tpu.dot_dimension_numbers<[1], [0], [0], [1], [0, 0, 1, 1], [], []>} : vector<2x128xf32>, vector<128x8xf32>, vector<2x8xf32> -> vector<2x8xf32>
    %238 = arith.addf %233, %237 : vector<2x8xf32>
    %c24_236 = arith.constant 24 : index
    %c0_237 = arith.constant 0 : index
    %239 = vector.load %arg10[%c24_236, %c0_237] : memref<32x128xf32, #tpu.memory_space<vmem>>, vector<2x128xf32>
    %c12_238 = arith.constant 12 : index
    %c0_239 = arith.constant 0 : index
    %c0_240 = arith.constant 0 : index
    %240 = vector.load %arg7[%c12_238, %c0_239, %c0_240] : memref<16x128x8xf32, #tpu.memory_space<vmem>>, vector<1x128x8xf32>
    %241 = vector.shape_cast %240 : vector<1x128x8xf32> to vector<128x8xf32>
    %cst_241 = arith.constant dense<0.000000e+00> : vector<2x8xf32>
    %242 = tpu.matmul %239, %241, %cst_241 {dimension_numbers = #tpu.dot_dimension_numbers<[1], [0], [0], [1], [0, 0, 1, 1], [], []>} : vector<2x128xf32>, vector<128x8xf32>, vector<2x8xf32> -> vector<2x8xf32>
    %243 = arith.addf %238, %242 : vector<2x8xf32>
    %c26_242 = arith.constant 26 : index
    %c0_243 = arith.constant 0 : index
    %244 = vector.load %arg10[%c26_242, %c0_243] : memref<32x128xf32, #tpu.memory_space<vmem>>, vector<2x128xf32>
    %c13_244 = arith.constant 13 : index
    %c0_245 = arith.constant 0 : index
    %c0_246 = arith.constant 0 : index
    %245 = vector.load %arg7[%c13_244, %c0_245, %c0_246] : memref<16x128x8xf32, #tpu.memory_space<vmem>>, vector<1x128x8xf32>
    %246 = vector.shape_cast %245 : vector<1x128x8xf32> to vector<128x8xf32>
    %cst_247 = arith.constant dense<0.000000e+00> : vector<2x8xf32>
    %247 = tpu.matmul %244, %246, %cst_247 {dimension_numbers = #tpu.dot_dimension_numbers<[1], [0], [0], [1], [0, 0, 1, 1], [], []>} : vector<2x128xf32>, vector<128x8xf32>, vector<2x8xf32> -> vector<2x8xf32>
    %248 = arith.addf %243, %247 : vector<2x8xf32>
    %c28_248 = arith.constant 28 : index
    %c0_249 = arith.constant 0 : index
    %249 = vector.load %arg10[%c28_248, %c0_249] : memref<32x128xf32, #tpu.memory_space<vmem>>, vector<2x128xf32>
    %c14_250 = arith.constant 14 : index
    %c0_251 = arith.constant 0 : index
    %c0_252 = arith.constant 0 : index
    %250 = vector.load %arg7[%c14_250, %c0_251, %c0_252] : memref<16x128x8xf32, #tpu.memory_space<vmem>>, vector<1x128x8xf32>
    %251 = vector.shape_cast %250 : vector<1x128x8xf32> to vector<128x8xf32>
    %cst_253 = arith.constant dense<0.000000e+00> : vector<2x8xf32>
    %252 = tpu.matmul %249, %251, %cst_253 {dimension_numbers = #tpu.dot_dimension_numbers<[1], [0], [0], [1], [0, 0, 1, 1], [], []>} : vector<2x128xf32>, vector<128x8xf32>, vector<2x8xf32> -> vector<2x8xf32>
    %253 = arith.addf %248, %252 : vector<2x8xf32>
    %c30_254 = arith.constant 30 : index
    %c0_255 = arith.constant 0 : index
    %254 = vector.load %arg10[%c30_254, %c0_255] : memref<32x128xf32, #tpu.memory_space<vmem>>, vector<2x128xf32>
    %c15_256 = arith.constant 15 : index
    %c0_257 = arith.constant 0 : index
    %c0_258 = arith.constant 0 : index
    %255 = vector.load %arg7[%c15_256, %c0_257, %c0_258] : memref<16x128x8xf32, #tpu.memory_space<vmem>>, vector<1x128x8xf32>
    %256 = vector.shape_cast %255 : vector<1x128x8xf32> to vector<128x8xf32>
    %cst_259 = arith.constant dense<0.000000e+00> : vector<2x8xf32>
    %257 = tpu.matmul %254, %256, %cst_259 {dimension_numbers = #tpu.dot_dimension_numbers<[1], [0], [0], [1], [0, 0, 1, 1], [], []>} : vector<2x128xf32>, vector<128x8xf32>, vector<2x8xf32> -> vector<2x8xf32>
    %258 = arith.addf %253, %257 : vector<2x8xf32>
    %c0_260 = arith.constant 0 : index
    %c0_261 = arith.constant 0 : index
    %259 = vector.load %arg8[%c0_260, %c0_261] : memref<1x8xf32, #tpu.memory_space<vmem>>, vector<1x8xf32>
    %260 = vector.broadcast %259 : vector<1x8xf32> to vector<2x8xf32>
    %261 = arith.addf %258, %260 : vector<2x8xf32>
    %c0_262 = arith.constant 0 : index
    %c0_263 = arith.constant 0 : index
    %262 = vector.load %arg11[%c0_262, %c0_263] : memref<2x8xf32, #tpu.memory_space<vmem>>, vector<2x8xf32>
    tpu.vector_store %arg11[%c0_262, %c0_263], %261 {strides = array<i32>} : memref<2x8xf32, #tpu.memory_space<vmem>>, vector<2x8xf32>,
    return
  }
}

</mosaic_0001>

<bundles_post_ra>
// kernel: net_forward.2
= control target key start
LH: loop header
LB: loop body
LE: loop exit
PB: predicated region body
PF: predicated region fallthrough
CT: control target
= control target key end

     0   :  { %vm438_vm0 = vcmask 1040384   ;;  %v1893_v1 = vmov 0   ;;  %vm329_vm1 = vcmask 662528   ;;  %vm1273_vm2 = vcmask 1041408   ;;  %s2555_s1 = inlined_call_operand.vmem [shape: bf16[81,8], index: 1, kind: input, shape index: {}]   ;;  %s2556_s0 = inlined_call_operand.vmem [shape: bf16[576,81], index: 0, kind: input, shape index: {}]   ;;  %s2557_s4 = inlined_call_operand.vmem [shape: bf16[36,64], index: 4, kind: input, shape index: {}]   ;;  %s2558_s3 = inlined_call_operand.vmem [shape: bf16[72,36], index: 3, kind: input, shape index: {}]   ;;  %s2559_s2 = inlined_call_operand.vmem [shape: f32[1,8], index: 2, kind: input, shape index: {}]   ;;  %s2560_s6 = inlined_call_operand.vmem [shape: bf16[576,8], index: 6, kind: output, shape index: {0}]   ;;  %s2561_s5 = inlined_call_operand.vmem [shape: f32[1,64], index: 5, kind: input, shape index: {}]   ;;  %s2562_s7 = inlined_call_operand.vmem [shape: bf16[72,64], index: 7, kind: output, shape index: {1}]  }
   0x1   :  { %v1843_v0 = vld [vmem:[%s2555_s1 + $0x28] ss:$0 sps:$4 sm:$0x11]   ;;  %v440_v2 = vsel %vm438_vm0, 65535, %v1893_v1  ;;  %v1844_v4 = vld [vmem:[%s2555_s1 + $0x20] sm:$0xff]   ;;  %v1845_v5 = vld [vmem:[%s2555_s1 + $0x18] sm:$0xff]  }
   0x2   :  { %v442_v3 = vand.u32 %v1843_v0, %v440_v2  ;;  %v1849_v6 = vld [vmem:[%s2556_s0] sm:$0xff]   ;;  %v1846_v8 = vld [vmem:[%s2555_s1 + $0x10] sm:$0xff]   ;;  %v1847_v9 = vld [vmem:[%s2555_s1 + $0x8] sm:$0xff]   ;;  %v1894_v15 = vmov 0.0   ;;  %vm1895_vm3 = vmmov 0   ;;  %vm1257_vm4 = vcmask 293888  }
   0x3   :  { %1730 = vmatprep.mubr.msk.bf16.mxu0 %vm329_vm1, %v1849_v6  ;;  %v1852_v7 = vld [vmem:[%s2556_s0 + $0xc0] sm:$0xff]   ;;  %v1855_v11 = vld [vmem:[%s2557_s4 + $0x10] ss:$0 sps:$4 sm:$0x33]   ;;  %v1850_v12 = vld [vmem:[%s2556_s0 + $0x8] sm:$0xff]   ;;  %vm1125_vm5 = vcmask 60416  }
   0x4   :  { %1718 = vmatprep.subr.bf16.mxu0 %v442_v3  ;;  %1828 = vmatprep.subr.bf16.mxu1 %v442_v3  ;;  %v1848_v10 = vld [vmem:[%s2555_s1] sm:$0xff]   ;;  %v1854_v13 = vld [vmem:[%s2556_s0 + $0xc8] sm:$0xff]   ;;  %v1851_v14 = vld [vmem:[%s2556_s0 + $0x10] sm:$0xff]   ;;  %v1275_v16 = vsel %vm1273_vm2, %v1855_v11, 0  ;;  %vm1395_vm6 = vcmask 519168  }
   0x5   :  { %1719 = vmatpush3.bf16.msra.mxu0 %v442_v3  ;;  %1834 = vmatpush3.bf16.msra.mxu1 %v442_v3  ;;  %v1857_v17 = vld [vmem:[%s2556_s0 + $0xd0] sm:$0xff]   ;;  %v1864_v18 = vld [vmem:[%s2557_s4 + $0x8] sm:$0xff]   ;;  %v1853_v19 = vld [vmem:[%s2556_s0 + $0x18] sm:$0xff]  }
   0x6   :  { %1720 = vmatprep.subr.bf16.mxu0 %v1844_v4  ;;  %1829 = vmatprep.subr.bf16.mxu1 %v1844_v4  ;;  %v1856_v20 = vld [vmem:[%s2556_s0 + $0x20] sm:$0xff]   ;;  %v1859_v21 = vld [vmem:[%s2556_s0 + $0xd8] sm:$0xff]   ;;  %v1858_v24 = vld [vmem:[%s2556_s0 + $0x28] sm:$0xff]  }
   0x7   :  { %1778 = vmatprep.mubr.msk.bf16.mxu1 %vm329_vm1, %v1852_v7  ;;  %v1861_v22 = vld [vmem:[%s2556_s0 + $0xe0] sm:$0xff]   ;;  %v1860_v25 = vld [vmem:[%s2556_s0 + $0x30] sm:$0xff]   ;;  %v1863_v26 = vld [vmem:[%s2556_s0 + $0xe8] sm:$0xff]  }
   0x8   :  { %v1873_v23 = vld [vmem:[%s2557_s4] sm:$0xff]   ;;  %v1866_v27 = vld [vmem:[%s2556_s0 + $0xf0] sm:$0xff]   ;;  %v1862_v28 = vld [vmem:[%s2556_s0 + $0x38] sm:$0xff]  }
   0x9   :  { %1721 = vmatpush3.bf16.msra.mxu0 %v1844_v4  ;;  %1835 = vmatpush3.bf16.msra.mxu1 %v1844_v4  ;;  %v1868_v29 = vld [vmem:[%s2556_s0 + $0xf8] sm:$0xff]   ;;  %v1865_v30 = vld [vmem:[%s2556_s0 + $0x40] sm:$0xff]   ;;  %v1867_v32 = vld [vmem:[%s2556_s0 + $0x48] sm:$0xff]  }
   0xa   :  { %1722 = vmatprep.subr.bf16.mxu0 %v1845_v5  ;;  %1830 = vmatprep.subr.bf16.mxu1 %v1845_v5  ;;  %v1870_v31 = vld [vmem:[%s2556_s0 + $0x100] sm:$0xff]   ;;  %v1872_v33 = vld [vmem:[%s2556_s0 + $0x108] sm:$0xff]   ;;  %v1869_v34 = vld [vmem:[%s2556_s0 + $0x50] sm:$0xff]  }
   0xb   :  { %v1875_v35 = vld [vmem:[%s2556_s0 + $0x110] sm:$0xff]   ;;  %v1871_v36 = vld [vmem:[%s2556_s0 + $0x58] sm:$0xff]   ;;  %v1874_v38 = vld [vmem:[%s2556_s0 + $0x60] sm:$0xff]  }
   0xc   :  { %v1877_v37 = vld [vmem:[%s2556_s0 + $0x118] sm:$0xff]   ;;  %v1876_v39 = vld [vmem:[%s2556_s0 + $0x68] sm:$0xff]   ;;  %v1880_v40 = vld [vmem:[%s2558_s3] sm:$0xff]  }
   0xd   :  { %1723 = vmatpush3.bf16.msra.mxu0 %v1845_v5  ;;  %1836 = vmatpush3.bf16.msra.mxu1 %v1845_v5  ;;  %v1878_v41 = vld [vmem:[%s2556_s0 + $0x70] sm:$0xff]   ;;  %v1879_v42 = vld [vmem:[%s2556_s0 + $0x78] sm:$0xff]   ;;  %v1883_v43 = vld [vmem:[%s2558_s3 + $0x8] sm:$0xff]  }
   0xe   :  { %1724 = vmatprep.subr.bf16.mxu0 %v1846_v8  ;;  %1831 = vmatprep.subr.bf16.mxu1 %v1846_v8  ;;  %v1881_v44 = vld [vmem:[%s2556_s0 + $0x80] sm:$0xff]   ;;  %v1882_v45 = vld [vmem:[%s2556_s0 + $0x88] sm:$0xff]   ;;  %v1886_v46 = vld [vmem:[%s2558_s3 + $0x10] sm:$0xff]  }
   0xf   :  { %v1884_v47 = vld [vmem:[%s2556_s0 + $0x90] sm:$0xff]   ;;  %v1885_v48 = vld [vmem:[%s2556_s0 + $0x98] sm:$0xff]   ;;  %v1887_v50 = vld [vmem:[%s2556_s0 + $0xa0] sm:$0xff]  }
  0x10   :  { %v1889_v49 = vld [vmem:[%s2558_s3 + $0x18] sm:$0xff]   ;;  %v1888_v51 = vld [vmem:[%s2556_s0 + $0xa8] sm:$0xff]   ;;  %v1892_v52 = vld [vmem:[%s2558_s3 + $0x20] ss:$0 sps:$4 sm:$0xff]  }
  0x11   :  { %1725 = vmatpush3.bf16.msra.mxu0 %v1846_v8  ;;  %1837 = vmatpush3.bf16.msra.mxu1 %v1846_v8  ;;  %v1890_v53 = vld [vmem:[%s2556_s0 + $0xb0] sm:$0xff]   ;;  %v1891_v54 = vld [vmem:[%s2556_s0 + $0xb8] sm:$0xff]   ;;  %v2143_v55 = vld [vmem:[%s2559_s2] ss:$0 sm:$0xff] }
  0x12   :  { %1726 = vmatprep.subr.bf16.mxu0 %v1847_v9  ;;  %1832 = vmatprep.subr.bf16.mxu1 %v1847_v9 }
  0x15   :  { %1727 = vmatpush3.bf16.msra.mxu0 %v1847_v9  ;;  %1838 = vmatpush3.bf16.msra.mxu1 %v1847_v9 }
  0x16   :  { %1728 = vmatprep.subr.bf16.mxu0 %v1848_v10  ;;  %1833 = vmatprep.subr.bf16.mxu1 %v1848_v10 }
  0x19   :  { %1729 = vmatpush3.bf16.msra.mxu0 %v1848_v10  ;;  %1839 = vmatpush3.bf16.msra.mxu1 %v1848_v10 }
  0x1a   :  { %1802 = vmatprep.subr.bf16.mxu1 %v1894_v15 }
  0x1c   :  { %1731 = vmatmul.mubr.msk.bf16.vlgmr.msra.gmra.mxu0 %vm329_vm1, %v1850_v12  ;;  %1779 = vmatmul.mubr.msk.bf16.vlgmr.msra.gmra.mxu1 %vm329_vm1, %v1854_v13 }
  0x1d   :  { %1734 = vmatprep.mubr.msk.bf16.mxu0 %vm329_vm1, %v1851_v14  ;;  %1803 = vmatpush3.bf16.msra.mxu1 %v1275_v16 }
  0x1e   :  { %1782 = vmatprep.mubr.msk.bf16.mxu1 %vm329_vm1, %v1857_v17  ;;  %1804 = vmatprep.subr.bf16.mxu1 %v1894_v15 }
  0x21   :  { %1805 = vmatpush3.bf16.msra.mxu1 %v1864_v18 }
  0x22   :  { %1806 = vmatprep.subr.bf16.mxu1 %v1894_v15 }
  0x24   :  { %1735 = vmatmul.mubr.msk.bf16.gmra.mxu0 %vm329_vm1, %v1853_v19  ;;  %1783 = vmatmul.mubr.msk.bf16.gmra.mxu1 %vm329_vm1, %v1859_v21 }
  0x25   :  { %1738 = vmatprep.mubr.msk.bf16.mxu0 %vm329_vm1, %v1856_v20  ;;  %1786 = vmatprep.mubr.msk.bf16.mxu1 %vm329_vm1, %v1861_v22 }
  0x26   :  { %1807 = vmatpush3.bf16.msra.mxu1 %v1873_v23 }
  0x2c   :  { %1739 = vmatmul.mubr.msk.bf16.gmra.mxu0 %vm329_vm1, %v1858_v24  ;;  %1787 = vmatmul.mubr.msk.bf16.gmra.mxu1 %vm329_vm1, %v1863_v26 }
  0x2d   :  { %1742 = vmatprep.mubr.msk.bf16.mxu0 %vm329_vm1, %v1860_v25  ;;  %1790 = vmatprep.mubr.msk.bf16.mxu1 %vm329_vm1, %v1866_v27 }
  0x34   :  { %1743 = vmatmul.mubr.msk.bf16.gmra.mxu0 %vm329_vm1, %v1862_v28  ;;  %1791 = vmatmul.mubr.msk.bf16.gmra.mxu1 %vm329_vm1, %v1868_v29 }
  0x35   :  { %1746 = vmatprep.mubr.msk.bf16.mxu0 %vm329_vm1, %v1865_v30  ;;  %1794 = vmatprep.mubr.msk.bf16.mxu1 %vm329_vm1, %v1870_v31 }
  0x3c   :  { %1747 = vmatmul.mubr.msk.bf16.gmra.mxu0 %vm329_vm1, %v1867_v32  ;;  %1795 = vmatmul.mubr.msk.bf16.gmra.mxu1 %vm329_vm1, %v1872_v33 }
  0x3d   :  { %1750 = vmatprep.mubr.msk.bf16.mxu0 %vm329_vm1, %v1869_v34  ;;  %1798 = vmatprep.mubr.msk.bf16.mxu1 %vm329_vm1, %v1875_v35 }
  0x44   :  { %1751 = vmatmul.mubr.msk.bf16.gmra.mxu0 %vm329_vm1, %v1871_v36  ;;  %1799 = vmatmul.mubr.msk.bf16.gmra.mxu1 %vm329_vm1, %v1877_v37 }
  0x45   :  { %1754 = vmatprep.mubr.msk.bf16.mxu0 %vm329_vm1, %v1874_v38  ;;  %1808 = vmatprep.mubr.msk.bf16.mxu1 %vm1895_vm3, %v1894_v15 }
  0x4c   :  { %1755 = vmatmul.mubr.msk.bf16.gmra.mxu0 %vm329_vm1, %v1876_v39  ;;  %1809 = vmatmul.mubr.msk.bf16.vlgmr.msra.gmra.mxu1 %vm1257_vm4, %v1880_v40 }
  0x4d   :  { %1758 = vmatprep.mubr.msk.bf16.mxu0 %vm329_vm1, %v1878_v41  ;;  %1812 = vmatprep.mubr.msk.bf16.mxu1 %vm1895_vm3, %v1894_v15 }
  0x54   :  { %1759 = vmatmul.mubr.msk.bf16.gmra.mxu0 %vm329_vm1, %v1879_v42  ;;  %1813 = vmatmul.mubr.msk.bf16.gmra.mxu1 %vm1257_vm4, %v1883_v43 }
  0x55   :  { %1762 = vmatprep.mubr.msk.bf16.mxu0 %vm329_vm1, %v1881_v44  ;;  %1816 = vmatprep.mubr.msk.bf16.mxu1 %vm1895_vm3, %v1894_v15 }
  0x5c   :  { %1763 = vmatmul.mubr.msk.bf16.gmra.mxu0 %vm329_vm1, %v1882_v45  ;;  %1817 = vmatmul.mubr.msk.bf16.gmra.mxu1 %vm1257_vm4, %v1886_v46 }
  0x5d   :  { %1766 = vmatprep.mubr.msk.bf16.mxu0 %vm329_vm1, %v1884_v47  ;;  %1820 = vmatprep.mubr.msk.bf16.mxu1 %vm1895_vm3, %v1894_v15 }
  0x64   :  { %1767 = vmatmul.mubr.msk.bf16.gmra.mxu0 %vm329_vm1, %v1885_v48  ;;  %1821 = vmatmul.mubr.msk.bf16.gmra.mxu1 %vm1257_vm4, %v1889_v49 }
  0x65   :  { %1770 = vmatprep.mubr.msk.bf16.mxu0 %vm329_vm1, %v1887_v50  ;;  %1824 = vmatprep.mubr.msk.bf16.mxu1 %vm1895_vm3, %v1894_v15 }
  0x6c   :  { %1771 = vmatmul.mubr.msk.bf16.gmra.mxu0 %vm329_vm1, %v1888_v51  ;;  %1825 = vmatmul.mubr.msk.bf16.gmra.mxu1 %vm1257_vm4, %v1892_v52 }
  0x6d   :  { %1774 = vmatprep.mubr.msk.bf16.mxu0 %vm329_vm1, %v1890_v53 }
  0x74   :  { %1775 = vmatmul.mubr.msk.bf16.gmra.mxu0 %vm329_vm1, %v1891_v54 }
  0xdc   :  { %v1732_v56 = vpop.f32.mrf.mxu0  ;;  %v1780_v57 = vpop.f32.mrf.mxu1 }
  0xdd   :  { %v487_v58 = vadd.f32 %v1732_v56, %v2143_v55  ;;  %v679_v59 = vadd.f32 %v1780_v57, %v2143_v55 }
  0xde   :  { %v478_v60 = vpop.f32.mrf.mxu0  ;;  %v670_v61 = vpop.f32.mrf.mxu1 }
  0xdf   :  { %v767_v62 = vmax.f32 %v487_v58, 0.0  ;;  %v479_v63 = vadd.f32 %v2143_v55, %v478_v60  ;;  %v815_v0 = vmax.f32 %v679_v59, 0.0  ;;  %v671_v1 = vadd.f32 %v2143_v55, %v670_v61 }
  0xe0   :  { %v1733_v2 = vpop.f32.mrf.mxu0  ;;  %v1781_v3 = vpop.f32.mrf.mxu1 }
  0xe1   :  { %v1589_v4 = vpack.c.bf16 %v767_v62, %v767_v62  ;;  %v765_v5 = vmax.f32 %v479_v63, 0.0  ;;  %v490_v6 = vadd.f32 %v1733_v2, %v2143_v55  ;;  %v1637_v7 = vpack.c.bf16 %v815_v0, %v815_v0 }
  0xe2   :  { %v481_v8 = vpop.f32.mrf.mxu0  ;;  %v813_v9 = vmax.f32 %v671_v1, 0.0  ;;  %v682_v10 = vadd.f32 %v1781_v3, %v2143_v55  ;;  %v673_v11 = vpop.f32.mrf.mxu1 }
  0xe3   :  { %1128 = vst.msk [vmem:[%s2560_s6 + $0x8] sm:$0xf] %vm1125_vm5, %v1589_v4  ;;  %v1587_v12 = vpack.c.bf16 %v765_v5, %v765_v5  ;;  %v768_v13 = vmax.f32 %v490_v6, 0.0  ;;  %v482_v14 = vadd.f32 %v2143_v55, %v481_v8  ;;  %1176 = vst.msk [vmem:[%s2560_s6 + $0xc8] sm:$0xf] %vm1125_vm5, %v1637_v7  ;;  %v674_v15 = vadd.f32 %v2143_v55, %v673_v11 }
  0xe4   :  { %v1736_v16 = vpop.f32.mrf.mxu0  ;;  %v1635_v17 = vpack.c.bf16 %v813_v9, %v813_v9  ;;  %v816_v18 = vmax.f32 %v682_v10, 0.0  ;;  %v1784_v19 = vpop.f32.mrf.mxu1 }
  0xe5   :  { %1126 = vst.msk [vmem:[%s2560_s6] sm:$0xf] %vm1125_vm5, %v1587_v12  ;;  %v1590_v20 = vpack.c.bf16 %v768_v13, %v768_v13  ;;  %v766_v21 = vmax.f32 %v482_v14, 0.0  ;;  %v503_v22 = vadd.f32 %v1736_v16, %v2143_v55  ;;  %v814_v23 = vmax.f32 %v674_v15, 0.0 }
  0xe6   :  { %v494_v24 = vpop.f32.mrf.mxu0  ;;  %1174 = vst.msk [vmem:[%s2560_s6 + $0xc0] sm:$0xf] %vm1125_vm5, %v1635_v17  ;;  %v1638_v25 = vpack.c.bf16 %v816_v18, %v816_v18  ;;  %v695_v26 = vadd.f32 %v1784_v19, %v2143_v55  ;;  %v686_v27 = vpop.f32.mrf.mxu1 }
  0xe7   :  { %1129 = vst.msk [vmem:[%s2560_s6 + $0xc] sm:$0xf] %vm1125_vm5, %v1590_v20  ;;  %v1588_v28 = vpack.c.bf16 %v766_v21, %v766_v21  ;;  %v771_v29 = vmax.f32 %v503_v22, 0.0  ;;  %v495_v30 = vadd.f32 %v2143_v55, %v494_v24  ;;  %v1636_v31 = vpack.c.bf16 %v814_v23, %v814_v23 }
  0xe8   :  { %v1737_v32 = vpop.f32.mrf.mxu0  ;;  %1177 = vst.msk [vmem:[%s2560_s6 + $0xcc] sm:$0xf] %vm1125_vm5, %v1638_v25  ;;  %v819_v33 = vmax.f32 %v695_v26, 0.0  ;;  %v687_v34 = vadd.f32 %v2143_v55, %v686_v27  ;;  %v1785_v35 = vpop.f32.mrf.mxu1 }
  0xe9   :  { %1127 = vst.msk [vmem:[%s2560_s6 + $0x4] sm:$0xf] %vm1125_vm5, %v1588_v28  ;;  %v1593_v36 = vpack.c.bf16 %v771_v29, %v771_v29  ;;  %v769_v37 = vmax.f32 %v495_v30, 0.0  ;;  %v506_v38 = vadd.f32 %v1737_v32, %v2143_v55  ;;  %1175 = vst.msk [vmem:[%s2560_s6 + $0xc4] sm:$0xf] %vm1125_vm5, %v1636_v31  ;;  %v698_v39 = vadd.f32 %v1785_v35, %v2143_v55 }
  0xea   :  { %v497_v40 = vpop.f32.mrf.mxu0  ;;  %v1641_v41 = vpack.c.bf16 %v819_v33, %v819_v33  ;;  %v817_v42 = vmax.f32 %v687_v34, 0.0  ;;  %v689_v43 = vpop.f32.mrf.mxu1 }
  0xeb   :  { %1132 = vst.msk [vmem:[%s2560_s6 + $0x18] sm:$0xf] %vm1125_vm5, %v1593_v36  ;;  %v1591_v44 = vpack.c.bf16 %v769_v37, %v769_v37  ;;  %v772_v45 = vmax.f32 %v506_v38, 0.0  ;;  %v498_v46 = vadd.f32 %v2143_v55, %v497_v40  ;;  %v820_v47 = vmax.f32 %v698_v39, 0.0 }
  0xec   :  { %v1740_v48 = vpop.f32.mrf.mxu0  ;;  %1180 = vst.msk [vmem:[%s2560_s6 + $0xd8] sm:$0xf] %vm1125_vm5, %v1641_v41  ;;  %v1639_v49 = vpack.c.bf16 %v817_v42, %v817_v42  ;;  %v690_v50 = vadd.f32 %v2143_v55, %v689_v43  ;;  %v1788_v51 = vpop.f32.mrf.mxu1 }
  0xed   :  { %1130 = vst.msk [vmem:[%s2560_s6 + $0x10] sm:$0xf] %vm1125_vm5, %v1591_v44  ;;  %v1594_v52 = vpack.c.bf16 %v772_v45, %v772_v45  ;;  %v770_v53 = vmax.f32 %v498_v46, 0.0  ;;  %v519_v54 = vadd.f32 %v1740_v48, %v2143_v55  ;;  %v1642_v56 = vpack.c.bf16 %v820_v47, %v820_v47 }
  0xee   :  { %v510_v57 = vpop.f32.mrf.mxu0  ;;  %1178 = vst.msk [vmem:[%s2560_s6 + $0xd0] sm:$0xf] %vm1125_vm5, %v1639_v49  ;;  %v818_v58 = vmax.f32 %v690_v50, 0.0  ;;  %v711_v59 = vadd.f32 %v1788_v51, %v2143_v55  ;;  %v702_v60 = vpop.f32.mrf.mxu1 }
  0xef   :  { %1133 = vst.msk [vmem:[%s2560_s6 + $0x1c] sm:$0xf] %vm1125_vm5, %v1594_v52  ;;  %v1592_v61 = vpack.c.bf16 %v770_v53, %v770_v53  ;;  %v775_v62 = vmax.f32 %v519_v54, 0.0  ;;  %v511_v63 = vadd.f32 %v2143_v55, %v510_v57  ;;  %1181 = vst.msk [vmem:[%s2560_s6 + $0xdc] sm:$0xf] %vm1125_vm5, %v1642_v56  ;;  %v703_v0 = vadd.f32 %v2143_v55, %v702_v60 }
  0xf0   :  { %v1741_v1 = vpop.f32.mrf.mxu0  ;;  %v1640_v2 = vpack.c.bf16 %v818_v58, %v818_v58  ;;  %v823_v3 = vmax.f32 %v711_v59, 0.0  ;;  %v1789_v4 = vpop.f32.mrf.mxu1 }
  0xf1   :  { %1131 = vst.msk [vmem:[%s2560_s6 + $0x14] sm:$0xf] %vm1125_vm5, %v1592_v61  ;;  %v1597_v5 = vpack.c.bf16 %v775_v62, %v775_v62  ;;  %v773_v6 = vmax.f32 %v511_v63, 0.0  ;;  %v522_v7 = vadd.f32 %v1741_v1, %v2143_v55  ;;  %v821_v8 = vmax.f32 %v703_v0, 0.0 }
  0xf2   :  { %v513_v9 = vpop.f32.mrf.mxu0  ;;  %1179 = vst.msk [vmem:[%s2560_s6 + $0xd4] sm:$0xf] %vm1125_vm5, %v1640_v2  ;;  %v1645_v10 = vpack.c.bf16 %v823_v3, %v823_v3  ;;  %v714_v11 = vadd.f32 %v1789_v4, %v2143_v55  ;;  %v705_v12 = vpop.f32.mrf.mxu1 }
  0xf3   :  { %1136 = vst.msk [vmem:[%s2560_s6 + $0x28] sm:$0xf] %vm1125_vm5, %v1597_v5  ;;  %v1595_v13 = vpack.c.bf16 %v773_v6, %v773_v6  ;;  %v776_v14 = vmax.f32 %v522_v7, 0.0  ;;  %v514_v15 = vadd.f32 %v2143_v55, %v513_v9  ;;  %v1643_v16 = vpack.c.bf16 %v821_v8, %v821_v8 }
  0xf4   :  { %v1744_v17 = vpop.f32.mrf.mxu0  ;;  %1184 = vst.msk [vmem:[%s2560_s6 + $0xe8] sm:$0xf] %vm1125_vm5, %v1645_v10  ;;  %v824_v18 = vmax.f32 %v714_v11, 0.0  ;;  %v706_v19 = vadd.f32 %v2143_v55, %v705_v12  ;;  %v1792_v20 = vpop.f32.mrf.mxu1 }
  0xf5   :  { %1134 = vst.msk [vmem:[%s2560_s6 + $0x20] sm:$0xf] %vm1125_vm5, %v1595_v13  ;;  %v1598_v21 = vpack.c.bf16 %v776_v14, %v776_v14  ;;  %v774_v22 = vmax.f32 %v514_v15, 0.0  ;;  %v535_v23 = vadd.f32 %v1744_v17, %v2143_v55  ;;  %1182 = vst.msk [vmem:[%s2560_s6 + $0xe0] sm:$0xf] %vm1125_vm5, %v1643_v16  ;;  %v727_v24 = vadd.f32 %v1792_v20, %v2143_v55 }
  0xf6   :  { %v526_v25 = vpop.f32.mrf.mxu0  ;;  %v1646_v26 = vpack.c.bf16 %v824_v18, %v824_v18  ;;  %v822_v27 = vmax.f32 %v706_v19, 0.0  ;;  %v718_v28 = vpop.f32.mrf.mxu1 }
  0xf7   :  { %1137 = vst.msk [vmem:[%s2560_s6 + $0x2c] sm:$0xf] %vm1125_vm5, %v1598_v21  ;;  %v1596_v29 = vpack.c.bf16 %v774_v22, %v774_v22  ;;  %v779_v30 = vmax.f32 %v535_v23, 0.0  ;;  %v527_v31 = vadd.f32 %v2143_v55, %v526_v25  ;;  %v827_v32 = vmax.f32 %v727_v24, 0.0 }
  0xf8   :  { %v1745_v33 = vpop.f32.mrf.mxu0  ;;  %1185 = vst.msk [vmem:[%s2560_s6 + $0xec] sm:$0xf] %vm1125_vm5, %v1646_v26  ;;  %v1644_v34 = vpack.c.bf16 %v822_v27, %v822_v27  ;;  %v719_v35 = vadd.f32 %v2143_v55, %v718_v28  ;;  %v1793_v36 = vpop.f32.mrf.mxu1 }
  0xf9   :  { %1135 = vst.msk [vmem:[%s2560_s6 + $0x24] sm:$0xf] %vm1125_vm5, %v1596_v29  ;;  %v1601_v37 = vpack.c.bf16 %v779_v30, %v779_v30  ;;  %v777_v38 = vmax.f32 %v527_v31, 0.0  ;;  %v538_v39 = vadd.f32 %v1745_v33, %v2143_v55  ;;  %v1649_v40 = vpack.c.bf16 %v827_v32, %v827_v32 }
  0xfa   :  { %v529_v41 = vpop.f32.mrf.mxu0  ;;  %1183 = vst.msk [vmem:[%s2560_s6 + $0xe4] sm:$0xf] %vm1125_vm5, %v1644_v34  ;;  %v825_v42 = vmax.f32 %v719_v35, 0.0  ;;  %v730_v43 = vadd.f32 %v1793_v36, %v2143_v55  ;;  %v721_v44 = vpop.f32.mrf.mxu1 }
  0xfb   :  { %1140 = vst.msk [vmem:[%s2560_s6 + $0x38] sm:$0xf] %vm1125_vm5, %v1601_v37  ;;  %v1599_v45 = vpack.c.bf16 %v777_v38, %v777_v38  ;;  %v780_v46 = vmax.f32 %v538_v39, 0.0  ;;  %v530_v47 = vadd.f32 %v2143_v55, %v529_v41  ;;  %1188 = vst.msk [vmem:[%s2560_s6 + $0xf8] sm:$0xf] %vm1125_vm5, %v1649_v40  ;;  %v722_v48 = vadd.f32 %v2143_v55, %v721_v44 }
  0xfc   :  { %v1748_v49 = vpop.f32.mrf.mxu0  ;;  %v1647_v50 = vpack.c.bf16 %v825_v42, %v825_v42  ;;  %v828_v51 = vmax.f32 %v730_v43, 0.0  ;;  %v1796_v52 = vpop.f32.mrf.mxu1 }
  0xfd   :  { %1138 = vst.msk [vmem:[%s2560_s6 + $0x30] sm:$0xf] %vm1125_vm5, %v1599_v45  ;;  %v1602_v53 = vpack.c.bf16 %v780_v46, %v780_v46  ;;  %v778_v54 = vmax.f32 %v530_v47, 0.0  ;;  %v551_v56 = vadd.f32 %v1748_v49, %v2143_v55  ;;  %v826_v57 = vmax.f32 %v722_v48, 0.0  ;;  %v2354_v46 = vld [vmem:[%s2561_s5] ss:$0 sm:$0xff] }
  0xfe   :  { %v542_v58 = vpop.f32.mrf.mxu0  ;;  %1186 = vst.msk [vmem:[%s2560_s6 + $0xf0] sm:$0xf] %vm1125_vm5, %v1647_v50  ;;  %v1650_v59 = vpack.c.bf16 %v828_v51, %v828_v51  ;;  %v743_v60 = vadd.f32 %v1796_v52, %v2143_v55  ;;  %v734_v61 = vpop.f32.mrf.mxu1 }
  0xff   :  { %1141 = vst.msk [vmem:[%s2560_s6 + $0x3c] sm:$0xf] %vm1125_vm5, %v1602_v53  ;;  %v1600_v62 = vpack.c.bf16 %v778_v54, %v778_v54  ;;  %v783_v63 = vmax.f32 %v551_v56, 0.0  ;;  %v543_v0 = vadd.f32 %v2143_v55, %v542_v58  ;;  %v1648_v1 = vpack.c.bf16 %v826_v57, %v826_v57 }
 0x100   :  { %v1749_v2 = vpop.f32.mrf.mxu0  ;;  %1189 = vst.msk [vmem:[%s2560_s6 + $0xfc] sm:$0xf] %vm1125_vm5, %v1650_v59  ;;  %v831_v3 = vmax.f32 %v743_v60, 0.0  ;;  %v735_v4 = vadd.f32 %v2143_v55, %v734_v61  ;;  %v1797_v5 = vpop.f32.mrf.mxu1 }
 0x101   :  { %1139 = vst.msk [vmem:[%s2560_s6 + $0x34] sm:$0xf] %vm1125_vm5, %v1600_v62  ;;  %v1605_v6 = vpack.c.bf16 %v783_v63, %v783_v63  ;;  %v781_v7 = vmax.f32 %v543_v0, 0.0  ;;  %v554_v8 = vadd.f32 %v1749_v2, %v2143_v55  ;;  %1187 = vst.msk [vmem:[%s2560_s6 + $0xf4] sm:$0xf] %vm1125_vm5, %v1648_v1  ;;  %v746_v9 = vadd.f32 %v1797_v5, %v2143_v55 }
 0x102   :  { %v545_v10 = vpop.f32.mrf.mxu0  ;;  %v1653_v11 = vpack.c.bf16 %v831_v3, %v831_v3  ;;  %v829_v12 = vmax.f32 %v735_v4, 0.0  ;;  %v737_v13 = vpop.f32.mrf.mxu1 }
 0x103   :  { %1144 = vst.msk [vmem:[%s2560_s6 + $0x48] sm:$0xf] %vm1125_vm5, %v1605_v6  ;;  %v1603_v14 = vpack.c.bf16 %v781_v7, %v781_v7  ;;  %v784_v15 = vmax.f32 %v554_v8, 0.0  ;;  %v546_v16 = vadd.f32 %v2143_v55, %v545_v10  ;;  %v832_v17 = vmax.f32 %v746_v9, 0.0 }
 0x104   :  { %v1752_v18 = vpop.f32.mrf.mxu0  ;;  %1192 = vst.msk [vmem:[%s2560_s6 + $0x108] sm:$0xf] %vm1125_vm5, %v1653_v11  ;;  %v1651_v19 = vpack.c.bf16 %v829_v12, %v829_v12  ;;  %v738_v20 = vadd.f32 %v2143_v55, %v737_v13  ;;  %v1800_v21 = vpop.f32.mrf.mxu1 }
 0x105   :  { %1142 = vst.msk [vmem:[%s2560_s6 + $0x40] sm:$0xf] %vm1125_vm5, %v1603_v14  ;;  %v1606_v22 = vpack.c.bf16 %v784_v15, %v784_v15  ;;  %v782_v23 = vmax.f32 %v546_v16, 0.0  ;;  %v567_v24 = vadd.f32 %v1752_v18, %v2143_v55  ;;  %v1654_v25 = vpack.c.bf16 %v832_v17, %v832_v17 }
 0x106   :  { %v558_v26 = vpop.f32.mrf.mxu0  ;;  %1190 = vst.msk [vmem:[%s2560_s6 + $0x100] sm:$0xf] %vm1125_vm5, %v1651_v19  ;;  %v830_v27 = vmax.f32 %v738_v20, 0.0  ;;  %v759_v28 = vadd.f32 %v1800_v21, %v2143_v55  ;;  %v750_v29 = vpop.f32.mrf.mxu1 }
 0x107   :  { %1145 = vst.msk [vmem:[%s2560_s6 + $0x4c] sm:$0xf] %vm1125_vm5, %v1606_v22  ;;  %v1604_v30 = vpack.c.bf16 %v782_v23, %v782_v23  ;;  %v787_v31 = vmax.f32 %v567_v24, 0.0  ;;  %v559_v32 = vadd.f32 %v2143_v55, %v558_v26  ;;  %1193 = vst.msk [vmem:[%s2560_s6 + $0x10c] sm:$0xf] %vm1125_vm5, %v1654_v25  ;;  %v751_v33 = vadd.f32 %v2143_v55, %v750_v29 }
 0x108   :  { %v1753_v34 = vpop.f32.mrf.mxu0  ;;  %v1652_v35 = vpack.c.bf16 %v830_v27, %v830_v27  ;;  %v835_v36 = vmax.f32 %v759_v28, 0.0  ;;  %v1801_v37 = vpop.f32.mrf.mxu1 }
 0x109   :  { %1143 = vst.msk [vmem:[%s2560_s6 + $0x44] sm:$0xf] %vm1125_vm5, %v1604_v30  ;;  %v1609_v38 = vpack.c.bf16 %v787_v31, %v787_v31  ;;  %v785_v39 = vmax.f32 %v559_v32, 0.0  ;;  %v570_v40 = vadd.f32 %v1753_v34, %v2143_v55  ;;  %v833_v41 = vmax.f32 %v751_v33, 0.0 }
 0x10a   :  { %v561_v42 = vpop.f32.mrf.mxu0  ;;  %1191 = vst.msk [vmem:[%s2560_s6 + $0x104] sm:$0xf] %vm1125_vm5, %v1652_v35  ;;  %v1657_v43 = vpack.c.bf16 %v835_v36, %v835_v36  ;;  %v762_v44 = vadd.f32 %v1801_v37, %v2143_v55  ;;  %v753_v45 = vpop.f32.mrf.mxu1 }
 0x10b   :  { %1148 = vst.msk [vmem:[%s2560_s6 + $0x58] sm:$0xf] %vm1125_vm5, %v1609_v38  ;;  %v1607_v47 = vpack.c.bf16 %v785_v39, %v785_v39  ;;  %v788_v48 = vmax.f32 %v570_v40, 0.0  ;;  %v562_v49 = vadd.f32 %v2143_v55, %v561_v42  ;;  %v1655_v50 = vpack.c.bf16 %v833_v41, %v833_v41 }
 0x10c   :  { %v1756_v51 = vpop.f32.mrf.mxu0  ;;  %1196 = vst.msk [vmem:[%s2560_s6 + $0x118] sm:$0xf] %vm1125_vm5, %v1657_v43  ;;  %v836_v52 = vmax.f32 %v762_v44, 0.0  ;;  %v754_v53 = vadd.f32 %v2143_v55, %v753_v45  ;;  %v1311_v54 = vpop.f32.mrf.mxu1 }
 0x10d   :  { %1146 = vst.msk [vmem:[%s2560_s6 + $0x50] sm:$0xf] %vm1125_vm5, %v1607_v47  ;;  %v1610_v56 = vpack.c.bf16 %v788_v48, %v788_v48  ;;  %v786_v57 = vmax.f32 %v562_v49, 0.0  ;;  %v583_v58 = vadd.f32 %v1756_v51, %v2143_v55  ;;  %1194 = vst.msk [vmem:[%s2560_s6 + $0x110] sm:$0xf] %vm1125_vm5, %v1655_v50  ;;  %v1312_v59 = vadd.f32 %v2354_v46, %v1311_v54 }
 0x10e   :  { %v574_v60 = vpop.f32.mrf.mxu0  ;;  %v1658_v61 = vpack.c.bf16 %v836_v52, %v836_v52  ;;  %v834_v62 = vmax.f32 %v754_v53, 0.0  ;;  %v1810_v63 = vpop.f32.mrf.mxu1 }
 0x10f   :  { %1149 = vst.msk [vmem:[%s2560_s6 + $0x5c] sm:$0xf] %vm1125_vm5, %v1610_v56  ;;  %v1608_v0 = vpack.c.bf16 %v786_v57, %v786_v57  ;;  %v791_v1 = vmax.f32 %v583_v58, 0.0  ;;  %v575_v2 = vadd.f32 %v2143_v55, %v574_v60  ;;  %v1349_v3 = vmax.f32 %v1312_v59, 0.0 }
 0x110   :  { %v1757_v4 = vpop.f32.mrf.mxu0  ;;  %1197 = vst.msk [vmem:[%s2560_s6 + $0x11c] sm:$0xf] %vm1125_vm5, %v1658_v61  ;;  %v1656_v5 = vpack.c.bf16 %v834_v62, %v834_v62  ;;  %v1314_v6 = vpop.f32.mrf.mxu1 }
 0x111   :  { %1147 = vst.msk [vmem:[%s2560_s6 + $0x54] sm:$0xf] %vm1125_vm5, %v1608_v0  ;;  %v1613_v7 = vpack.c.bf16 %v791_v1, %v791_v1  ;;  %v789_v8 = vmax.f32 %v575_v2, 0.0  ;;  %v586_v9 = vadd.f32 %v1757_v4, %v2143_v55  ;;  %v1659_v10 = vpack.c.bf16 %v1349_v3, %v1349_v3 }
 0x112   :  { %v577_v11 = vpop.f32.mrf.mxu0  ;;  %1195 = vst.msk [vmem:[%s2560_s6 + $0x114] sm:$0xf] %vm1125_vm5, %v1656_v5  ;;  %v1315_v12 = vadd.f32 %v2354_v46, %v1314_v6  ;;  %v1811_v13 = vpop.f32.mrf.mxu1 }
 0x113   :  { %1152 = vst.msk [vmem:[%s2560_s6 + $0x68] sm:$0xf] %vm1125_vm5, %v1613_v7  ;;  %v1611_v14 = vpack.c.bf16 %v789_v8, %v789_v8  ;;  %v792_v15 = vmax.f32 %v586_v9, 0.0  ;;  %v578_v16 = vadd.f32 %v2143_v55, %v577_v11 }
 0x114   :  { %1396 = vst.msk [vmem:[%s2562_s7] sm:$0xf] %vm1395_vm6, %v1659_v10  ;;  %v1760_v17 = vpop.f32.mrf.mxu0  ;;  %v1350_v18 = vmax.f32 %v1315_v12, 0.0  ;;  %v1319_v19 = vpop.f32.mrf.mxu1 }
 0x115   :  { %1150 = vst.msk [vmem:[%s2560_s6 + $0x60] sm:$0xf] %vm1125_vm5, %v1611_v14  ;;  %v1614_v20 = vpack.c.bf16 %v792_v15, %v792_v15  ;;  %v790_v21 = vmax.f32 %v578_v16, 0.0  ;;  %v599_v22 = vadd.f32 %v1760_v17, %v2143_v55  ;;  %v1320_v23 = vadd.f32 %v2354_v46, %v1319_v19 }
 0x116   :  { %v590_v24 = vpop.f32.mrf.mxu0  ;;  %v1660_v25 = vpack.c.bf16 %v1350_v18, %v1350_v18  ;;  %v1814_v26 = vpop.f32.mrf.mxu1 }
 0x117   :  { %1153 = vst.msk [vmem:[%s2560_s6 + $0x6c] sm:$0xf] %vm1125_vm5, %v1614_v20  ;;  %v1612_v27 = vpack.c.bf16 %v790_v21, %v790_v21  ;;  %v795_v28 = vmax.f32 %v599_v22, 0.0  ;;  %v591_v29 = vadd.f32 %v2143_v55, %v590_v24  ;;  %v1351_v30 = vmax.f32 %v1320_v23, 0.0 }
 0x118   :  { %v1761_v31 = vpop.f32.mrf.mxu0  ;;  %1397 = vst.msk [vmem:[%s2562_s7 + $0x4] sm:$0xf] %vm1395_vm6, %v1660_v25  ;;  %v1322_v32 = vpop.f32.mrf.mxu1 }
 0x119   :  { %1151 = vst.msk [vmem:[%s2560_s6 + $0x64] sm:$0xf] %vm1125_vm5, %v1612_v27  ;;  %v1617_v33 = vpack.c.bf16 %v795_v28, %v795_v28  ;;  %v793_v34 = vmax.f32 %v591_v29, 0.0  ;;  %v602_v35 = vadd.f32 %v1761_v31, %v2143_v55  ;;  %v1661_v36 = vpack.c.bf16 %v1351_v30, %v1351_v30 }
 0x11a   :  { %v593_v37 = vpop.f32.mrf.mxu0  ;;  %v1323_v38 = vadd.f32 %v2354_v46, %v1322_v32  ;;  %v1815_v39 = vpop.f32.mrf.mxu1 }
 0x11b   :  { %1156 = vst.msk [vmem:[%s2560_s6 + $0x78] sm:$0xf] %vm1125_vm5, %v1617_v33  ;;  %v1615_v40 = vpack.c.bf16 %v793_v34, %v793_v34  ;;  %v796_v41 = vmax.f32 %v602_v35, 0.0  ;;  %v594_v42 = vadd.f32 %v2143_v55, %v593_v37 }
 0x11c   :  { %1398 = vst.msk [vmem:[%s2562_s7 + $0x8] sm:$0xf] %vm1395_vm6, %v1661_v36  ;;  %v1764_v43 = vpop.f32.mrf.mxu0  ;;  %v1352_v44 = vmax.f32 %v1323_v38, 0.0  ;;  %v1327_v45 = vpop.f32.mrf.mxu1 }
 0x11d   :  { %1154 = vst.msk [vmem:[%s2560_s6 + $0x70] sm:$0xf] %vm1125_vm5, %v1615_v40  ;;  %v1618_v47 = vpack.c.bf16 %v796_v41, %v796_v41  ;;  %v794_v48 = vmax.f32 %v594_v42, 0.0  ;;  %v615_v49 = vadd.f32 %v1764_v43, %v2143_v55  ;;  %v1328_v50 = vadd.f32 %v2354_v46, %v1327_v45 }
 0x11e   :  { %v606_v51 = vpop.f32.mrf.mxu0  ;;  %v1662_v52 = vpack.c.bf16 %v1352_v44, %v1352_v44  ;;  %v1818_v53 = vpop.f32.mrf.mxu1 }
 0x11f   :  { %1157 = vst.msk [vmem:[%s2560_s6 + $0x7c] sm:$0xf] %vm1125_vm5, %v1618_v47  ;;  %v1616_v54 = vpack.c.bf16 %v794_v48, %v794_v48  ;;  %v799_v56 = vmax.f32 %v615_v49, 0.0  ;;  %v607_v57 = vadd.f32 %v2143_v55, %v606_v51  ;;  %v1353_v58 = vmax.f32 %v1328_v50, 0.0 }
 0x120   :  { %v1765_v59 = vpop.f32.mrf.mxu0  ;;  %1399 = vst.msk [vmem:[%s2562_s7 + $0xc] sm:$0xf] %vm1395_vm6, %v1662_v52  ;;  %v1330_v60 = vpop.f32.mrf.mxu1 }
 0x121   :  { %1155 = vst.msk [vmem:[%s2560_s6 + $0x74] sm:$0xf] %vm1125_vm5, %v1616_v54  ;;  %v1621_v61 = vpack.c.bf16 %v799_v56, %v799_v56  ;;  %v797_v62 = vmax.f32 %v607_v57, 0.0  ;;  %v618_v63 = vadd.f32 %v1765_v59, %v2143_v55  ;;  %v1663_v0 = vpack.c.bf16 %v1353_v58, %v1353_v58 }
 0x122   :  { %v609_v1 = vpop.f32.mrf.mxu0  ;;  %v1331_v2 = vadd.f32 %v2354_v46, %v1330_v60  ;;  %v1819_v3 = vpop.f32.mrf.mxu1 }
 0x123   :  { %1160 = vst.msk [vmem:[%s2560_s6 + $0x88] sm:$0xf] %vm1125_vm5, %v1621_v61  ;;  %v1619_v4 = vpack.c.bf16 %v797_v62, %v797_v62  ;;  %v800_v5 = vmax.f32 %v618_v63, 0.0  ;;  %v610_v6 = vadd.f32 %v2143_v55, %v609_v1 }
 0x124   :  { %1400 = vst.msk [vmem:[%s2562_s7 + $0x10] sm:$0xf] %vm1395_vm6, %v1663_v0  ;;  %v1768_v7 = vpop.f32.mrf.mxu0  ;;  %v1354_v8 = vmax.f32 %v1331_v2, 0.0  ;;  %v1335_v9 = vpop.f32.mrf.mxu1 }
 0x125   :  { %1158 = vst.msk [vmem:[%s2560_s6 + $0x80] sm:$0xf] %vm1125_vm5, %v1619_v4  ;;  %v1622_v10 = vpack.c.bf16 %v800_v5, %v800_v5  ;;  %v798_v11 = vmax.f32 %v610_v6, 0.0  ;;  %v631_v12 = vadd.f32 %v1768_v7, %v2143_v55  ;;  %v1336_v13 = vadd.f32 %v2354_v46, %v1335_v9 }
 0x126   :  { %v622_v14 = vpop.f32.mrf.mxu0  ;;  %v1664_v15 = vpack.c.bf16 %v1354_v8, %v1354_v8  ;;  %v1822_v16 = vpop.f32.mrf.mxu1 }
 0x127   :  { %1161 = vst.msk [vmem:[%s2560_s6 + $0x8c] sm:$0xf] %vm1125_vm5, %v1622_v10  ;;  %v1620_v17 = vpack.c.bf16 %v798_v11, %v798_v11  ;;  %v803_v18 = vmax.f32 %v631_v12, 0.0  ;;  %v623_v19 = vadd.f32 %v2143_v55, %v622_v14  ;;  %v1355_v20 = vmax.f32 %v1336_v13, 0.0 }
 0x128   :  { %v1769_v21 = vpop.f32.mrf.mxu0  ;;  %1401 = vst.msk [vmem:[%s2562_s7 + $0x14] sm:$0xf] %vm1395_vm6, %v1664_v15  ;;  %v1338_v22 = vpop.f32.mrf.mxu1 }
 0x129   :  { %1159 = vst.msk [vmem:[%s2560_s6 + $0x84] sm:$0xf] %vm1125_vm5, %v1620_v17  ;;  %v1625_v23 = vpack.c.bf16 %v803_v18, %v803_v18  ;;  %v801_v24 = vmax.f32 %v623_v19, 0.0  ;;  %v634_v25 = vadd.f32 %v1769_v21, %v2143_v55  ;;  %v1665_v26 = vpack.c.bf16 %v1355_v20, %v1355_v20 }
 0x12a   :  { %v625_v27 = vpop.f32.mrf.mxu0  ;;  %v1339_v28 = vadd.f32 %v2354_v46, %v1338_v22  ;;  %v1823_v29 = vpop.f32.mrf.mxu1 }
 0x12b   :  { %1164 = vst.msk [vmem:[%s2560_s6 + $0x98] sm:$0xf] %vm1125_vm5, %v1625_v23  ;;  %v1623_v30 = vpack.c.bf16 %v801_v24, %v801_v24  ;;  %v804_v31 = vmax.f32 %v634_v25, 0.0  ;;  %v626_v32 = vadd.f32 %v2143_v55, %v625_v27 }
 0x12c   :  { %1402 = vst.msk [vmem:[%s2562_s7 + $0x18] sm:$0xf] %vm1395_vm6, %v1665_v26  ;;  %v1772_v33 = vpop.f32.mrf.mxu0  ;;  %v1356_v34 = vmax.f32 %v1339_v28, 0.0  ;;  %v1343_v35 = vpop.f32.mrf.mxu1 }
 0x12d   :  { %1162 = vst.msk [vmem:[%s2560_s6 + $0x90] sm:$0xf] %vm1125_vm5, %v1623_v30  ;;  %v1626_v36 = vpack.c.bf16 %v804_v31, %v804_v31  ;;  %v802_v37 = vmax.f32 %v626_v32, 0.0  ;;  %v647_v38 = vadd.f32 %v1772_v33, %v2143_v55  ;;  %v1344_v39 = vadd.f32 %v2354_v46, %v1343_v35 }
 0x12e   :  { %v638_v40 = vpop.f32.mrf.mxu0  ;;  %v1666_v41 = vpack.c.bf16 %v1356_v34, %v1356_v34  ;;  %v1826_v42 = vpop.f32.mrf.mxu1 }
 0x12f   :  { %1165 = vst.msk [vmem:[%s2560_s6 + $0x9c] sm:$0xf] %vm1125_vm5, %v1626_v36  ;;  %v1624_v43 = vpack.c.bf16 %v802_v37, %v802_v37  ;;  %v807_v44 = vmax.f32 %v647_v38, 0.0  ;;  %v639_v45 = vadd.f32 %v2143_v55, %v638_v40  ;;  %v1357_v47 = vmax.f32 %v1344_v39, 0.0 }
 0x130   :  { %v1773_v48 = vpop.f32.mrf.mxu0  ;;  %1403 = vst.msk [vmem:[%s2562_s7 + $0x1c] sm:$0xf] %vm1395_vm6, %v1666_v41  ;;  %v1346_v46 = vpop.f32.mrf.mxu1 }
 0x131   :  { %1163 = vst.msk [vmem:[%s2560_s6 + $0x94] sm:$0xf] %vm1125_vm5, %v1624_v43  ;;  %v1629_v49 = vpack.c.bf16 %v807_v44, %v807_v44  ;;  %v805_v50 = vmax.f32 %v639_v45, 0.0  ;;  %v650_v51 = vadd.f32 %v1773_v48, %v2143_v55  ;;  %v1667_v52 = vpack.c.bf16 %v1357_v47, %v1357_v47 }
 0x132   :  { %v641_v53 = vpop.f32.mrf.mxu0  ;;  %v1827_v54 = vpop.f32.mrf.mxu1 }
 0x133   :  { %1168 = vst.msk [vmem:[%s2560_s6 + $0xa8] sm:$0xf] %vm1125_vm5, %v1629_v49  ;;  %v1627_v56 = vpack.c.bf16 %v805_v50, %v805_v50  ;;  %v808_v57 = vmax.f32 %v650_v51, 0.0  ;;  %v642_v58 = vadd.f32 %v2143_v55, %v641_v53 }
 0x134   :  { %1404 = vst.msk [vmem:[%s2562_s7 + $0x20] sm:$0xf] %vm1395_vm6, %v1667_v52  ;;  %v1776_v59 = vpop.f32.mrf.mxu0 }
 0x135   :  { %1166 = vst.msk [vmem:[%s2560_s6 + $0xa0] sm:$0xf] %vm1125_vm5, %v1627_v56  ;;  %v1630_v60 = vpack.c.bf16 %v808_v57, %v808_v57  ;;  %v806_v61 = vmax.f32 %v642_v58, 0.0  ;;  %v663_v62 = vadd.f32 %v1776_v59, %v2143_v55 }
 0x136   :  { %v654_v63 = vpop.f32.mrf.mxu0 }
 0x137   :  { %1169 = vst.msk [vmem:[%s2560_s6 + $0xac] sm:$0xf] %vm1125_vm5, %v1630_v60  ;;  %v1628_v0 = vpack.c.bf16 %v806_v61, %v806_v61  ;;  %v811_v1 = vmax.f32 %v663_v62, 0.0  ;;  %v655_v2 = vadd.f32 %v2143_v55, %v654_v63 }
 0x138   :  { %v1777_v3 = vpop.f32.mrf.mxu0 }
 0x139   :  { %1167 = vst.msk [vmem:[%s2560_s6 + $0xa4] sm:$0xf] %vm1125_vm5, %v1628_v0  ;;  %v1633_v4 = vpack.c.bf16 %v811_v1, %v811_v1  ;;  %v809_v5 = vmax.f32 %v655_v2, 0.0  ;;  %v666_v6 = vadd.f32 %v1777_v3, %v2143_v55 }
 0x13a   :  { %v657_v7 = vpop.f32.mrf.mxu0 }
 0x13b   :  { %1172 = vst.msk [vmem:[%s2560_s6 + $0xb8] sm:$0xf] %vm1125_vm5, %v1633_v4  ;;  %v1631_v8 = vpack.c.bf16 %v809_v5, %v809_v5  ;;  %v812_v9 = vmax.f32 %v666_v6, 0.0  ;;  %v658_v10 = vadd.f32 %v2143_v55, %v657_v7 }
 0x13d   :  { %1170 = vst.msk [vmem:[%s2560_s6 + $0xb0] sm:$0xf] %vm1125_vm5, %v1631_v8  ;;  %v1634_v11 = vpack.c.bf16 %v812_v9, %v812_v9  ;;  %v810_v12 = vmax.f32 %v658_v10, 0.0 }
 0x13f   :  { %1173 = vst.msk [vmem:[%s2560_s6 + $0xbc] sm:$0xf] %vm1125_vm5, %v1634_v11  ;;  %v1632_v13 = vpack.c.bf16 %v810_v12, %v810_v12 }
 0x141   :  { %1171 = vst.msk [vmem:[%s2560_s6 + $0xb4] sm:$0xf] %vm1125_vm5, %v1632_v13 }

// kernel: net_forward.3
= control target key start
LH: loop header
LB: loop body
LE: loop exit
PB: predicated region body
PF: predicated region fallthrough
CT: control target
= control target key end

     0   :  { %vm401_vm0 = vcmask 1043456   ;;  %vm388_vm1 = vcmask 982016   ;;  %vm909_vm2 = vcmask 523264   ;;  %s8873_s0 = inlined_call_operand.vmem [shape: bf16[64,504], index: 0, kind: input, shape index: {}]   ;;  %s8874_s1 = inlined_call_operand.vmem [shape: bf16[504,16], index: 1, kind: input, shape index: {}]   ;;  %s8875_s2 = inlined_call_operand.vmem [shape: f32[1,16], index: 2, kind: input, shape index: {}]   ;;  %s8876_s3 = inlined_call_operand.vmem [shape: bf16[32,576], index: 3, kind: input, shape index: {}]   ;;  %s8877_s4 = inlined_call_operand.vmem [shape: bf16[576,128], index: 4, kind: input, shape index: {}]   ;;  %s8878_s5 = inlined_call_operand.vmem [shape: f32[1,128], index: 5, kind: input, shape index: {}]   ;;  %s8879_s6 = inlined_call_operand.vmem [shape: f32[32,16,8], index: 6, kind: input, shape index: {}]   ;;  %s8880_s7 = inlined_call_operand.vmem [shape: f32[16,128,8], index: 7, kind: input, shape index: {}]   ;;  %s8881_s8 = inlined_call_operand.vmem [shape: f32[1,8], index: 8, kind: input, shape index: {}]   ;;  %s8882_s9 = inlined_call_operand.vmem [shape: f32[64,16], index: 9, kind: output, shape index: {0}]   ;;  %s8883_s10 = inlined_call_operand.vmem [shape: f32[32,128], index: 10, kind: output, shape index: {1}]   ;;  %s8884_s11 = inlined_call_operand.hbm [shape: f32[2,8], index: 11, kind: output, shape index: {2}]  }
   0x1   :  { %v6766_v0 = vld [vmem:[%s8874_s1 + $0x78] sm:$0xff]   ;;  %v6770_v4 = vld [vmem:[%s8874_s1 + $0x70] sm:$0xff]   ;;  %v6774_v8 = vld [vmem:[%s8874_s1 + $0x68] sm:$0xff]  }
   0x2   :  { %v6767_v1 = vld [vmem:[%s8874_s1 + $0xf8] ss:$0 sps:$4 sm:$0xff]   ;;  %5456 = vmatprep.subr.bf16.mxu0 %v6766_v0  ;;  %v6771_v5 = vld [vmem:[%s8874_s1 + $0xf0] sm:$0xff]   ;;  %v6775_v9 = vld [vmem:[%s8874_s1 + $0xe8] sm:$0xff]  }
   0x3   :  { %v6768_v2 = vld [vmem:[%s8874_s1 + $0x38] sm:$0xff]   ;;  %6762 = vmatprep.subr.msk.bf16.mxu1 %vm401_vm0, %v6767_v1  ;;  %v6772_v6 = vld [vmem:[%s8874_s1 + $0x30] sm:$0xff]   ;;  %v6776_v10 = vld [vmem:[%s8874_s1 + $0x28] sm:$0xff]  }
   0x4   :  { %v6769_v3 = vld [vmem:[%s8874_s1 + $0xb8] sm:$0xff]   ;;  %5457 = vmatpush3.bf16.msra.mxu0 %v6768_v2  ;;  %v6773_v7 = vld [vmem:[%s8874_s1 + $0xb0] sm:$0xff]   ;;  %v6777_v11 = vld [vmem:[%s8874_s1 + $0xa8] sm:$0xff]  }
   0x5   :  { %5497 = vmatpush3.bf16.msra.mxu1 %v6769_v3  ;;  %5458 = vmatprep.subr.bf16.mxu0 %v6770_v4  ;;  %v6778_v12 = vld [vmem:[%s8874_s1 + $0x60] sm:$0xff]   ;;  %v6782_v16 = vld [vmem:[%s8874_s1 + $0x58] sm:$0xff]   ;;  %v6786_v20 = vld [vmem:[%s8874_s1 + $0x50] sm:$0xff]  }
   0x6   :  { %5498 = vmatprep.subr.bf16.mxu1 %v6771_v5  ;;  %v6779_v13 = vld [vmem:[%s8874_s1 + $0xe0] sm:$0xff]   ;;  %v6783_v17 = vld [vmem:[%s8874_s1 + $0xd8] sm:$0xff]   ;;  %v6787_v21 = vld [vmem:[%s8874_s1 + $0xd0] sm:$0xff]  }
   0x7   :  { %v6780_v14 = vld [vmem:[%s8874_s1 + $0x20] sm:$0xff]   ;;  %v6784_v18 = vld [vmem:[%s8874_s1 + $0x18] sm:$0xff]   ;;  %v6788_v22 = vld [vmem:[%s8874_s1 + $0x10] sm:$0xff]  }
   0x8   :  { %5459 = vmatpush3.bf16.msra.mxu0 %v6772_v6  ;;  %v6781_v15 = vld [vmem:[%s8874_s1 + $0xa0] sm:$0xff]   ;;  %v6785_v19 = vld [vmem:[%s8874_s1 + $0x98] sm:$0xff]   ;;  %v6789_v23 = vld [vmem:[%s8874_s1 + $0x90] sm:$0xff]  }
   0x9   :  { %5499 = vmatpush3.bf16.msra.mxu1 %v6773_v7  ;;  %5460 = vmatprep.subr.bf16.mxu0 %v6774_v8  ;;  %v6790_v24 = vld [vmem:[%s8874_s1 + $0x48] sm:$0xff]   ;;  %v6794_v28 = vld [vmem:[%s8874_s1 + $0x40] sm:$0xff]   ;;  %v6816_v42 = vld [vmem:[%s8877_s4 + $0x78] sm:$0xff]  }
   0xa   :  { %5500 = vmatprep.subr.bf16.mxu1 %v6775_v9  ;;  %v6791_v25 = vld [vmem:[%s8874_s1 + $0xc8] sm:$0xff]   ;;  %v6795_v29 = vld [vmem:[%s8874_s1 + $0xc0] sm:$0xff]   ;;  %v6817_v43 = vld [vmem:[%s8877_s4 + $0x38] sm:$0xff]  }
   0xb   :  { %v6792_v26 = vld [vmem:[%s8874_s1 + $0x8] sm:$0xff]   ;;  %v6796_v30 = vld [vmem:[%s8874_s1] sm:$0xff]   ;;  %v6818_v44 = vld [vmem:[%s8877_s4 + $0x70] sm:$0xff]  }
   0xc   :  { %5461 = vmatpush3.bf16.msra.mxu0 %v6776_v10  ;;  %v6793_v27 = vld [vmem:[%s8874_s1 + $0x88] sm:$0xff]   ;;  %v6797_v31 = vld [vmem:[%s8874_s1 + $0x80] sm:$0xff]   ;;  %v6819_v45 = vld [vmem:[%s8877_s4 + $0x30] sm:$0xff]  }
   0xd   :  { %5501 = vmatpush3.bf16.msra.mxu1 %v6777_v11  ;;  %5462 = vmatprep.subr.bf16.mxu0 %v6778_v12  ;;  %v6798_v32 = vld [vmem:[%s8873_s0] ss:$16 sps:$4 sm:$0xff]   ;;  %v6800_v33 = vld [vmem:[%s8873_s0 + $0x4] ss:$16 sps:$4 sm:$0xff]   ;;  %v6801_v34 = vld [vmem:[%s8873_s0 + $0x8] ss:$16 sps:$4 sm:$0xff]  }
   0xe   :  { %5502 = vmatprep.subr.bf16.mxu1 %v6779_v13  ;;  %437 = vmatprep.mubr.bf16.mxu0 %v6800_v33  ;;  %v6803_v35 = vld [vmem:[%s8873_s0 + $0xc] ss:$16 sps:$4 sm:$0xff]   ;;  %v6804_v36 = vld [vmem:[%s8873_s0 + $0x24] ss:$16 sps:$4 sm:$0xff]   ;;  %v6806_v38 = vld [vmem:[%s8873_s0 + $0x20] ss:$16 sps:$4 sm:$0xff]  }
   0xf   :  { %5068 = vmatprep.mubr.msk.bf16.mxu1 %vm388_vm1, %v6803_v35  ;;  %v6807_v37 = vld [vmem:[%s8873_s0 + $0x2c] ss:$16 sps:$4 sm:$0xff]   ;;  %v6809_v39 = vld [vmem:[%s8873_s0 + $0x28] ss:$16 sps:$4 sm:$0xff]   ;;  %v6810_v40 = vld [vmem:[%s8873_s0 + $0x44] ss:$16 sps:$4 sm:$0xff]  }
  0x10   :  { %5463 = vmatpush3.bf16.msra.mxu0 %v6780_v14  ;;  %v6813_v41 = vld [vmem:[%s8873_s0 + $0x4c] ss:$16 sps:$4 sm:$0xff]   ;;  %v6812_v47 = vld [vmem:[%s8873_s0 + $0x40] ss:$16 sps:$4 sm:$0xff]   ;;  %v6821_v48 = vld [vmem:[%s8873_s0 + $0x64] ss:$16 sps:$4 sm:$0xff]  }
  0x11   :  { %5503 = vmatpush3.bf16.msra.mxu1 %v6781_v15  ;;  %5464 = vmatprep.subr.bf16.mxu0 %v6782_v16  ;;  %v6820_v46 = vld [vmem:[%s8877_s4 + $0x68] sm:$0xff]   ;;  %v6828_v52 = vld [vmem:[%s8877_s4 + $0x60] sm:$0xff]   ;;  %v6829_v53 = vld [vmem:[%s8877_s4 + $0xf8] sm:$0xff]  }
  0x12   :  { %5504 = vmatprep.subr.bf16.mxu1 %v6783_v17  ;;  %v6815_v49 = vld [vmem:[%s8873_s0 + $0x48] ss:$16 sps:$4 sm:$0xff]   ;;  %v6825_v51 = vld [vmem:[%s8873_s0 + $0x6c] ss:$16 sps:$4 sm:$0xff]   ;;  %v6830_v54 = vld [vmem:[%s8877_s4 + $0x20] sm:$0xff]  }
  0x13   :  { %v6823_v50 = vld [vmem:[%s8877_s4 + $0x28] sm:$0xff]   ;;  %v6831_v55 = vld [vmem:[%s8877_s4 + $0xb8] sm:$0xff]   ;;  %v6824_v56 = vld [vmem:[%s8873_s0 + $0x60] ss:$16 sps:$4 sm:$0xff]  }
  0x14   :  { %5465 = vmatpush3.bf16.msra.mxu0 %v6784_v18  ;;  %v6832_v57 = vld [vmem:[%s8877_s4 + $0x58] sm:$0xff]   ;;  %v6833_v58 = vld [vmem:[%s8877_s4 + $0xf0] sm:$0xff]   ;;  %v6837_v63 = vld [vmem:[%s8877_s4 + $0xe8] sm:$0xff]  }
  0x15   :  { %5505 = vmatpush3.bf16.msra.mxu1 %v6785_v19  ;;  %5466 = vmatprep.subr.bf16.mxu0 %v6786_v20  ;;  %v6827_v59 = vld [vmem:[%s8873_s0 + $0x68] ss:$16 sps:$4 sm:$0xff]   ;;  %v6835_v61 = vld [vmem:[%s8877_s4 + $0xb0] sm:$0xff]   ;;  %v6841_v3 = vld [vmem:[%s8877_s4 + $0xe0] sm:$0xff]  }
  0x16   :  { %5506 = vmatprep.subr.bf16.mxu1 %v6787_v21  ;;  %v6834_v60 = vld [vmem:[%s8877_s4 + $0x18] sm:$0xff]   ;;  %v6836_v62 = vld [vmem:[%s8877_s4 + $0x50] sm:$0xff]   ;;  %v6839_v1 = vld [vmem:[%s8877_s4 + $0xa8] sm:$0xff]  }
  0x17   :  { %v6838_v0 = vld [vmem:[%s8877_s4 + $0x10] sm:$0xff]   ;;  %v6840_v2 = vld [vmem:[%s8877_s4 + $0x48] sm:$0xff]   ;;  %v6843_v5 = vld [vmem:[%s8877_s4 + $0xa0] sm:$0xff]  }
  0x18   :  { %5467 = vmatpush3.bf16.msra.mxu0 %v6788_v22  ;;  %v6842_v4 = vld [vmem:[%s8877_s4 + $0x8] sm:$0xff]   ;;  %v6844_v6 = vld [vmem:[%s8877_s4 + $0x40] sm:$0xff]   ;;  %v6845_v7 = vld [vmem:[%s8877_s4 + $0xd8] sm:$0xff]  }
  0x19   :  { %5507 = vmatpush3.bf16.msra.mxu1 %v6789_v23  ;;  %5468 = vmatprep.subr.bf16.mxu0 %v6790_v24  ;;  %v6846_v8 = vld [vmem:[%s8877_s4] sm:$0xff]   ;;  %v6847_v9 = vld [vmem:[%s8877_s4 + $0x98] sm:$0xff]   ;;  %v6851_v12 = vld [vmem:[%s8877_s4 + $0xd0] sm:$0xff]  }
  0x1a   :  { %5508 = vmatprep.subr.bf16.mxu1 %v6791_v25  ;;  %v6848_v10 = vld [vmem:[%s8876_s3] ss:$20 sps:$4 sm:$0xff]   ;;  %v6850_v11 = vld [vmem:[%s8876_s3 + $0x4] ss:$20 sps:$4 sm:$0xff]   ;;  %v6854_v15 = vld [vmem:[%s8877_s4 + $0xc8] sm:$0xff]  }
  0x1b   :  { %v6852_v13 = vld [vmem:[%s8877_s4 + $0x118] sm:$0xff]   ;;  %v6853_v14 = vld [vmem:[%s8877_s4 + $0x90] sm:$0xff]   ;;  %v6856_v17 = vld [vmem:[%s8877_s4 + $0x88] sm:$0xff]  }
  0x1c   :  { %5469 = vmatpush3.bf16.msra.mxu0 %v6792_v26  ;;  %v6855_v16 = vld [vmem:[%s8877_s4 + $0x110] sm:$0xff]   ;;  %v6857_v18 = vld [vmem:[%s8876_s3 + $0x2c] ss:$20 sps:$4 sm:$0xff]   ;;  %v6859_v19 = vld [vmem:[%s8876_s3 + $0x28] ss:$20 sps:$4 sm:$0xff]  }
  0x1d   :  { %5509 = vmatpush3.bf16.msra.mxu1 %v6793_v27  ;;  %5470 = vmatprep.subr.bf16.mxu0 %v6794_v28  ;;  %v6860_v20 = vld [vmem:[%s8877_s4 + $0xc0] sm:$0xff]   ;;  %v6861_v21 = vld [vmem:[%s8877_s4 + $0x108] sm:$0xff]  }
  0x1e   :  { %5510 = vmatprep.subr.bf16.mxu1 %v6795_v29  ;;  %v6862_v22 = vld [vmem:[%s8877_s4 + $0x80] sm:$0xff]   ;;  %v6863_v23 = vld [vmem:[%s8876_s3 + $0x8] ss:$20 sps:$4 sm:$0xff]  }
  0x1f   :  { %v6865_v24 = vld [vmem:[%s8876_s3 + $0xc] ss:$20 sps:$4 sm:$0xff]   ;;  %v6867_v26 = vld [vmem:[%s8876_s3 + $0x10] ss:$20 sps:$4 sm:$0xff]   ;;  %v6869_v27 = vld [vmem:[%s8876_s3 + $0x34] ss:$20 sps:$4 sm:$0xff]  }
  0x20   :  { %5471 = vmatpush3.bf16.msra.mxu0 %v6796_v30  ;;  %v6866_v25 = vld [vmem:[%s8877_s4 + $0x100] sm:$0xff]  }
  0x21   :  { %5511 = vmatpush3.bf16.msra.mxu1 %v6797_v31  ;;  %5536 = vmatprep.subr.bf16.mxu0 %v6816_v42 }
  0x22   :  { %5564 = vmatprep.subr.bf16.mxu1 %v6829_v53 }
  0x23   :  { %438 = vmatmul.mubr.bf16.vlgmr.msra.gmra.mxu0 %v6798_v32 }
  0x24   :  { %503 = vmatmul.mubr.bf16.vlgmr.msra.gmra.mxu1 %v6801_v34  ;;  %445 = vmatprep.mubr.bf16.mxu0 %v6804_v36 }
  0x25   :  { %5069 = vmatprep.mubr.msk.bf16.mxu1 %vm388_vm1, %v6807_v37  ;;  %5537 = vmatpush3.bf16.msra.mxu0 %v6817_v43 }
  0x26   :  { %5538 = vmatprep.subr.bf16.mxu0 %v6818_v44  ;;  %5565 = vmatpush3.bf16.msra.mxu1 %v6831_v55 }
  0x27   :  { %5566 = vmatprep.subr.bf16.mxu1 %v6833_v58 }
  0x29   :  { %5539 = vmatpush3.bf16.msra.mxu0 %v6819_v45 }
  0x2a   :  { %5540 = vmatprep.subr.bf16.mxu0 %v6820_v46  ;;  %5567 = vmatpush3.bf16.msra.mxu1 %v6835_v61 }
  0x2b   :  { %446 = vmatmul.mubr.bf16.gmra.mxu0 %v6806_v38  ;;  %5568 = vmatprep.subr.bf16.mxu1 %v6837_v63 }
  0x2c   :  { %453 = vmatprep.mubr.bf16.mxu0 %v6810_v40  ;;  %511 = vmatmul.mubr.bf16.gmra.mxu1 %v6809_v39 }
  0x2d   :  { %5070 = vmatprep.mubr.msk.bf16.mxu1 %vm388_vm1, %v6813_v41  ;;  %5541 = vmatpush3.bf16.msra.mxu0 %v6823_v50 }
  0x2e   :  { %5542 = vmatprep.subr.bf16.mxu0 %v6828_v52  ;;  %5569 = vmatpush3.bf16.msra.mxu1 %v6839_v1 }
  0x2f   :  { %5570 = vmatprep.subr.bf16.mxu1 %v6841_v3 }
  0x31   :  { %5543 = vmatpush3.bf16.msra.mxu0 %v6830_v54 }
  0x32   :  { %5544 = vmatprep.subr.bf16.mxu0 %v6832_v57  ;;  %5571 = vmatpush3.bf16.msra.mxu1 %v6843_v5 }
  0x33   :  { %454 = vmatmul.mubr.bf16.gmra.mxu0 %v6812_v47  ;;  %5572 = vmatprep.subr.bf16.mxu1 %v6845_v7 }
  0x34   :  { %461 = vmatprep.mubr.bf16.mxu0 %v6821_v48  ;;  %519 = vmatmul.mubr.bf16.gmra.mxu1 %v6815_v49 }
  0x35   :  { %5071 = vmatprep.mubr.msk.bf16.mxu1 %vm388_vm1, %v6825_v51  ;;  %5545 = vmatpush3.bf16.msra.mxu0 %v6834_v60 }
  0x36   :  { %5546 = vmatprep.subr.bf16.mxu0 %v6836_v62  ;;  %5573 = vmatpush3.bf16.msra.mxu1 %v6847_v9 }
  0x37   :  { %5574 = vmatprep.subr.bf16.mxu1 %v6851_v12 }
  0x39   :  { %5547 = vmatpush3.bf16.msra.mxu0 %v6838_v0 }
  0x3a   :  { %5548 = vmatprep.subr.bf16.mxu0 %v6840_v2  ;;  %5575 = vmatpush3.bf16.msra.mxu1 %v6853_v14 }
  0x3b   :  { %462 = vmatmul.mubr.bf16.gmra.mxu0 %v6824_v56  ;;  %5576 = vmatprep.subr.bf16.mxu1 %v6854_v15 }
  0x3c   :  { %527 = vmatmul.mubr.bf16.gmra.mxu1 %v6827_v59  ;;  %948 = vmatprep.mubr.bf16.mxu0 %v6850_v11 }
  0x3d   :  { %5549 = vmatpush3.bf16.msra.mxu0 %v6842_v4  ;;  %997 = vmatprep.mubr.bf16.mxu1 %v6865_v24 }
  0x3e   :  { %5550 = vmatprep.subr.bf16.mxu0 %v6844_v6  ;;  %5577 = vmatpush3.bf16.msra.mxu1 %v6856_v17 }
  0x3f   :  { %5578 = vmatprep.subr.bf16.mxu1 %v6860_v20 }
  0x41   :  { %5551 = vmatpush3.bf16.msra.mxu0 %v6846_v8 }
  0x42   :  { %5966 = vmatprep.subr.bf16.mxu0 %v6852_v13  ;;  %5579 = vmatpush3.bf16.msra.mxu1 %v6862_v22 }
  0x44   :  { %949 = vmatmul.mubr.bf16.vlgmr.msra.gmra.mxu0 %v6848_v10 }
  0x45   :  { %5967 = vmatpush3.bf16.msra.mxu0 %v6852_v13  ;;  %956 = vmatprep.mubr.bf16.mxu0 %v6857_v18 }
  0x46   :  { %5968 = vmatprep.subr.bf16.mxu0 %v6855_v16 }
  0x49   :  { %5969 = vmatpush3.bf16.msra.mxu0 %v6855_v16 }
  0x4a   :  { %5970 = vmatprep.subr.bf16.mxu0 %v6861_v21 }
  0x4c   :  { %957 = vmatmul.mubr.bf16.gmra.mxu0 %v6859_v19 }
  0x4d   :  { %5971 = vmatpush3.bf16.msra.mxu0 %v6861_v21  ;;  %5974 = vmatprep.mubr.msk.bf16.mxu0 %vm909_vm2, %v6867_v26 }
  0x4e   :  { %5972 = vmatprep.subr.bf16.mxu0 %v6866_v25 }
  0x4f   :  { %17 = vsyncpa [#allocation3], 0  ;;  %998 = vmatmul.mubr.bf16.vlgmr.msra.gmra.mxu1 %v6863_v23  ;;  %v6868_v28 = vld [vmem:[%s8876_s3 + $0x38] ss:$20 sps:$4 sm:$0xff]   ;;  %v6871_v29 = vld [vmem:[%s8876_s3 + $0x30] ss:$20 sps:$4 sm:$0xff]  }
  0x50   :  { %1005 = vmatprep.mubr.bf16.mxu1 %v6869_v27  ;;  %v5122_v30 = vld [vmem:[%s8879_s6 + $0x18] sm:$0xff]  ;;  %v6894_v31 = vmov 0.0   ;;  %v5121_v32 = vld [vmem:[%s8879_s6 + $0x10] sm:$0xff]  ;;  %v5126_v33 = vld [vmem:[%s8879_s6 + $0x28] sm:$0xff]  ;;  %vm6895_vm3 = vmmov 0   ;;  %vm543_vm4 = vcmask 130048  }
  0x51   :  { %5973 = vmatpush3.bf16.msra.mxu0 %v6866_v25  ;;  %5978 = vmatprep.subr.mxu1 %v6894_v31  ;;  %v5125_v34 = vld [vmem:[%s8879_s6 + $0x20] sm:$0xff]  ;;  %v1073_v6 = vld [vmem:[%s8879_s6 + $0x8] sm:$0xff]  ;;  %v5129_v25 = vld [vmem:[%s8879_s6 + $0x38] sm:$0xff]  ;;  %s6896_s27 = smov [#allocation2]   ;;  %vm4995_vm5 = vcmask 58368  }
  0x52   :  { %5992 = vmatprep.subr.mxu0 %v6894_v31  ;;  %5979 = vmatpush3.msra.mxu1 %v5122_v30  ;;  %v7268_v37 = vld [vmem:[%s8875_s2] ss:$0 sm:$0xff]  ;;  %v5132_v7 = vld [vmem:[%s8879_s6 + $0x48] sm:$0xff] }
  0x53   :  { %5980 = vmatprep.subr.mxu1 %v6894_v31  ;;  %v1072_v14 = vld [vmem:[%s8879_s6] sm:$0xff]  ;;  %v5138_v26 = vld [vmem:[%s8879_s6 + $0x68] sm:$0xff] }
  0x54   :  { %5975 = vmatmul.mubr.msk.bf16.vlgmr.msra.gmra.mxu0 %vm909_vm2, %v6868_v28  ;;  %5981 = vmatpush3.msra.mxu1 %v5121_v32  ;;  %v5131_v15 = vld [vmem:[%s8879_s6 + $0x40] sm:$0xff] }
  0x55   :  { %5993 = vmatpush3.msra.mxu0 %v5126_v33  ;;  %5985 = vmatprep.subr.mxu1 %v6894_v31  ;;  %v5128_v33 = vld [vmem:[%s8879_s6 + $0x30] sm:$0xff] }
  0x56   :  { %5994 = vmatprep.subr.mxu0 %v6894_v31  ;;  %5996 = vmatprep.mubr.msk.f32.mxu0 %vm6895_vm3, %v6894_v31 }
  0x57   :  { %1006 = vmatmul.mubr.bf16.gmra.mxu1 %v6871_v29  ;;  %5995 = vmatpush3.msra.mxu0 %v5125_v34  ;;  %v5137_v34 = vld [vmem:[%s8879_s6 + $0x60] sm:$0xff] }
  0x58   :  { %5982 = vmatprep.mubr.msk.f32.mxu1 %vm6895_vm3, %v6894_v31  ;;  %6006 = vmatprep.subr.mxu0 %v6894_v31 }
  0xe3   :  { %v5472_v35 = vpop.f32.mrf.mxu0 }
  0xe4   :  { %v5512_v36 = vpop.f32.mrf.mxu1 }
  0xe5   :  { %v5473_v38 = vpop.f32.mrf.mxu0 }
  0xe6   :  { %v5474_v39 = vadd.f32 %v5473_v38, %v5472_v35  ;;  %v5513_v40 = vpop.f32.mrf.mxu1 }
  0xe7   :  { %v5475_v41 = vpop.f32.mrf.mxu0  ;;  %v5514_v43 = vadd.f32 %v5513_v40, %v5512_v36 }
  0xe8   :  { %v440_v42 = vadd.f32 %v5474_v39, %v7268_v37  ;;  %v5515_v44 = vpop.f32.mrf.mxu1 }
  0xe9   :  { %v5476_v45 = vpop.f32.mrf.mxu0 }
  0xea   :  { %v505_v46 = vadd.f32 %v5514_v43, %v440_v42  ;;  %v5477_v47 = vadd.f32 %v5476_v45, %v5475_v41  ;;  %v5516_v48 = vpop.f32.mrf.mxu1  ;;  %v5135_v45 = vld [vmem:[%s8879_s6 + $0x58] sm:$0xff] }
  0xeb   :  { %v5478_v49 = vpop.f32.mrf.mxu0  ;;  %v5517_v52 = vadd.f32 %v5516_v48, %v5515_v44 }
  0xec   :  { %v535_v50 = vmax.f32 %v505_v46, 0.0  ;;  %v443_v51 = vadd.f32 %v5477_v47, %v7268_v37  ;;  %v5518_v54 = vpop.f32.mrf.mxu1  ;;  %v5144_v46 = vld [vmem:[%s8879_s6 + $0x88] sm:$0xff] }
  0xed   :  { %v5479_v53 = vpop.f32.mrf.mxu0 }
  0xee   :  { %544 = vst.msk [vmem:[%s8882_s9] sm:$0xff] %vm543_vm4, %v535_v50  ;;  %v508_v55 = vadd.f32 %v5517_v52, %v443_v51  ;;  %v5480_v56 = vadd.f32 %v5479_v53, %v5478_v49  ;;  %v5519_v58 = vpop.f32.mrf.mxu1 }
  0xef   :  { %v5481_v57 = vpop.f32.mrf.mxu0  ;;  %v5520_v61 = vadd.f32 %v5519_v58, %v5518_v54  ;;  %v5134_v54 = vld [vmem:[%s8879_s6 + $0x50] sm:$0xff] }
  0xf0   :  { %v536_v59 = vmax.f32 %v508_v55, 0.0  ;;  %v448_v60 = vadd.f32 %v5480_v56, %v7268_v37  ;;  %v5521_v63 = vpop.f32.mrf.mxu1  ;;  %v5143_v55 = vld [vmem:[%s8879_s6 + $0x80] sm:$0xff] }
  0xf1   :  { %v5482_v62 = vpop.f32.mrf.mxu0 }
  0xf2   :  { %545 = vst.msk [vmem:[%s8882_s9 + $0x8] sm:$0xff] %vm543_vm4, %v536_v59  ;;  %v513_v0 = vadd.f32 %v5520_v61, %v448_v60  ;;  %v5483_v1 = vadd.f32 %v5482_v62, %v5481_v57  ;;  %v5522_v2 = vpop.f32.mrf.mxu1 }
  0xf3   :  { %v5484_v3 = vpop.f32.mrf.mxu0  ;;  %v5523_v8 = vadd.f32 %v5522_v2, %v5521_v63  ;;  %v5141_v63 = vld [vmem:[%s8879_s6 + $0x78] sm:$0xff]  ;;  %v5140_v2 = vld [vmem:[%s8879_s6 + $0x70] sm:$0xff] }
  0xf4   :  { %v537_v4 = vmax.f32 %v513_v0, 0.0  ;;  %v451_v5 = vadd.f32 %v5483_v1, %v7268_v37  ;;  %v5524_v12 = vpop.f32.mrf.mxu1 }
  0xf5   :  { %v1074_v9 = vld [vmem:[%s8882_s9 + $0x2] sm:$0x3]  ;;  %v1224_v10 = vld [vmem:[%s8882_s9 + $0x4] sm:$0x3]  ;;  %v5485_v11 = vpop.f32.mrf.mxu0  ;;  %v1071_v29 = vld [vmem:[%s8882_s9] sm:$0x3] }
  0xf6   :  { %546 = vst.msk [vmem:[%s8882_s9 + $0x10] sm:$0xff] %vm543_vm4, %v537_v4  ;;  %5983 = vmatmul.mubr.msk.f32.vlgmr.msra.gmra.mxu1 %vm543_vm4, %v1074_v9  ;;  %5997 = vmatmul.mubr.msk.f32.vlgmr.msra.gmra.mxu0 %vm543_vm4, %v1224_v10  ;;  %v516_v13 = vadd.f32 %v5523_v8, %v451_v5  ;;  %v5486_v16 = vadd.f32 %v5485_v11, %v5484_v3  ;;  %v5525_v18 = vpop.f32.mrf.mxu1  ;;  %v1302_v50 = vld [vmem:[%s8882_s9 + $0x6] sm:$0x3]  ;;  %v5156_v8 = vld [vmem:[%s8879_s6 + $0xc8] sm:$0xff]  ;;  %v5146_v11 = vld [vmem:[%s8879_s6 + $0x90] sm:$0xff] }
  0xf7   :  { %5986 = vmatpush3.msra.mxu1 %v1073_v6  ;;  %6007 = vmatpush3.msra.mxu0 %v5132_v7  ;;  %v5487_v17 = vpop.f32.mrf.mxu0  ;;  %v5526_v21 = vadd.f32 %v5525_v18, %v5524_v12  ;;  %v5149_v3 = vld [vmem:[%s8879_s6 + $0xa0] sm:$0xff]  ;;  %v5147_v7 = vld [vmem:[%s8879_s6 + $0x98] sm:$0xff] }
  0xf8   :  { %v538_v19 = vmax.f32 %v516_v13, 0.0  ;;  %5987 = vmatprep.subr.mxu1 %v6894_v31  ;;  %6008 = vmatprep.subr.mxu0 %v6894_v31  ;;  %v456_v20 = vadd.f32 %v5486_v16, %v7268_v37  ;;  %v5527_v24 = vpop.f32.mrf.mxu1  ;;  %v5155_v12 = vld [vmem:[%s8879_s6 + $0xc0] sm:$0xff]  ;;  %v5162_v16 = vld [vmem:[%s8879_s6 + $0xe8] sm:$0xff] }
  0xf9   :  { %5988 = vmatpush3.msra.mxu1 %v1072_v14  ;;  %6009 = vmatpush3.msra.mxu0 %v5131_v15  ;;  %v1380_v22 = vld [vmem:[%s8882_s9 + $0x8] sm:$0x3]  ;;  %v5488_v23 = vpop.f32.mrf.mxu0  ;;  %v1536_v51 = vld [vmem:[%s8882_s9 + $0xc] sm:$0x3]  ;;  %v1458_v1 = vld [vmem:[%s8882_s9 + $0xa] sm:$0x3] }
  0xfa   :  { %547 = vst.msk [vmem:[%s8882_s9 + $0x18] sm:$0xff] %vm543_vm4, %v538_v19  ;;  %5989 = vmatprep.mubr.msk.f32.mxu1 %vm6895_vm3, %v6894_v31  ;;  %5999 = vmatprep.subr.mxu1 %v6894_v31  ;;  %v521_v27 = vadd.f32 %v5526_v21, %v456_v20  ;;  %v5489_v28 = vadd.f32 %v5488_v23, %v5487_v17  ;;  %v5528_v30 = vpop.f32.mrf.mxu1  ;;  %v1614_v9 = vld [vmem:[%s8882_s9 + $0xe] sm:$0x3]  ;;  %v5153_v15 = vld [vmem:[%s8879_s6 + $0xb8] sm:$0xff]  ;;  %v5152_v21 = vld [vmem:[%s8879_s6 + $0xb0] sm:$0xff] }
  0xfb   :  { %6010 = vmatprep.mubr.msk.f32.mxu0 %vm6895_vm3, %v6894_v31  ;;  %6020 = vmatprep.subr.mxu0 %v6894_v31  ;;  %v5490_v32 = vpop.f32.mrf.mxu0  ;;  %v5529_v38 = vadd.f32 %v5528_v30, %v5527_v24  ;;  %v7473_v23 = vld [vmem:[%s8878_s5] ss:$0 sm:$0xff]  ;;  %v5168_v30 = vld [vmem:[%s8879_s6 + $0x108] sm:$0xff]  ;;  %s5007_s5 = sshll.u32 %s6896_s27, 4  ;;  %s5008_s5 = int_to_ptr.vmem [resolvable:$true] %s5007_s5 }
  0xfc   :  { %5990 = vmatmul.mubr.msk.f32.vlgmr.msra.gmra.mxu1 %vm543_vm4, %v1071_v29  ;;  %6011 = vmatmul.mubr.msk.f32.vlgmr.msra.gmra.mxu0 %vm543_vm4, %v1380_v22  ;;  %v539_v35 = vmax.f32 %v521_v27, 0.0  ;;  %v459_v36 = vadd.f32 %v5489_v28, %v7268_v37  ;;  %v5530_v40 = vpop.f32.mrf.mxu1  ;;  %v5161_v22 = vld [vmem:[%s8879_s6 + $0xe0] sm:$0xff]  ;;  %v5159_v29 = vld [vmem:[%s8879_s6 + $0xd8] sm:$0xff]  ;;  %s6872_s0 = scalar_lea.vmem %s5008_s5, 32  ;;  %p6877_p1 = scmp.lt.s32.totalorder %s5008_s5, %s5008_s5 }
  0xfd   :  { %6000 = vmatpush3.msra.mxu1 %v5129_v25  ;;  %6021 = vmatpush3.msra.mxu0 %v5138_v26  ;;  %v5491_v39 = vpop.f32.mrf.mxu0  ;;  %v1692_v62 = vld [vmem:[%s8882_s9 + $0x10] sm:$0x3]  ;;  %v1848_v5 = vld [vmem:[%s8882_s9 + $0x14] sm:$0x3]  ;;  %v1770_v17 = vld [vmem:[%s8882_s9 + $0x12] sm:$0x3]  ;;  %p6873_p0 = scmp.ne.s32.totalorder %s5008_s5, %s6872_s0  ;;  %p6878_p2 = scmp.lt.s32.totalorder %s6872_s0, %s6872_s0 }
  0xfe   :  { %6001 = vmatprep.subr.mxu1 %v6894_v31  ;;  %6022 = vmatprep.subr.mxu0 %v6894_v31  ;;  %548 = vst.msk [vmem:[%s8882_s9 + $0x20] sm:$0xff] %vm543_vm4, %v539_v35  ;;  %v524_v41 = vadd.f32 %v5529_v38, %v459_v36  ;;  %v5492_v42 = vadd.f32 %v5491_v39, %v5490_v32  ;;  %v5531_v44 = vpop.f32.mrf.mxu1  ;;  %v5158_v38 = vld [vmem:[%s8879_s6 + $0xd0] sm:$0xff]  ;;  %v5167_v39 = vld [vmem:[%s8879_s6 + $0x100] sm:$0xff] }
  0xff   :  { %6002 = vmatpush3.msra.mxu1 %v5128_v33  ;;  %6023 = vmatpush3.msra.mxu0 %v5137_v34  ;;  %v5493_v43 = vpop.f32.mrf.mxu0  ;;  %v5532_v49 = vadd.f32 %v5531_v44, %v5530_v40  ;;  %v1926_v33 = vld [vmem:[%s8882_s9 + $0x16] sm:$0x3]  ;;  %p6879_p3 = por %p6878_p2, %p6877_p1 }
 0x100   :  { %6003 = vmatprep.mubr.msk.f32.mxu1 %vm6895_vm3, %v6894_v31  ;;  %6013 = vmatprep.subr.mxu1 %v6894_v31  ;;  %v540_v47 = vmax.f32 %v524_v41, 0.0  ;;  %v464_v48 = vadd.f32 %v5492_v42, %v7268_v37  ;;  %v5533_v53 = vpop.f32.mrf.mxu1 }
 0x101   :  { %6024 = vmatprep.mubr.msk.f32.mxu0 %vm6895_vm3, %v6894_v31  ;;  %6034 = vmatprep.subr.mxu0 %v6894_v31  ;;  %v5494_v52 = vpop.f32.mrf.mxu0  ;;  %v2004_v18 = vld [vmem:[%s8882_s9 + $0x18] sm:$0x3]  ;;  %v2160_v34 = vld [vmem:[%s8882_s9 + $0x1c] sm:$0x3]  ;;  %p6880_p4 = pnand %p6879_p3, %p6873_p0 }
 0x102   :  { %6004 = vmatmul.mubr.msk.f32.vlgmr.msra.gmra.mxu1 %vm543_vm4, %v1302_v50  ;;  %6025 = vmatmul.mubr.msk.f32.vlgmr.msra.gmra.mxu0 %vm543_vm4, %v1536_v51  ;;  %549 = vst.msk [vmem:[%s8882_s9 + $0x28] sm:$0xff] %vm543_vm4, %v540_v47  ;;  %v529_v56 = vadd.f32 %v5532_v49, %v464_v48  ;;  %v5495_v57 = vadd.f32 %v5494_v52, %v5493_v43  ;;  %v5534_v58 = vpop.f32.mrf.mxu1  ;;  %v5165_v49 = vld [vmem:[%s8879_s6 + $0xf8] sm:$0xff]  ;;  %v5174_v50 = vld [vmem:[%s8879_s6 + $0x128] sm:$0xff] }
 0x103   :  { %6014 = vmatpush3.msra.mxu1 %v5135_v45  ;;  %6035 = vmatpush3.msra.mxu0 %v5144_v46  ;;  %v5535_v61 = vadd.f32 %v5534_v58, %v5533_v53  ;;  %v2082_v53 = vld [vmem:[%s8882_s9 + $0x1a] sm:$0x3]  ;;  %v5164_v58 = vld [vmem:[%s8879_s6 + $0xf0] sm:$0xff] }
 0x104   :  { %6015 = vmatprep.subr.mxu1 %v6894_v31  ;;  %6036 = vmatprep.subr.mxu0 %v6894_v31  ;;  %v541_v59 = vmax.f32 %v529_v56, 0.0  ;;  %v467_v60 = vadd.f32 %v5495_v57, %v7268_v37  ;;  %v5150_v37 = vld [vmem:[%s8879_s6 + $0xa8] sm:$0xff]  ;;  %v5552_v6 = vpop.f32.mrf.mxu0 }
 0x105   :  { %6016 = vmatpush3.msra.mxu1 %v5134_v54  ;;  %6037 = vmatpush3.msra.mxu0 %v5143_v55  ;;  %v2316_v46 = vld [vmem:[%s8882_s9 + $0x20] sm:$0x3] }
 0x106   :  { %6017 = vmatprep.mubr.msk.f32.mxu1 %vm6895_vm3, %v6894_v31  ;;  %6027 = vmatprep.subr.mxu1 %v6894_v31  ;;  %550 = vst.msk [vmem:[%s8882_s9 + $0x30] sm:$0xff] %vm543_vm4, %v541_v59  ;;  %v532_v0 = vadd.f32 %v5535_v61, %v467_v60  ;;  %v5553_v10 = vpop.f32.mrf.mxu0  ;;  %v5173_v59 = vld [vmem:[%s8879_s6 + $0x120] sm:$0xff] }
 0x107   :  { %6038 = vmatprep.mubr.msk.f32.mxu0 %vm6895_vm3, %v6894_v31  ;;  %6048 = vmatprep.subr.mxu0 %v6894_v31  ;;  %v5554_v19 = vadd.f32 %v5553_v10, %v5552_v6 }
 0x108   :  { %6018 = vmatmul.mubr.msk.f32.vlgmr.msra.gmra.mxu1 %vm543_vm4, %v1458_v1  ;;  %6039 = vmatmul.mubr.msk.f32.vlgmr.msra.gmra.mxu0 %vm543_vm4, %v1692_v62  ;;  %v542_v4 = vmax.f32 %v532_v0, 0.0  ;;  %v5555_v13 = vpop.f32.mrf.mxu0  ;;  %v2472_v1 = vld [vmem:[%s8882_s9 + $0x24] sm:$0x3] }
 0x109   :  { %6028 = vmatpush3.msra.mxu1 %v5141_v63  ;;  %6049 = vmatpush3.msra.mxu0 %v5150_v37  ;;  %v951_v26 = vadd.f32 %v5554_v19, %v7473_v23  ;;  %v2628_v19 = vld [vmem:[%s8882_s9 + $0x28] sm:$0x3] }
 0x10a   :  { %6029 = vmatprep.subr.mxu1 %v6894_v31  ;;  %6050 = vmatprep.subr.mxu0 %v6894_v31  ;;  %551 = vst.msk [vmem:[%s8882_s9 + $0x38] sm:$0xff] %vm543_vm4, %v542_v4  ;;  %v5556_v14 = vpop.f32.mrf.mxu0  ;;  %v5171_v4 = vld [vmem:[%s8879_s6 + $0x118] sm:$0xff] }
 0x10b   :  { %6030 = vmatpush3.msra.mxu1 %v5140_v2  ;;  %6051 = vmatpush3.msra.mxu0 %v5149_v3  ;;  %v5557_v27 = vadd.f32 %v5556_v14, %v5555_v13 }
 0x10c   :  { %6031 = vmatprep.mubr.msk.f32.mxu1 %vm6895_vm3, %v6894_v31  ;;  %6041 = vmatprep.subr.mxu1 %v6894_v31  ;;  %v5558_v20 = vpop.f32.mrf.mxu0 }
 0x10d   :  { %6052 = vmatprep.mubr.msk.f32.mxu0 %vm6895_vm3, %v6894_v31  ;;  %6062 = vmatprep.subr.mxu0 %v6894_v31  ;;  %v954_v41 = vadd.f32 %v5557_v27, %v7473_v23  ;;  %v5182_v27 = vld [vmem:[%s8879_s6 + $0x150] sm:$0xff] }
 0x10e   :  { %6032 = vmatmul.mubr.msk.f32.vlgmr.msra.gmra.mxu1 %vm543_vm4, %v1614_v9  ;;  %6053 = vmatmul.mubr.msk.f32.vlgmr.msra.gmra.mxu0 %vm543_vm4, %v1848_v5  ;;  %v5559_v24 = vpop.f32.mrf.mxu0  ;;  %v5180_v5 = vld [vmem:[%s8879_s6 + $0x148] sm:$0xff] }
 0x10f   :  { %6042 = vmatpush3.msra.mxu1 %v5147_v7  ;;  %6063 = vmatpush3.msra.mxu0 %v5156_v8  ;;  %v5580_v25 = vpop.f32.mrf.mxu1  ;;  %v5560_v42 = vadd.f32 %v5559_v24, %v5558_v20  ;;  %v2238_v8 = vld [vmem:[%s8882_s9 + $0x1e] sm:$0x3]  ;;  %v5192_v24 = vld [vmem:[%s8879_s6 + $0x188] sm:$0xff] }
 0x110   :  { %6043 = vmatprep.subr.mxu1 %v6894_v31  ;;  %6064 = vmatprep.subr.mxu0 %v6894_v31  ;;  %v5561_v28 = vpop.f32.mrf.mxu0 }
 0x111   :  { %6044 = vmatpush3.msra.mxu1 %v5146_v11  ;;  %6065 = vmatpush3.msra.mxu0 %v5155_v12  ;;  %v5581_v32 = vpop.f32.mrf.mxu1  ;;  %v959_v54 = vadd.f32 %v5560_v42, %v7473_v23  ;;  %v5170_v11 = vld [vmem:[%s8879_s6 + $0x110] sm:$0xff]  ;;  %v5179_v12 = vld [vmem:[%s8879_s6 + $0x140] sm:$0xff] }
 0x112   :  { %6045 = vmatprep.mubr.msk.f32.mxu1 %vm6895_vm3, %v6894_v31  ;;  %6055 = vmatprep.subr.mxu1 %v6894_v31  ;;  %v5562_v35 = vpop.f32.mrf.mxu0  ;;  %v5582_v36 = vadd.f32 %v5581_v32, %v5580_v25  ;;  %v2550_v25 = vld [vmem:[%s8882_s9 + $0x26] sm:$0x3]  ;;  %v5198_v32 = vld [vmem:[%s8879_s6 + $0x1a8] sm:$0xff] }
 0x113   :  { %6066 = vmatprep.mubr.msk.f32.mxu0 %vm6895_vm3, %v6894_v31  ;;  %6076 = vmatprep.subr.mxu0 %v6894_v31  ;;  %v5583_v40 = vpop.f32.mrf.mxu1  ;;  %v5563_v55 = vadd.f32 %v5562_v35, %v5561_v28  ;;  %v5191_v28 = vld [vmem:[%s8879_s6 + $0x180] sm:$0xff] }
 0x114   :  { %6046 = vmatmul.mubr.msk.f32.vlgmr.msra.gmra.mxu1 %vm543_vm4, %v1770_v17  ;;  %6067 = vmatmul.mubr.msk.f32.vlgmr.msra.gmra.mxu0 %vm543_vm4, %v2004_v18  ;;  %v5976_v43 = vpop.f32.mrf.mxu0  ;;  %v1000_v44 = vadd.f32 %v5582_v36, %v951_v26  ;;  %v5186_v17 = vld [vmem:[%s8879_s6 + $0x168] sm:$0xff]  ;;  %v2394_v18 = vld [vmem:[%s8882_s9 + $0x22] sm:$0x3]  ;;  %v3096_v36 = vld [vmem:[%s8882_s9 + $0x34] sm:$0x3] }
 0x115   :  { %6056 = vmatpush3.msra.mxu1 %v5153_v15  ;;  %6077 = vmatpush3.msra.mxu0 %v5162_v16  ;;  %v5584_v45 = vpop.f32.mrf.mxu1  ;;  %v962_v2 = vadd.f32 %v5563_v55, %v7473_v23  ;;  %v5177_v16 = vld [vmem:[%s8879_s6 + $0x138] sm:$0xff]  ;;  %v2784_v26 = vld [vmem:[%s8882_s9 + $0x2c] sm:$0x3]  ;;  %v5197_v35 = vld [vmem:[%s8879_s6 + $0x1a0] sm:$0xff] }
 0x116   :  { %6057 = vmatprep.subr.mxu1 %v6894_v31  ;;  %6078 = vmatprep.subr.mxu0 %v6894_v31  ;;  %v5585_v47 = vadd.f32 %v5584_v45, %v5583_v40  ;;  %v1048_v48 = vpop.f32.mrf.mxu0  ;;  %v5183_v23 = vld [vmem:[%s8879_s6 + $0x158] sm:$0xff]  ;;  %v2862_v40 = vld [vmem:[%s8882_s9 + $0x2e] sm:$0x3]  ;;  %v5203_v42 = vld [vmem:[%s8879_s6 + $0x1c0] sm:$0xff] }
 0x117   :  { %6058 = vmatpush3.msra.mxu1 %v5152_v21  ;;  %6079 = vmatpush3.msra.mxu0 %v5161_v22  ;;  %v1049_v51 = vadd.f32 %v1048_v48, %v1000_v44  ;;  %v5586_v52 = vpop.f32.mrf.mxu1  ;;  %v5176_v21 = vld [vmem:[%s8879_s6 + $0x130] sm:$0xff]  ;;  %v5185_v22 = vld [vmem:[%s8879_s6 + $0x160] sm:$0xff]  ;;  %v5210_v44 = vld [vmem:[%s8879_s6 + $0x1e8] sm:$0xff] }
 0x118   :  { %6059 = vmatprep.mubr.msk.f32.mxu1 %vm6895_vm3, %v6894_v31  ;;  %6069 = vmatprep.subr.mxu1 %v6894_v31  ;;  %v5977_v56 = vpop.f32.mrf.mxu0  ;;  %v1003_v57 = vadd.f32 %v5585_v47, %v954_v41  ;;  %v5194_v41 = vld [vmem:[%s8879_s6 + $0x190] sm:$0xff]  ;;  %v5209_v48 = vld [vmem:[%s8879_s6 + $0x1e0] sm:$0xff]  ;;  %v5213_v55 = vld [vmem:[%s8879_s6 + $0x1f8] sm:$0xff] }
 0x119   :  { %6080 = vmatprep.mubr.msk.f32.mxu0 %vm6895_vm3, %v6894_v31  ;;  %6090 = vmatprep.subr.mxu0 %v6894_v31  ;;  %v1063_v60 = vmax.f32 %v1049_v51, 0.0  ;;  %v5587_v61 = vpop.f32.mrf.mxu1  ;;  %v3018_v45 = vld [vmem:[%s8882_s9 + $0x32] sm:$0x3]  ;;  %v3174_v51 = vld [vmem:[%s8882_s9 + $0x36] sm:$0x3] }
 0x11a   :  { %6060 = vmatmul.mubr.msk.f32.vlgmr.msra.gmra.mxu1 %vm543_vm4, %v1926_v33  ;;  %6081 = vmatmul.mubr.msk.f32.vlgmr.msra.gmra.mxu0 %vm543_vm4, %v2160_v34  ;;  %v5588_v62 = vadd.f32 %v5587_v61, %v5586_v52  ;;  %v1051_v63 = vpop.f32.mrf.mxu0  ;;  %v2706_v33 = vld [vmem:[%s8882_s9 + $0x2a] sm:$0x3]  ;;  %v5188_v34 = vld [vmem:[%s8879_s6 + $0x170] sm:$0xff]  ;;  %v3408_v52 = vld [vmem:[%s8882_s9 + $0x3c] sm:$0x3] }
 0x11b   :  { %6070 = vmatpush3.msra.mxu1 %v5159_v29  ;;  %6091 = vmatpush3.msra.mxu0 %v5168_v30  ;;  %1067 = vst [vmem:[%s8883_s10] sm:$0xff] %v1063_v60  ;;  %v1052_v37 = vadd.f32 %v1051_v63, %v1003_v57  ;;  %v5589_v0 = vpop.f32.mrf.mxu1  ;;  %v2940_v29 = vld [vmem:[%s8882_s9 + $0x30] sm:$0x3]  ;;  %v5189_v30 = vld [vmem:[%s8879_s6 + $0x178] sm:$0xff] }
 0x11c   :  { %6071 = vmatprep.subr.mxu1 %v6894_v31  ;;  %6092 = vmatprep.subr.mxu0 %v6894_v31  ;;  %v1008_v3 = vadd.f32 %v5588_v62, %v959_v54  ;;  %v5200_v47 = vld [vmem:[%s8879_s6 + $0x1b0] sm:$0xff]  ;;  %v3330_v57 = vld [vmem:[%s8882_s9 + $0x3a] sm:$0x3]  ;;  %v3486_v62 = vld [vmem:[%s8882_s9 + $0x3e] sm:$0x3] }
 0x11d   :  { %6072 = vmatpush3.msra.mxu1 %v5158_v38  ;;  %6093 = vmatpush3.msra.mxu0 %v5167_v39  ;;  %v1064_v6 = vmax.f32 %v1052_v37, 0.0  ;;  %v5590_v7 = vpop.f32.mrf.mxu1  ;;  %v5195_v38 = vld [vmem:[%s8879_s6 + $0x198] sm:$0xff]  ;;  %v5204_v39 = vld [vmem:[%s8879_s6 + $0x1c8] sm:$0xff]  ;;  %v3579_v54 = vld [vmem:[%s8880_s7 + $0x70] sm:$0xff] }
 0x11e   :  { %6073 = vmatprep.mubr.msk.f32.mxu1 %vm6895_vm3, %v6894_v31  ;;  %6083 = vmatprep.subr.mxu1 %v6894_v31  ;;  %v1057_v9 = vadd.f32 %v5976_v43, %v1008_v3  ;;  %v5591_v10 = vadd.f32 %v5590_v7, %v5589_v0  ;;  %v5201_v43 = vld [vmem:[%s8879_s6 + $0x1b8] sm:$0xff]  ;;  %v3575_v63 = vld [vmem:[%s8880_s7 + $0x50] sm:$0xff]  ;;  %v3574_v0 = vld [vmem:[%s8880_s7 + $0x48] sm:$0xff] }
 0x11f   :  { %6094 = vmatprep.mubr.msk.f32.mxu0 %vm6895_vm3, %v6894_v31  ;;  %6104 = vmatprep.subr.mxu0 %v6894_v31  ;;  %1068 = vst [vmem:[%s8883_s10 + $0x8] sm:$0xff] %v1064_v6  ;;  %v3576_v60 = vld [vmem:[%s8880_s7 + $0x58] sm:$0xff]  ;;  %v5229_v37 = vld [vmem:[%s8880_s7 + $0xf0] sm:$0xff]  ;;  %v5227_v3 = vld [vmem:[%s8880_s7 + $0xe0] sm:$0xff] }
 0x120   :  { %6074 = vmatmul.mubr.msk.f32.vlgmr.msra.gmra.mxu1 %vm543_vm4, %v2082_v53  ;;  %6095 = vmatmul.mubr.msk.f32.vlgmr.msra.gmra.mxu0 %vm543_vm4, %v2316_v46  ;;  %v1065_v13 = vmax.f32 %v1057_v9, 0.0  ;;  %v1011_v14 = vadd.f32 %v5591_v10, %v962_v2  ;;  %v3252_v46 = vld [vmem:[%s8882_s9 + $0x38] sm:$0x3]  ;;  %v5206_v53 = vld [vmem:[%s8879_s6 + $0x1d0] sm:$0xff]  ;;  %v3573_v2 = vld [vmem:[%s8880_s7 + $0x40] sm:$0xff] }
 0x121   :  { %6084 = vmatpush3.msra.mxu1 %v5165_v49  ;;  %6105 = vmatpush3.msra.mxu0 %v5174_v50  ;;  %v5207_v49 = vld [vmem:[%s8879_s6 + $0x1d8] sm:$0xff]  ;;  %v3571_v6 = vld [vmem:[%s8880_s7 + $0x30] sm:$0xff]  ;;  %v5224_v9 = vld [vmem:[%s8880_s7 + $0xc8] sm:$0xff] }
 0x122   :  { %6085 = vmatprep.subr.mxu1 %v6894_v31  ;;  %6106 = vmatprep.subr.mxu0 %v6894_v31  ;;  %1069 = vst [vmem:[%s8883_s10 + $0x10] sm:$0xff] %v1065_v13  ;;  %v1060_v15 = vadd.f32 %v5977_v56, %v1011_v14  ;;  %v3580_v50 = vld [vmem:[%s8880_s7 + $0x78] sm:$0xff]  ;;  %v3578_v56 = vld [vmem:[%s8880_s7 + $0x68] sm:$0xff]  ;;  %v5225_v7 = vld [vmem:[%s8880_s7 + $0xd0] sm:$0xff] }
 0x123   :  { %6086 = vmatpush3.msra.mxu1 %v5164_v58  ;;  %6107 = vmatpush3.msra.mxu0 %v5173_v59  ;;  %v5212_v58 = vld [vmem:[%s8879_s6 + $0x1f0] sm:$0xff]  ;;  %v3577_v59 = vld [vmem:[%s8880_s7 + $0x60] sm:$0xff]  ;;  %v5230_v61 = vld [vmem:[%s8880_s7 + $0xf8] sm:$0xff] }
 0x124   :  { %6087 = vmatprep.mubr.msk.f32.mxu1 %vm6895_vm3, %v6894_v31  ;;  %6097 = vmatprep.subr.mxu1 %v6894_v31  ;;  %v1066_v20 = vmax.f32 %v1060_v15, 0.0  ;;  %v3569_v10 = vld [vmem:[%s8880_s7 + $0x20] sm:$0xff]  ;;  %v5222_v13 = vld [vmem:[%s8880_s7 + $0xb8] sm:$0xff]  ;;  %v3567_v14 = vld [vmem:[%s8880_s7 + $0x10] sm:$0xff] }
 0x125   :  { %6108 = vmatprep.mubr.msk.f32.mxu0 %vm6895_vm3, %v6894_v31  ;;  %6118 = vmatprep.subr.mxu0 %v6894_v31  ;;  %v5221_v15 = vld [vmem:[%s8880_s7 + $0xb0] sm:$0xff] }
 0x126   :  { %6088 = vmatmul.mubr.msk.f32.vlgmr.msra.gmra.mxu1 %vm543_vm4, %v2238_v8  ;;  %6109 = vmatmul.mubr.msk.f32.vlgmr.msra.gmra.mxu0 %vm543_vm4, %v2472_v1  ;;  %1070 = vst [vmem:[%s8883_s10 + $0x18] sm:$0xff] %v1066_v20  ;;  %v5228_v1 = vld [vmem:[%s8880_s7 + $0xe8] sm:$0xff]  ;;  %v3564_v20 = vld [vmem:[%s8883_s10] sm:$0x3] }
 0x127   :  { %6098 = vmatpush3.msra.mxu1 %v5171_v4  ;;  %6119 = vmatpush3.msra.mxu0 %v5180_v5  ;;  %v3572_v4 = vld [vmem:[%s8880_s7 + $0x38] sm:$0xff]  ;;  %v3570_v8 = vld [vmem:[%s8880_s7 + $0x28] sm:$0xff] }
 0x128   :  { %6099 = vmatprep.subr.mxu1 %v6894_v31  ;;  %6120 = vmatprep.subr.mxu0 %v6894_v31  ;;  %v5226_v5 = vld [vmem:[%s8880_s7 + $0xd8] sm:$0xff] }
 0x129   :  { %6100 = vmatpush3.msra.mxu1 %v5170_v11  ;;  %6121 = vmatpush3.msra.mxu0 %v5179_v12  ;;  %v5223_v11 = vld [vmem:[%s8880_s7 + $0xc0] sm:$0xff]  ;;  %v3568_v12 = vld [vmem:[%s8880_s7 + $0x18] sm:$0xff] }
 0x12a   :  { %6101 = vmatprep.mubr.msk.f32.mxu1 %vm6895_vm3, %v6894_v31  ;;  %6111 = vmatprep.subr.mxu1 %v6894_v31 }
 0x12b   :  { %6122 = vmatprep.mubr.msk.f32.mxu0 %vm6895_vm3, %v6894_v31  ;;  %6132 = vmatprep.subr.mxu0 %v6894_v31 }
 0x12c   :  { %6102 = vmatmul.mubr.msk.f32.vlgmr.msra.gmra.mxu1 %vm543_vm4, %v2394_v18  ;;  %6123 = vmatmul.mubr.msk.f32.vlgmr.msra.gmra.mxu0 %vm543_vm4, %v2628_v19  ;;  %v3565_v18 = vld [vmem:[%s8880_s7] sm:$0xff] }
 0x12d   :  { %6112 = vmatpush3.msra.mxu1 %v5177_v16  ;;  %6133 = vmatpush3.msra.mxu0 %v5186_v17  ;;  %v3566_v16 = vld [vmem:[%s8880_s7 + $0x8] sm:$0xff]  ;;  %v5219_v19 = vld [vmem:[%s8880_s7 + $0xa0] sm:$0xff] }
 0x12e   :  { %6113 = vmatprep.subr.mxu1 %v6894_v31  ;;  %6134 = vmatprep.subr.mxu0 %v6894_v31  ;;  %v5220_v17 = vld [vmem:[%s8880_s7 + $0xa8] sm:$0xff] }
 0x12f   :  { %6114 = vmatpush3.msra.mxu1 %v5176_v21  ;;  %6135 = vmatpush3.msra.mxu0 %v5185_v22  ;;  %v5218_v21 = vld [vmem:[%s8880_s7 + $0x98] sm:$0xff] }
 0x130   :  { %6115 = vmatprep.mubr.msk.f32.mxu1 %vm6895_vm3, %v6894_v31  ;;  %6125 = vmatprep.subr.mxu1 %v6894_v31  ;;  %v5246_v22 = vld [vmem:[%s8880_s7 + $0x178] sm:$0xff] }
 0x131   :  { %6136 = vmatprep.mubr.msk.f32.mxu0 %vm6895_vm3, %v6894_v31  ;;  %6146 = vmatprep.subr.mxu0 %v6894_v31 }
 0x132   :  { %6116 = vmatmul.mubr.msk.f32.vlgmr.msra.gmra.mxu1 %vm543_vm4, %v2550_v25  ;;  %6137 = vmatmul.mubr.msk.f32.vlgmr.msra.gmra.mxu0 %vm543_vm4, %v2784_v26  ;;  %v5216_v25 = vld [vmem:[%s8880_s7 + $0x88] sm:$0xff] }
 0x133   :  { %6126 = vmatpush3.msra.mxu1 %v5183_v23  ;;  %6147 = vmatpush3.msra.mxu0 %v5192_v24  ;;  %v5217_v23 = vld [vmem:[%s8880_s7 + $0x90] sm:$0xff]  ;;  %v5244_v26 = vld [vmem:[%s8880_s7 + $0x168] sm:$0xff] }
 0x134   :  { %6127 = vmatprep.subr.mxu1 %v6894_v31  ;;  %6148 = vmatprep.subr.mxu0 %v6894_v31  ;;  %v5245_v24 = vld [vmem:[%s8880_s7 + $0x170] sm:$0xff] }
 0x135   :  { %6128 = vmatpush3.msra.mxu1 %v5182_v27  ;;  %6149 = vmatpush3.msra.mxu0 %v5191_v28  ;;  %v5215_v27 = vld [vmem:[%s8880_s7 + $0x80] sm:$0xff] }
 0x136   :  { %6129 = vmatprep.mubr.msk.f32.mxu1 %vm6895_vm3, %v6894_v31  ;;  %6139 = vmatprep.subr.mxu1 %v6894_v31  ;;  %v5243_v28 = vld [vmem:[%s8880_s7 + $0x160] sm:$0xff] }
 0x137   :  { %6150 = vmatprep.mubr.msk.f32.mxu0 %vm6895_vm3, %v6894_v31  ;;  %6160 = vmatprep.subr.mxu0 %v6894_v31 }
 0x138   :  { %6130 = vmatmul.mubr.msk.f32.vlgmr.msra.gmra.mxu1 %vm543_vm4, %v2706_v33  ;;  %6151 = vmatmul.mubr.msk.f32.vlgmr.msra.gmra.mxu0 %vm543_vm4, %v2940_v29  ;;  %v3652_v29 = vld [vmem:[%s8883_s10 + $0x2] sm:$0x3]  ;;  %v5241_v33 = vld [vmem:[%s8880_s7 + $0x150] sm:$0xff] }
 0x139   :  { %6140 = vmatpush3.msra.mxu1 %v5189_v30  ;;  %6161 = vmatpush3.msra.mxu0 %v5198_v32  ;;  %v5242_v30 = vld [vmem:[%s8880_s7 + $0x158] sm:$0xff] }
 0x13a   :  { %6141 = vmatprep.subr.mxu1 %v6894_v31  ;;  %6162 = vmatprep.subr.mxu0 %v6894_v31  ;;  %v5262_v32 = vld [vmem:[%s8880_s7 + $0x1f8] sm:$0xff] }
 0x13b   :  { %6142 = vmatpush3.msra.mxu1 %v5188_v34  ;;  %6163 = vmatpush3.msra.mxu0 %v5197_v35  ;;  %v5261_v34 = vld [vmem:[%s8880_s7 + $0x1f0] sm:$0xff]  ;;  %v5240_v35 = vld [vmem:[%s8880_s7 + $0x148] sm:$0xff] }
 0x13c   :  { %6143 = vmatprep.mubr.msk.f32.mxu1 %vm6895_vm3, %v6894_v31  ;;  %6153 = vmatprep.subr.mxu1 %v6894_v31 }
 0x13d   :  { %6164 = vmatprep.mubr.msk.f32.mxu0 %vm6895_vm3, %v6894_v31  ;;  %6174 = vmatprep.subr.mxu0 %v6894_v31 }
 0x13e   :  { %6144 = vmatmul.mubr.msk.f32.vlgmr.msra.gmra.mxu1 %vm543_vm4, %v2862_v40  ;;  %6165 = vmatmul.mubr.msk.f32.vlgmr.msra.gmra.mxu0 %vm543_vm4, %v3096_v36  ;;  %v5260_v36 = vld [vmem:[%s8880_s7 + $0x1e8] sm:$0xff]  ;;  %v5238_v40 = vld [vmem:[%s8880_s7 + $0x138] sm:$0xff] }
 0x13f   :  { %6154 = vmatpush3.msra.mxu1 %v5195_v38  ;;  %6175 = vmatpush3.msra.mxu0 %v5204_v39  ;;  %v5239_v38 = vld [vmem:[%s8880_s7 + $0x140] sm:$0xff] }
 0x140   :  { %6155 = vmatprep.subr.mxu1 %v6894_v31  ;;  %6176 = vmatprep.subr.mxu0 %v6894_v31  ;;  %v5259_v39 = vld [vmem:[%s8880_s7 + $0x1e0] sm:$0xff] }
 0x141   :  { %6156 = vmatpush3.msra.mxu1 %v5194_v41  ;;  %6177 = vmatpush3.msra.mxu0 %v5203_v42  ;;  %v5258_v41 = vld [vmem:[%s8880_s7 + $0x1d8] sm:$0xff]  ;;  %v5237_v42 = vld [vmem:[%s8880_s7 + $0x130] sm:$0xff] }
 0x142   :  { %6157 = vmatprep.mubr.msk.f32.mxu1 %vm6895_vm3, %v6894_v31  ;;  %6167 = vmatprep.subr.mxu1 %v6894_v31 }
 0x143   :  { %6178 = vmatprep.mubr.msk.f32.mxu0 %vm6895_vm3, %v6894_v31  ;;  %6188 = vmatprep.subr.mxu0 %v6894_v31 }
 0x144   :  { %6158 = vmatmul.mubr.msk.f32.vlgmr.msra.gmra.mxu1 %vm543_vm4, %v3018_v45  ;;  %6179 = vmatmul.mubr.msk.f32.vlgmr.msra.gmra.mxu0 %vm543_vm4, %v3252_v46  ;;  %v5256_v45 = vld [vmem:[%s8880_s7 + $0x1c8] sm:$0xff]  ;;  %v5235_v46 = vld [vmem:[%s8880_s7 + $0x120] sm:$0xff] }
 0x145   :  { %6168 = vmatpush3.msra.mxu1 %v5201_v43  ;;  %6189 = vmatpush3.msra.mxu0 %v5210_v44  ;;  %v5257_v43 = vld [vmem:[%s8880_s7 + $0x1d0] sm:$0xff]  ;;  %v5236_v44 = vld [vmem:[%s8880_s7 + $0x128] sm:$0xff] }
 0x146   :  { %6169 = vmatprep.subr.mxu1 %v6894_v31  ;;  %6190 = vmatprep.subr.mxu0 %v6894_v31 }
 0x147   :  { %6170 = vmatpush3.msra.mxu1 %v5200_v47  ;;  %6191 = vmatpush3.msra.mxu0 %v5209_v48  ;;  %v5255_v47 = vld [vmem:[%s8880_s7 + $0x1c0] sm:$0xff]  ;;  %v5234_v48 = vld [vmem:[%s8880_s7 + $0x118] sm:$0xff] }
 0x148   :  { %6171 = vmatprep.mubr.msk.f32.mxu1 %vm6895_vm3, %v6894_v31  ;;  %6181 = vmatprep.subr.mxu1 %v6894_v31 }
 0x149   :  { %6192 = vmatprep.mubr.msk.f32.mxu0 %vm6895_vm3, %v6894_v31  ;;  %6202 = vmatprep.subr.mxu0 %v6894_v31 }
 0x14a   :  { %6172 = vmatmul.mubr.msk.f32.vlgmr.msra.gmra.mxu1 %vm543_vm4, %v3174_v51  ;;  %6193 = vmatmul.mubr.msk.f32.vlgmr.msra.gmra.mxu0 %vm543_vm4, %v3408_v52  ;;  %v5253_v51 = vld [vmem:[%s8880_s7 + $0x1b0] sm:$0xff]  ;;  %v5232_v52 = vld [vmem:[%s8880_s7 + $0x108] sm:$0xff] }
 0x14b   :  { %6182 = vmatpush3.msra.mxu1 %v5207_v49  ;;  %6203 = vmatpush3.msra.mxu0 %v3580_v50  ;;  %v5254_v49 = vld [vmem:[%s8880_s7 + $0x1b8] sm:$0xff]  ;;  %v5233_v50 = vld [vmem:[%s8880_s7 + $0x110] sm:$0xff] }
 0x14c   :  { %6183 = vmatprep.subr.mxu1 %v6894_v31  ;;  %6204 = vmatprep.subr.mxu0 %v6894_v31 }
 0x14d   :  { %6184 = vmatpush3.msra.mxu1 %v5206_v53  ;;  %6205 = vmatpush3.msra.mxu0 %v3579_v54  ;;  %v5252_v53 = vld [vmem:[%s8880_s7 + $0x1a8] sm:$0xff]  ;;  %v5231_v54 = vld [vmem:[%s8880_s7 + $0x100] sm:$0xff] }
 0x14e   :  { %6185 = vmatprep.mubr.msk.f32.mxu1 %vm6895_vm3, %v6894_v31  ;;  %6195 = vmatprep.subr.mxu1 %v6894_v31 }
 0x14f   :  { %6206 = vmatprep.subr.mxu0 %v6894_v31  ;;  %6186 = vmatmul.mubr.msk.f32.vlgmr.msra.gmra.mxu1 %vm543_vm4, %v3330_v57  ;;  %v5250_v57 = vld [vmem:[%s8880_s7 + $0x198] sm:$0xff] }
 0x150   :  { %6196 = vmatpush3.msra.mxu1 %v5213_v55  ;;  %6207 = vmatpush3.msra.mxu0 %v3578_v56  ;;  %v5251_v55 = vld [vmem:[%s8880_s7 + $0x1a0] sm:$0xff] }
 0x151   :  { %6197 = vmatprep.subr.mxu1 %v6894_v31  ;;  %6208 = vmatprep.subr.mxu0 %v6894_v31  ;;  %v3741_v56 = vld [vmem:[%s8883_s10 + $0x4] sm:$0x3] }
 0x152   :  { %6198 = vmatpush3.msra.mxu1 %v5212_v58  ;;  %6209 = vmatpush3.msra.mxu0 %v3577_v59  ;;  %v5278_v58 = vld [vmem:[%s8880_s7 + $0x278] sm:$0xff]  ;;  %v5249_v59 = vld [vmem:[%s8880_s7 + $0x190] sm:$0xff] }
 0x153   :  { %6199 = vmatprep.mubr.msk.f32.mxu1 %vm6895_vm3, %v6894_v31  ;;  %6210 = vmatprep.subr.mxu0 %v6894_v31 }
 0x154   :  { %6237 = vmatprep.subr.mxu1 %v6894_v31  ;;  %6200 = vmatmul.mubr.msk.f32.vlgmr.msra.gmra.mxu1 %vm543_vm4, %v3486_v62  ;;  %v5276_v62 = vld [vmem:[%s8880_s7 + $0x268] sm:$0xff] }
 0x155   :  { %6211 = vmatpush3.msra.mxu0 %v3576_v60  ;;  %6238 = vmatpush3.msra.mxu1 %v5230_v61  ;;  %v5277_v60 = vld [vmem:[%s8880_s7 + $0x270] sm:$0xff]  ;;  %v5248_v61 = vld [vmem:[%s8880_s7 + $0x188] sm:$0xff] }
 0x156   :  { %6212 = vmatprep.subr.mxu0 %v6894_v31  ;;  %6239 = vmatprep.subr.mxu1 %v6894_v31 }
 0x157   :  { %6213 = vmatpush3.msra.mxu0 %v3575_v63  ;;  %6240 = vmatpush3.msra.mxu1 %v5229_v37  ;;  %v5247_v63 = vld [vmem:[%s8880_s7 + $0x180] sm:$0xff] }
 0x158   :  { %6214 = vmatprep.subr.mxu0 %v6894_v31  ;;  %6241 = vmatprep.subr.mxu1 %v6894_v31  ;;  %v5275_v37 = vld [vmem:[%s8880_s7 + $0x260] sm:$0xff] }
 0x159   :  { %6215 = vmatpush3.msra.mxu0 %v3574_v0  ;;  %6242 = vmatpush3.msra.mxu1 %v5228_v1  ;;  %v3830_v0 = vld [vmem:[%s8883_s10 + $0x6] sm:$0x3]  ;;  %v5274_v1 = vld [vmem:[%s8880_s7 + $0x258] sm:$0xff] }
 0x15a   :  { %6216 = vmatprep.subr.mxu0 %v6894_v31  ;;  %6243 = vmatprep.subr.mxu1 %v6894_v31 }
 0x15b   :  { %6217 = vmatpush3.msra.mxu0 %v3573_v2  ;;  %6244 = vmatpush3.msra.mxu1 %v5227_v3  ;;  %v5294_v2 = vld [vmem:[%s8880_s7 + $0x2f8] sm:$0xff]  ;;  %v5273_v3 = vld [vmem:[%s8880_s7 + $0x250] sm:$0xff] }
 0x15c   :  { %6218 = vmatprep.subr.mxu0 %v6894_v31  ;;  %6245 = vmatprep.subr.mxu1 %v6894_v31 }
 0x15d   :  { %6219 = vmatpush3.msra.mxu0 %v3572_v4  ;;  %6246 = vmatpush3.msra.mxu1 %v5226_v5  ;;  %v5293_v4 = vld [vmem:[%s8880_s7 + $0x2f0] sm:$0xff]  ;;  %v5272_v5 = vld [vmem:[%s8880_s7 + $0x248] sm:$0xff] }
 0x15e   :  { %6220 = vmatprep.subr.mxu0 %v6894_v31  ;;  %6247 = vmatprep.subr.mxu1 %v6894_v31 }
 0x15f   :  { %6221 = vmatpush3.msra.mxu0 %v3571_v6  ;;  %6248 = vmatpush3.msra.mxu1 %v5225_v7  ;;  %v5292_v6 = vld [vmem:[%s8880_s7 + $0x2e8] sm:$0xff]  ;;  %v5271_v7 = vld [vmem:[%s8880_s7 + $0x240] sm:$0xff] }
 0x160   :  { %6222 = vmatprep.subr.mxu0 %v6894_v31  ;;  %6249 = vmatprep.subr.mxu1 %v6894_v31 }
 0x161   :  { %6223 = vmatpush3.msra.mxu0 %v3570_v8  ;;  %6250 = vmatpush3.msra.mxu1 %v5224_v9  ;;  %v5291_v8 = vld [vmem:[%s8880_s7 + $0x2e0] sm:$0xff]  ;;  %v5270_v9 = vld [vmem:[%s8880_s7 + $0x238] sm:$0xff] }
 0x162   :  { %6224 = vmatprep.subr.mxu0 %v6894_v31  ;;  %6251 = vmatprep.subr.mxu1 %v6894_v31 }
 0x163   :  { %6225 = vmatpush3.msra.mxu0 %v3569_v10  ;;  %6252 = vmatpush3.msra.mxu1 %v5223_v11  ;;  %v5290_v10 = vld [vmem:[%s8880_s7 + $0x2d8] sm:$0xff]  ;;  %v5269_v11 = vld [vmem:[%s8880_s7 + $0x230] sm:$0xff] }
 0x164   :  { %6226 = vmatprep.subr.mxu0 %v6894_v31  ;;  %6253 = vmatprep.subr.mxu1 %v6894_v31 }
 0x165   :  { %6227 = vmatpush3.msra.mxu0 %v3568_v12  ;;  %6254 = vmatpush3.msra.mxu1 %v5222_v13  ;;  %v5289_v12 = vld [vmem:[%s8880_s7 + $0x2d0] sm:$0xff]  ;;  %v5268_v13 = vld [vmem:[%s8880_s7 + $0x228] sm:$0xff] }
 0x166   :  { %6228 = vmatprep.subr.mxu0 %v6894_v31  ;;  %6255 = vmatprep.subr.mxu1 %v6894_v31 }
 0x167   :  { %6229 = vmatpush3.msra.mxu0 %v3567_v14  ;;  %6256 = vmatpush3.msra.mxu1 %v5221_v15  ;;  %v5288_v14 = vld [vmem:[%s8880_s7 + $0x2c8] sm:$0xff]  ;;  %v5267_v15 = vld [vmem:[%s8880_s7 + $0x220] sm:$0xff] }
 0x168   :  { %6230 = vmatprep.subr.mxu0 %v6894_v31  ;;  %6257 = vmatprep.subr.mxu1 %v6894_v31 }
 0x169   :  { %6231 = vmatpush3.msra.mxu0 %v3566_v16  ;;  %6258 = vmatpush3.msra.mxu1 %v5220_v17  ;;  %v5287_v16 = vld [vmem:[%s8880_s7 + $0x2c0] sm:$0xff]  ;;  %v5266_v17 = vld [vmem:[%s8880_s7 + $0x218] sm:$0xff] }
 0x16a   :  { %6232 = vmatprep.subr.mxu0 %v6894_v31  ;;  %6259 = vmatprep.subr.mxu1 %v6894_v31 }
 0x16b   :  { %6233 = vmatpush3.msra.mxu0 %v3565_v18  ;;  %6234 = vmatprep.mubr.msk.f32.mxu0 %vm6895_vm3, %v6894_v31  ;;  %v5286_v18 = vld [vmem:[%s8880_s7 + $0x2b8] sm:$0xff] }
 0x16c   :  { %6260 = vmatpush3.msra.mxu1 %v5219_v19  ;;  %6235 = vmatmul.mubr.f32.vlgmr.msra.gmra.mxu0 %v3564_v20  ;;  %v5265_v19 = vld [vmem:[%s8880_s7 + $0x210] sm:$0xff] }
 0x16d   :  { %6261 = vmatprep.subr.mxu1 %v6894_v31  ;;  %6272 = vmatprep.subr.mxu0 %v6894_v31  ;;  %v5285_v20 = vld [vmem:[%s8880_s7 + $0x2b0] sm:$0xff] }
 0x16e   :  { %6262 = vmatpush3.msra.mxu1 %v5218_v21  ;;  %6273 = vmatpush3.msra.mxu0 %v5246_v22  ;;  %v5264_v21 = vld [vmem:[%s8880_s7 + $0x208] sm:$0xff] }
 0x16f   :  { %6263 = vmatprep.subr.mxu1 %v6894_v31  ;;  %6274 = vmatprep.subr.mxu0 %v6894_v31  ;;  %v5284_v22 = vld [vmem:[%s8880_s7 + $0x2a8] sm:$0xff] }
 0x170   :  { %6264 = vmatpush3.msra.mxu1 %v5217_v23  ;;  %6275 = vmatpush3.msra.mxu0 %v5245_v24  ;;  %v5263_v23 = vld [vmem:[%s8880_s7 + $0x200] sm:$0xff] }
 0x171   :  { %6265 = vmatprep.subr.mxu1 %v6894_v31  ;;  %6276 = vmatprep.subr.mxu0 %v6894_v31  ;;  %v5283_v24 = vld [vmem:[%s8880_s7 + $0x2a0] sm:$0xff] }
 0x172   :  { %6266 = vmatpush3.msra.mxu1 %v5216_v25  ;;  %6277 = vmatpush3.msra.mxu0 %v5244_v26  ;;  %v3919_v25 = vld [vmem:[%s8883_s10 + $0x8] sm:$0x3]  ;;  %v5282_v26 = vld [vmem:[%s8880_s7 + $0x298] sm:$0xff] }
 0x173   :  { %6267 = vmatprep.subr.mxu1 %v6894_v31  ;;  %6278 = vmatprep.subr.mxu0 %v6894_v31 }
 0x174   :  { %6268 = vmatpush3.msra.mxu1 %v5215_v27  ;;  %6269 = vmatprep.mubr.msk.f32.mxu1 %vm6895_vm3, %v6894_v31  ;;  %v5310_v27 = vld [vmem:[%s8880_s7 + $0x378] sm:$0xff] }
 0x175   :  { %6279 = vmatpush3.msra.mxu0 %v5243_v28  ;;  %6270 = vmatmul.mubr.f32.vlgmr.msra.gmra.mxu1 %v3652_v29  ;;  %v5281_v28 = vld [vmem:[%s8880_s7 + $0x290] sm:$0xff] }
 0x176   :  { %6280 = vmatprep.subr.mxu0 %v6894_v31  ;;  %6307 = vmatprep.subr.mxu1 %v6894_v31  ;;  %v5309_v29 = vld [vmem:[%s8880_s7 + $0x370] sm:$0xff] }
 0x177   :  { %6281 = vmatpush3.msra.mxu0 %v5242_v30  ;;  %6308 = vmatpush3.msra.mxu1 %v5262_v32  ;;  %v5280_v30 = vld [vmem:[%s8880_s7 + $0x288] sm:$0xff] }
 0x178   :  { %6282 = vmatprep.subr.mxu0 %v6894_v31  ;;  %6309 = vmatprep.subr.mxu1 %v6894_v31  ;;  %v5308_v32 = vld [vmem:[%s8880_s7 + $0x368] sm:$0xff] }
 0x179   :  { %6283 = vmatpush3.msra.mxu0 %v5241_v33  ;;  %6310 = vmatpush3.msra.mxu1 %v5261_v34  ;;  %v5279_v33 = vld [vmem:[%s8880_s7 + $0x280] sm:$0xff] }
 0x17a   :  { %6284 = vmatprep.subr.mxu0 %v6894_v31  ;;  %6311 = vmatprep.subr.mxu1 %v6894_v31  ;;  %v5307_v34 = vld [vmem:[%s8880_s7 + $0x360] sm:$0xff] }
 0x17b   :  { %6285 = vmatpush3.msra.mxu0 %v5240_v35  ;;  %6312 = vmatpush3.msra.mxu1 %v5260_v36 }
 0x17c   :  { %6286 = vmatprep.subr.mxu0 %v6894_v31  ;;  %6313 = vmatprep.subr.mxu1 %v6894_v31 }
 0x17d   :  { %6287 = vmatpush3.msra.mxu0 %v5239_v38  ;;  %6314 = vmatpush3.msra.mxu1 %v5259_v39  ;;  %v4008_v38 = vld [vmem:[%s8883_s10 + $0xa] sm:$0x3]  ;;  %v5306_v39 = vld [vmem:[%s8880_s7 + $0x358] sm:$0xff] }
 0x17e   :  { %6288 = vmatprep.subr.mxu0 %v6894_v31  ;;  %6315 = vmatprep.subr.mxu1 %v6894_v31 }
 0x17f   :  { %6289 = vmatpush3.msra.mxu0 %v5238_v40  ;;  %6316 = vmatpush3.msra.mxu1 %v5258_v41  ;;  %v5326_v40 = vld [vmem:[%s8880_s7 + $0x3f8] sm:$0xff] }
 0x180   :  { %6290 = vmatprep.subr.mxu0 %v6894_v31  ;;  %6317 = vmatprep.subr.mxu1 %v6894_v31 }
 0x181   :  { %6291 = vmatpush3.msra.mxu0 %v5237_v42  ;;  %6318 = vmatpush3.msra.mxu1 %v5257_v43  ;;  %v5305_v43 = vld [vmem:[%s8880_s7 + $0x350] sm:$0xff] }
 0x182   :  { %6292 = vmatprep.subr.mxu0 %v6894_v31  ;;  %6319 = vmatprep.subr.mxu1 %v6894_v31 }
 0x183   :  { %6293 = vmatpush3.msra.mxu0 %v5236_v44  ;;  %6320 = vmatpush3.msra.mxu1 %v5256_v45  ;;  %v5325_v44 = vld [vmem:[%s8880_s7 + $0x3f0] sm:$0xff]  ;;  %v5304_v45 = vld [vmem:[%s8880_s7 + $0x348] sm:$0xff] }
 0x184   :  { %6294 = vmatprep.subr.mxu0 %v6894_v31  ;;  %6321 = vmatprep.subr.mxu1 %v6894_v31 }
 0x185   :  { %6295 = vmatpush3.msra.mxu0 %v5235_v46  ;;  %6322 = vmatpush3.msra.mxu1 %v5255_v47  ;;  %v5324_v46 = vld [vmem:[%s8880_s7 + $0x3e8] sm:$0xff] }
 0x186   :  { %6296 = vmatprep.subr.mxu0 %v6894_v31  ;;  %6323 = vmatprep.subr.mxu1 %v6894_v31 }
 0x187   :  { %6297 = vmatpush3.msra.mxu0 %v5234_v48  ;;  %6324 = vmatpush3.msra.mxu1 %v5254_v49 }
 0x188   :  { %6298 = vmatprep.subr.mxu0 %v6894_v31  ;;  %6325 = vmatprep.subr.mxu1 %v6894_v31 }
 0x189   :  { %6299 = vmatpush3.msra.mxu0 %v5233_v50  ;;  %6326 = vmatpush3.msra.mxu1 %v5253_v51  ;;  %v5303_v50 = vld [vmem:[%s8880_s7 + $0x340] sm:$0xff] }
 0x18a   :  { %6300 = vmatprep.subr.mxu0 %v6894_v31  ;;  %6327 = vmatprep.subr.mxu1 %v6894_v31  ;;  %v5323_v51 = vld [vmem:[%s8880_s7 + $0x3e0] sm:$0xff] }
 0x18b   :  { %6301 = vmatpush3.msra.mxu0 %v5232_v52  ;;  %6328 = vmatpush3.msra.mxu1 %v5252_v53 }
 0x18c   :  { %6302 = vmatprep.subr.mxu0 %v6894_v31  ;;  %6329 = vmatprep.subr.mxu1 %v6894_v31 }
 0x18d   :  { %6303 = vmatpush3.msra.mxu0 %v5231_v54  ;;  %6304 = vmatprep.mubr.msk.f32.mxu0 %vm6895_vm3, %v6894_v31 }
 0x18e   :  { %6330 = vmatpush3.msra.mxu1 %v5251_v55  ;;  %6305 = vmatmul.mubr.f32.vlgmr.msra.gmra.mxu0 %v3741_v56  ;;  %v5302_v55 = vld [vmem:[%s8880_s7 + $0x338] sm:$0xff] }
 0x18f   :  { %6331 = vmatprep.subr.mxu1 %v6894_v31  ;;  %6342 = vmatprep.subr.mxu0 %v6894_v31  ;;  %v5322_v56 = vld [vmem:[%s8880_s7 + $0x3d8] sm:$0xff] }
 0x190   :  { %6332 = vmatpush3.msra.mxu1 %v5250_v57  ;;  %6343 = vmatpush3.msra.mxu0 %v5278_v58  ;;  %v5301_v57 = vld [vmem:[%s8880_s7 + $0x330] sm:$0xff] }
 0x191   :  { %6333 = vmatprep.subr.mxu1 %v6894_v31  ;;  %6344 = vmatprep.subr.mxu0 %v6894_v31  ;;  %v5321_v58 = vld [vmem:[%s8880_s7 + $0x3d0] sm:$0xff] }
 0x192   :  { %6334 = vmatpush3.msra.mxu1 %v5249_v59  ;;  %6345 = vmatpush3.msra.mxu0 %v5277_v60 }
 0x193   :  { %6335 = vmatprep.subr.mxu1 %v6894_v31  ;;  %6346 = vmatprep.subr.mxu0 %v6894_v31 }
 0x194   :  { %6336 = vmatpush3.msra.mxu1 %v5248_v61  ;;  %6347 = vmatpush3.msra.mxu0 %v5276_v62  ;;  %v5300_v62 = vld [vmem:[%s8880_s7 + $0x328] sm:$0xff] }
 0x195   :  { %6337 = vmatprep.subr.mxu1 %v6894_v31  ;;  %6348 = vmatprep.subr.mxu0 %v6894_v31 }
 0x196   :  { %6338 = vmatpush3.msra.mxu1 %v5247_v63  ;;  %6339 = vmatprep.mubr.msk.f32.mxu1 %vm6895_vm3, %v6894_v31  ;;  %v5320_v63 = vld [vmem:[%s8880_s7 + $0x3c8] sm:$0xff] }
 0x197   :  { %6349 = vmatpush3.msra.mxu0 %v5275_v37  ;;  %6340 = vmatmul.mubr.f32.vlgmr.msra.gmra.mxu1 %v3830_v0 }
 0x198   :  { %6350 = vmatprep.subr.mxu0 %v6894_v31  ;;  %6377 = vmatprep.subr.mxu1 %v6894_v31 }
 0x199   :  { %6351 = vmatpush3.msra.mxu0 %v5274_v1  ;;  %6378 = vmatpush3.msra.mxu1 %v5294_v2  ;;  %v5299_v2 = vld [vmem:[%s8880_s7 + $0x320] sm:$0xff] }
 0x19a   :  { %6352 = vmatprep.subr.mxu0 %v6894_v31  ;;  %6379 = vmatprep.subr.mxu1 %v6894_v31 }
 0x19b   :  { %6353 = vmatpush3.msra.mxu0 %v5273_v3  ;;  %6380 = vmatpush3.msra.mxu1 %v5293_v4  ;;  %v5319_v3 = vld [vmem:[%s8880_s7 + $0x3c0] sm:$0xff]  ;;  %v5298_v4 = vld [vmem:[%s8880_s7 + $0x318] sm:$0xff] }
 0x19c   :  { %6354 = vmatprep.subr.mxu0 %v6894_v31  ;;  %6381 = vmatprep.subr.mxu1 %v6894_v31 }
 0x19d   :  { %6355 = vmatpush3.msra.mxu0 %v5272_v5  ;;  %6382 = vmatpush3.msra.mxu1 %v5292_v6  ;;  %v5318_v5 = vld [vmem:[%s8880_s7 + $0x3b8] sm:$0xff] }
 0x19e   :  { %6356 = vmatprep.subr.mxu0 %v6894_v31  ;;  %6383 = vmatprep.subr.mxu1 %v6894_v31 }
 0x19f   :  { %6357 = vmatpush3.msra.mxu0 %v5271_v7  ;;  %6384 = vmatpush3.msra.mxu1 %v5291_v8 }
 0x1a0   :  { %6358 = vmatprep.subr.mxu0 %v6894_v31  ;;  %6385 = vmatprep.subr.mxu1 %v6894_v31 }
 0x1a1   :  { %6359 = vmatpush3.msra.mxu0 %v5270_v9  ;;  %6386 = vmatpush3.msra.mxu1 %v5290_v10  ;;  %v5297_v9 = vld [vmem:[%s8880_s7 + $0x310] sm:$0xff] }
 0x1a2   :  { %6360 = vmatprep.subr.mxu0 %v6894_v31  ;;  %6387 = vmatprep.subr.mxu1 %v6894_v31  ;;  %v5317_v10 = vld [vmem:[%s8880_s7 + $0x3b0] sm:$0xff] }
 0x1a3   :  { %6361 = vmatpush3.msra.mxu0 %v5269_v11  ;;  %6388 = vmatpush3.msra.mxu1 %v5289_v12 }
 0x1a4   :  { %6362 = vmatprep.subr.mxu0 %v6894_v31  ;;  %6389 = vmatprep.subr.mxu1 %v6894_v31 }
 0x1a5   :  { %6363 = vmatpush3.msra.mxu0 %v5268_v13  ;;  %6390 = vmatpush3.msra.mxu1 %v5288_v14  ;;  %v5296_v14 = vld [vmem:[%s8880_s7 + $0x308] sm:$0xff] }
 0x1a6   :  { %6364 = vmatprep.subr.mxu0 %v6894_v31  ;;  %6391 = vmatprep.subr.mxu1 %v6894_v31 }
 0x1a7   :  { %6365 = vmatpush3.msra.mxu0 %v5267_v15  ;;  %6392 = vmatpush3.msra.mxu1 %v5287_v16  ;;  %v5316_v15 = vld [vmem:[%s8880_s7 + $0x3a8] sm:$0xff]  ;;  %v5295_v16 = vld [vmem:[%s8880_s7 + $0x300] sm:$0xff] }
 0x1a8   :  { %6366 = vmatprep.subr.mxu0 %v6894_v31  ;;  %6393 = vmatprep.subr.mxu1 %v6894_v31 }
 0x1a9   :  { %6367 = vmatpush3.msra.mxu0 %v5266_v17  ;;  %6394 = vmatpush3.msra.mxu1 %v5286_v18 }
 0x1aa   :  { %6368 = vmatprep.subr.mxu0 %v6894_v31  ;;  %6395 = vmatprep.subr.mxu1 %v6894_v31 }
 0x1ab   :  { %6369 = vmatpush3.msra.mxu0 %v5265_v19  ;;  %6396 = vmatpush3.msra.mxu1 %v5285_v20  ;;  %v5315_v19 = vld [vmem:[%s8880_s7 + $0x3a0] sm:$0xff] }
 0x1ac   :  { %6370 = vmatprep.subr.mxu0 %v6894_v31  ;;  %6397 = vmatprep.subr.mxu1 %v6894_v31 }
 0x1ad   :  { %6371 = vmatpush3.msra.mxu0 %v5264_v21  ;;  %6398 = vmatpush3.msra.mxu1 %v5284_v22 }
 0x1ae   :  { %6372 = vmatprep.subr.mxu0 %v6894_v31  ;;  %6399 = vmatprep.subr.mxu1 %v6894_v31 }
 0x1af   :  { %6373 = vmatpush3.msra.mxu0 %v5263_v23  ;;  %6374 = vmatprep.mubr.msk.f32.mxu0 %vm6895_vm3, %v6894_v31  ;;  %v4097_v23 = vld [vmem:[%s8883_s10 + $0xc] sm:$0x3] }
 0x1b0   :  { %6400 = vmatpush3.msra.mxu1 %v5283_v24  ;;  %6375 = vmatmul.mubr.f32.vlgmr.msra.gmra.mxu0 %v3919_v25  ;;  %v5314_v24 = vld [vmem:[%s8880_s7 + $0x398] sm:$0xff] }
 0x1b1   :  { %6401 = vmatprep.subr.mxu1 %v6894_v31  ;;  %6412 = vmatprep.subr.mxu0 %v6894_v31  ;;  %v5342_v25 = vld [vmem:[%s8880_s7 + $0x478] sm:$0xff] }
 0x1b2   :  { %6402 = vmatpush3.msra.mxu1 %v5282_v26  ;;  %6413 = vmatpush3.msra.mxu0 %v5310_v27  ;;  %v5313_v27 = vld [vmem:[%s8880_s7 + $0x390] sm:$0xff] }
 0x1b3   :  { %6403 = vmatprep.subr.mxu1 %v6894_v31  ;;  %6414 = vmatprep.subr.mxu0 %v6894_v31 }
 0x1b4   :  { %6404 = vmatpush3.msra.mxu1 %v5281_v28  ;;  %6415 = vmatpush3.msra.mxu0 %v5309_v29  ;;  %v5341_v28 = vld [vmem:[%s8880_s7 + $0x470] sm:$0xff] }
 0x1b5   :  { %6405 = vmatprep.subr.mxu1 %v6894_v31  ;;  %6416 = vmatprep.subr.mxu0 %v6894_v31 }
 0x1b6   :  { %6406 = vmatpush3.msra.mxu1 %v5280_v30  ;;  %6417 = vmatpush3.msra.mxu0 %v5308_v32  ;;  %v1147_v35 = vpop.f32.mrf.mxu1  ;;  %v1297_v36 = vpop.f32.mrf.mxu0  ;;  %v5312_v32 = vld [vmem:[%s8880_s7 + $0x388] sm:$0xff] }
 0x1b7   :  { %6407 = vmatprep.subr.mxu1 %v6894_v31  ;;  %6418 = vmatprep.subr.mxu0 %v6894_v31 }
 0x1b8   :  { %6408 = vmatpush3.msra.mxu1 %v5279_v33  ;;  %6409 = vmatprep.mubr.msk.f32.mxu1 %vm6895_vm3, %v6894_v31  ;;  %v5984_v41 = vpop.f32.mrf.mxu1  ;;  %v5998_v42 = vpop.f32.mrf.mxu0  ;;  %v5340_v33 = vld [vmem:[%s8880_s7 + $0x468] sm:$0xff] }
 0x1b9   :  { %6419 = vmatpush3.msra.mxu0 %v5307_v34  ;;  %6410 = vmatmul.mubr.f32.vlgmr.msra.gmra.mxu1 %v4008_v38  ;;  %v5311_v38 = vld [vmem:[%s8880_s7 + $0x380] sm:$0xff]  ;;  %v4186_v41 = vld [vmem:[%s8883_s10 + $0xe] sm:$0x3]  ;;  %v5338_v42 = vld [vmem:[%s8880_s7 + $0x458] sm:$0xff] }
 0x1ba   :  { %6420 = vmatprep.subr.mxu0 %v6894_v31  ;;  %6447 = vmatprep.subr.mxu1 %v6894_v31 }
 0x1bb   :  { %6421 = vmatpush3.msra.mxu0 %v5306_v39  ;;  %6448 = vmatpush3.msra.mxu1 %v5326_v40  ;;  %v5339_v40 = vld [vmem:[%s8880_s7 + $0x460] sm:$0xff] }
 0x1bc   :  { %6422 = vmatprep.subr.mxu0 %v6894_v31  ;;  %6449 = vmatprep.subr.mxu1 %v6894_v31  ;;  %v1220_v47 = vpop.f32.mrf.mxu1  ;;  %v1453_v48 = vpop.f32.mrf.mxu0 }
 0x1bd   :  { %6423 = vmatpush3.msra.mxu0 %v5305_v43  ;;  %6450 = vmatpush3.msra.mxu1 %v5325_v44  ;;  %v1221_v49 = vadd.f32 %v1220_v47, %v1147_v35  ;;  %v5358_v43 = vld [vmem:[%s8880_s7 + $0x4f8] sm:$0xff]  ;;  %v5337_v47 = vld [vmem:[%s8880_s7 + $0x450] sm:$0xff] }
 0x1be   :  { %6424 = vmatprep.subr.mxu0 %v6894_v31  ;;  %6451 = vmatprep.subr.mxu1 %v6894_v31  ;;  %v5991_v52 = vpop.f32.mrf.mxu1  ;;  %v6012_v53 = vpop.f32.mrf.mxu0 }
 0x1bf   :  { %6425 = vmatpush3.msra.mxu0 %v5304_v45  ;;  %6452 = vmatpush3.msra.mxu1 %v5324_v46  ;;  %v1301_v54 = vadd.f32 %v1297_v36, %v1221_v49  ;;  %v5336_v52 = vld [vmem:[%s8880_s7 + $0x448] sm:$0xff] }
 0x1c0   :  { %6426 = vmatprep.subr.mxu0 %v6894_v31  ;;  %6453 = vmatprep.subr.mxu1 %v6894_v31  ;;  %v5356_v53 = vld [vmem:[%s8880_s7 + $0x4e8] sm:$0xff] }
 0x1c1   :  { %6427 = vmatpush3.msra.mxu0 %v5303_v50  ;;  %6454 = vmatpush3.msra.mxu1 %v5323_v51 }
 0x1c2   :  { %6428 = vmatprep.subr.mxu0 %v6894_v31  ;;  %6455 = vmatprep.subr.mxu1 %v6894_v31  ;;  %v1375_v59 = vpop.f32.mrf.mxu1  ;;  %v1609_v60 = vpop.f32.mrf.mxu0 }
 0x1c3   :  { %6429 = vmatpush3.msra.mxu0 %v5302_v55  ;;  %6456 = vmatpush3.msra.mxu1 %v5322_v56  ;;  %v1379_v61 = vadd.f32 %v1375_v59, %v1301_v54  ;;  %v5335_v54 = vld [vmem:[%s8880_s7 + $0x440] sm:$0xff]  ;;  %v5334_v59 = vld [vmem:[%s8880_s7 + $0x438] sm:$0xff] }
 0x1c4   :  { %6430 = vmatprep.subr.mxu0 %v6894_v31  ;;  %6457 = vmatprep.subr.mxu1 %v6894_v31  ;;  %v6005_v37 = vpop.f32.mrf.mxu1  ;;  %v6026_v0 = vpop.f32.mrf.mxu0  ;;  %v5355_v55 = vld [vmem:[%s8880_s7 + $0x4e0] sm:$0xff] }
 0x1c5   :  { %6431 = vmatpush3.msra.mxu0 %v5301_v57  ;;  %6458 = vmatpush3.msra.mxu1 %v5321_v58  ;;  %v1457_v1 = vadd.f32 %v1453_v48, %v1379_v61  ;;  %v5357_v48 = vld [vmem:[%s8880_s7 + $0x4f0] sm:$0xff] }
 0x1c6   :  { %6432 = vmatprep.subr.mxu0 %v6894_v31  ;;  %6459 = vmatprep.subr.mxu1 %v6894_v31  ;;  %v5333_v37 = vld [vmem:[%s8880_s7 + $0x430] sm:$0xff] }
 0x1c7   :  { %6433 = vmatpush3.msra.mxu0 %v5300_v62  ;;  %6460 = vmatpush3.msra.mxu1 %v5320_v63  ;;  %v5353_v0 = vld [vmem:[%s8880_s7 + $0x4d0] sm:$0xff] }
 0x1c8   :  { %6434 = vmatprep.subr.mxu0 %v6894_v31  ;;  %6461 = vmatprep.subr.mxu1 %v6894_v31  ;;  %v1531_v6 = vpop.f32.mrf.mxu1  ;;  %v1765_v7 = vpop.f32.mrf.mxu0 }
 0x1c9   :  { %6435 = vmatpush3.msra.mxu0 %v5299_v2  ;;  %6462 = vmatpush3.msra.mxu1 %v5319_v3  ;;  %v1535_v8 = vadd.f32 %v1531_v6, %v1457_v1  ;;  %v5332_v1 = vld [vmem:[%s8880_s7 + $0x428] sm:$0xff]  ;;  %v5331_v6 = vld [vmem:[%s8880_s7 + $0x420] sm:$0xff] }
 0x1ca   :  { %6436 = vmatprep.subr.mxu0 %v6894_v31  ;;  %6463 = vmatprep.subr.mxu1 %v6894_v31  ;;  %v6019_v11 = vpop.f32.mrf.mxu1  ;;  %v6040_v12 = vpop.f32.mrf.mxu0  ;;  %v5352_v2 = vld [vmem:[%s8880_s7 + $0x4c8] sm:$0xff] }
 0x1cb   :  { %6437 = vmatpush3.msra.mxu0 %v5298_v4  ;;  %6464 = vmatpush3.msra.mxu1 %v5318_v5  ;;  %v1613_v13 = vadd.f32 %v1609_v60, %v1535_v8  ;;  %v5354_v60 = vld [vmem:[%s8880_s7 + $0x4d8] sm:$0xff] }
 0x1cc   :  { %6438 = vmatprep.subr.mxu0 %v6894_v31  ;;  %6465 = vmatprep.subr.mxu1 %v6894_v31  ;;  %v5330_v11 = vld [vmem:[%s8880_s7 + $0x418] sm:$0xff] }
 0x1cd   :  { %6439 = vmatpush3.msra.mxu0 %v5297_v9  ;;  %6466 = vmatpush3.msra.mxu1 %v5317_v10  ;;  %v5350_v12 = vld [vmem:[%s8880_s7 + $0x4b8] sm:$0xff] }
 0x1ce   :  { %6440 = vmatprep.subr.mxu0 %v6894_v31  ;;  %6467 = vmatprep.subr.mxu1 %v6894_v31  ;;  %v1687_v17 = vpop.f32.mrf.mxu1  ;;  %v1921_v18 = vpop.f32.mrf.mxu0 }
 0x1cf   :  { %6441 = vmatpush3.msra.mxu0 %v5296_v14  ;;  %6468 = vmatpush3.msra.mxu1 %v5316_v15  ;;  %v1691_v20 = vadd.f32 %v1687_v17, %v1613_v13  ;;  %v5329_v13 = vld [vmem:[%s8880_s7 + $0x410] sm:$0xff] }
 0x1d0   :  { %6442 = vmatprep.subr.mxu0 %v6894_v31  ;;  %6469 = vmatprep.subr.mxu1 %v6894_v31  ;;  %v6033_v21 = vpop.f32.mrf.mxu1  ;;  %v6054_v22 = vpop.f32.mrf.mxu0  ;;  %v5349_v14 = vld [vmem:[%s8880_s7 + $0x4b0] sm:$0xff] }
 0x1d1   :  { %6443 = vmatpush3.msra.mxu0 %v5295_v16  ;;  %6444 = vmatprep.mubr.msk.f32.mxu0 %vm6895_vm3, %v6894_v31  ;;  %v1769_v26 = vadd.f32 %v1765_v7, %v1691_v20  ;;  %v5351_v7 = vld [vmem:[%s8880_s7 + $0x4c0] sm:$0xff] }
 0x1d2   :  { %6470 = vmatpush3.msra.mxu1 %v5315_v19  ;;  %6445 = vmatmul.mubr.f32.vlgmr.msra.gmra.mxu0 %v4097_v23  ;;  %v5348_v19 = vld [vmem:[%s8880_s7 + $0x4a8] sm:$0xff]  ;;  %v5327_v23 = vld [vmem:[%s8880_s7 + $0x400] sm:$0xff] }
 0x1d3   :  { %6471 = vmatprep.subr.mxu1 %v6894_v31  ;;  %6482 = vmatprep.subr.mxu0 %v6894_v31 }
 0x1d4   :  { %6472 = vmatpush3.msra.mxu1 %v5314_v24  ;;  %6483 = vmatpush3.msra.mxu0 %v5342_v25  ;;  %v1843_v29 = vpop.f32.mrf.mxu1  ;;  %v2077_v30 = vpop.f32.mrf.mxu0  ;;  %v5347_v24 = vld [vmem:[%s8880_s7 + $0x4a0] sm:$0xff] }
 0x1d5   :  { %6473 = vmatprep.subr.mxu1 %v6894_v31  ;;  %6484 = vmatprep.subr.mxu0 %v6894_v31  ;;  %v1847_v34 = vadd.f32 %v1843_v29, %v1769_v26  ;;  %v5374_v29 = vld [vmem:[%s8880_s7 + $0x578] sm:$0xff] }
 0x1d6   :  { %6474 = vmatpush3.msra.mxu1 %v5313_v27  ;;  %6485 = vmatpush3.msra.mxu0 %v5341_v28  ;;  %v6047_v35 = vpop.f32.mrf.mxu1  ;;  %v6068_v36 = vpop.f32.mrf.mxu0  ;;  %v4275_v27 = vld [vmem:[%s8883_s10 + $0x10] sm:$0x3]  ;;  %v5346_v28 = vld [vmem:[%s8880_s7 + $0x498] sm:$0xff] }
 0x1d7   :  { %6475 = vmatprep.subr.mxu1 %v6894_v31  ;;  %6486 = vmatprep.subr.mxu0 %v6894_v31  ;;  %v1925_v39 = vadd.f32 %v1921_v18, %v1847_v34  ;;  %v5328_v18 = vld [vmem:[%s8880_s7 + $0x408] sm:$0xff]  ;;  %v5345_v34 = vld [vmem:[%s8880_s7 + $0x490] sm:$0xff] }
 0x1d8   :  { %6476 = vmatpush3.msra.mxu1 %v5312_v32  ;;  %6487 = vmatpush3.msra.mxu0 %v5340_v33  ;;  %v5373_v35 = vld [vmem:[%s8880_s7 + $0x570] sm:$0xff] }
 0x1d9   :  { %6477 = vmatprep.subr.mxu1 %v6894_v31  ;;  %6488 = vmatprep.subr.mxu0 %v6894_v31 }
 0x1da   :  { %6478 = vmatpush3.msra.mxu1 %v5311_v38  ;;  %6479 = vmatprep.mubr.msk.f32.mxu1 %vm6895_vm3, %v6894_v31  ;;  %v1999_v44 = vpop.f32.mrf.mxu1  ;;  %v2233_v45 = vpop.f32.mrf.mxu0  ;;  %v5344_v38 = vld [vmem:[%s8880_s7 + $0x488] sm:$0xff] }
 0x1db   :  { %6489 = vmatpush3.msra.mxu0 %v5339_v40  ;;  %6480 = vmatmul.mubr.f32.vlgmr.msra.gmra.mxu1 %v4186_v41  ;;  %v2003_v46 = vadd.f32 %v1999_v44, %v1925_v39  ;;  %v5372_v39 = vld [vmem:[%s8880_s7 + $0x568] sm:$0xff]  ;;  %v5371_v44 = vld [vmem:[%s8880_s7 + $0x560] sm:$0xff] }
 0x1dc   :  { %6490 = vmatprep.subr.mxu0 %v6894_v31  ;;  %6517 = vmatprep.subr.mxu1 %v6894_v31  ;;  %v6061_v49 = vpop.f32.mrf.mxu1  ;;  %v6082_v50 = vpop.f32.mrf.mxu0 }
 0x1dd   :  { %6491 = vmatpush3.msra.mxu0 %v5338_v42  ;;  %6518 = vmatpush3.msra.mxu1 %v5358_v43  ;;  %v2081_v51 = vadd.f32 %v2077_v30, %v2003_v46  ;;  %v5343_v42 = vld [vmem:[%s8880_s7 + $0x480] sm:$0xff]  ;;  %v5370_v49 = vld [vmem:[%s8880_s7 + $0x558] sm:$0xff] }
 0x1de   :  { %6492 = vmatprep.subr.mxu0 %v6894_v31  ;;  %6519 = vmatprep.subr.mxu1 %v6894_v31  ;;  %v5390_v50 = vld [vmem:[%s8880_s7 + $0x5f8] sm:$0xff] }
 0x1df   :  { %6493 = vmatpush3.msra.mxu0 %v5337_v47  ;;  %6520 = vmatpush3.msra.mxu1 %v5357_v48  ;;  %v4364_v48 = vld [vmem:[%s8883_s10 + $0x12] sm:$0x3] }
 0x1e0   :  { %6494 = vmatprep.subr.mxu0 %v6894_v31  ;;  %6521 = vmatprep.subr.mxu1 %v6894_v31  ;;  %v2155_v56 = vpop.f32.mrf.mxu1  ;;  %v2389_v57 = vpop.f32.mrf.mxu0 }
 0x1e1   :  { %6495 = vmatpush3.msra.mxu0 %v5336_v52  ;;  %6522 = vmatpush3.msra.mxu1 %v5356_v53  ;;  %v2159_v58 = vadd.f32 %v2155_v56, %v2081_v51  ;;  %v5369_v51 = vld [vmem:[%s8880_s7 + $0x550] sm:$0xff]  ;;  %v5368_v56 = vld [vmem:[%s8880_s7 + $0x548] sm:$0xff] }
 0x1e2   :  { %6496 = vmatprep.subr.mxu0 %v6894_v31  ;;  %6523 = vmatprep.subr.mxu1 %v6894_v31  ;;  %v6075_v61 = vpop.f32.mrf.mxu1  ;;  %v6096_v62 = vpop.f32.mrf.mxu0  ;;  %v5389_v52 = vld [vmem:[%s8880_s7 + $0x5f0] sm:$0xff] }
 0x1e3   :  { %6497 = vmatpush3.msra.mxu0 %v5335_v54  ;;  %6524 = vmatpush3.msra.mxu1 %v5355_v55  ;;  %v2237_v63 = vadd.f32 %v2233_v45, %v2159_v58  ;;  %v5367_v61 = vld [vmem:[%s8880_s7 + $0x540] sm:$0xff] }
 0x1e4   :  { %6498 = vmatprep.subr.mxu0 %v6894_v31  ;;  %6525 = vmatprep.subr.mxu1 %v6894_v31  ;;  %v5387_v62 = vld [vmem:[%s8880_s7 + $0x5e0] sm:$0xff] }
 0x1e5   :  { %6499 = vmatpush3.msra.mxu0 %v5334_v59  ;;  %6526 = vmatpush3.msra.mxu1 %v5354_v60 }
 0x1e6   :  { %6500 = vmatprep.subr.mxu0 %v6894_v31  ;;  %6527 = vmatprep.subr.mxu1 %v6894_v31  ;;  %v2311_v3 = vpop.f32.mrf.mxu1  ;;  %v2545_v4 = vpop.f32.mrf.mxu0 }
 0x1e7   :  { %6501 = vmatpush3.msra.mxu0 %v5333_v37  ;;  %6528 = vmatpush3.msra.mxu1 %v5353_v0  ;;  %v2315_v5 = vadd.f32 %v2311_v3, %v2237_v63  ;;  %v5366_v63 = vld [vmem:[%s8880_s7 + $0x538] sm:$0xff]  ;;  %v5365_v3 = vld [vmem:[%s8880_s7 + $0x530] sm:$0xff] }
 0x1e8   :  { %6502 = vmatprep.subr.mxu0 %v6894_v31  ;;  %6529 = vmatprep.subr.mxu1 %v6894_v31  ;;  %v6089_v8 = vpop.f32.mrf.mxu1  ;;  %v6110_v9 = vpop.f32.mrf.mxu0  ;;  %v5386_v37 = vld [vmem:[%s8880_s7 + $0x5d8] sm:$0xff] }
 0x1e9   :  { %6503 = vmatpush3.msra.mxu0 %v5332_v1  ;;  %6530 = vmatpush3.msra.mxu1 %v5352_v2  ;;  %v2393_v10 = vadd.f32 %v2389_v57, %v2315_v5  ;;  %v5388_v57 = vld [vmem:[%s8880_s7 + $0x5e8] sm:$0xff] }
 0x1ea   :  { %6504 = vmatprep.subr.mxu0 %v6894_v31  ;;  %6531 = vmatprep.subr.mxu1 %v6894_v31  ;;  %v5364_v8 = vld [vmem:[%s8880_s7 + $0x528] sm:$0xff] }
 0x1eb   :  { %6505 = vmatpush3.msra.mxu0 %v5331_v6  ;;  %6532 = vmatpush3.msra.mxu1 %v5351_v7  ;;  %v5384_v9 = vld [vmem:[%s8880_s7 + $0x5c8] sm:$0xff] }
 0x1ec   :  { %6506 = vmatprep.subr.mxu0 %v6894_v31  ;;  %6533 = vmatprep.subr.mxu1 %v6894_v31  ;;  %v2467_v15 = vpop.f32.mrf.mxu1  ;;  %v2701_v16 = vpop.f32.mrf.mxu0 }
 0x1ed   :  { %6507 = vmatpush3.msra.mxu0 %v5330_v11  ;;  %6534 = vmatpush3.msra.mxu1 %v5350_v12  ;;  %v2471_v17 = vadd.f32 %v2467_v15, %v2393_v10  ;;  %v5363_v10 = vld [vmem:[%s8880_s7 + $0x520] sm:$0xff]  ;;  %v5362_v15 = vld [vmem:[%s8880_s7 + $0x518] sm:$0xff] }
 0x1ee   :  { %6508 = vmatprep.subr.mxu0 %v6894_v31  ;;  %6535 = vmatprep.subr.mxu1 %v6894_v31  ;;  %v6103_v20 = vpop.f32.mrf.mxu1  ;;  %v6124_v21 = vpop.f32.mrf.mxu0  ;;  %v5383_v11 = vld [vmem:[%s8880_s7 + $0x5c0] sm:$0xff] }
 0x1ef   :  { %6509 = vmatpush3.msra.mxu0 %v5329_v13  ;;  %6536 = vmatpush3.msra.mxu1 %v5349_v14  ;;  %v2549_v22 = vadd.f32 %v2545_v4, %v2471_v17  ;;  %v5385_v4 = vld [vmem:[%s8880_s7 + $0x5d0] sm:$0xff] }
 0x1f0   :  { %6510 = vmatprep.subr.mxu0 %v6894_v31  ;;  %6537 = vmatprep.subr.mxu1 %v6894_v31  ;;  %v5361_v20 = vld [vmem:[%s8880_s7 + $0x510] sm:$0xff] }
 0x1f1   :  { %6511 = vmatpush3.msra.mxu0 %v5328_v18  ;;  %6538 = vmatpush3.msra.mxu1 %v5348_v19  ;;  %v5381_v21 = vld [vmem:[%s8880_s7 + $0x5b0] sm:$0xff] }
 0x1f2   :  { %6512 = vmatprep.subr.mxu0 %v6894_v31  ;;  %6539 = vmatprep.subr.mxu1 %v6894_v31  ;;  %v2623_v25 = vpop.f32.mrf.mxu1  ;;  %v2857_v26 = vpop.f32.mrf.mxu0 }
 0x1f3   :  { %6513 = vmatpush3.msra.mxu0 %v5327_v23  ;;  %6514 = vmatprep.mubr.msk.f32.mxu0 %vm6895_vm3, %v6894_v31  ;;  %v2627_v30 = vadd.f32 %v2623_v25, %v2549_v22  ;;  %v5360_v23 = vld [vmem:[%s8880_s7 + $0x508] sm:$0xff] }
 0x1f4   :  { %6540 = vmatpush3.msra.mxu1 %v5347_v24  ;;  %6515 = vmatmul.mubr.f32.vlgmr.msra.gmra.mxu0 %v4275_v27  ;;  %v6117_v32 = vpop.f32.mrf.mxu1  ;;  %v6138_v33 = vpop.f32.mrf.mxu0  ;;  %v5380_v24 = vld [vmem:[%s8880_s7 + $0x5a8] sm:$0xff]  ;;  %v5359_v27 = vld [vmem:[%s8880_s7 + $0x500] sm:$0xff] }
 0x1f5   :  { %6541 = vmatprep.subr.mxu1 %v6894_v31  ;;  %6552 = vmatprep.subr.mxu0 %v6894_v31  ;;  %v2705_v36 = vadd.f32 %v2701_v16, %v2627_v30  ;;  %v5382_v16 = vld [vmem:[%s8880_s7 + $0x5b8] sm:$0xff]  ;;  %v4453_v32 = vld [vmem:[%s8883_s10 + $0x14] sm:$0x3] }
 0x1f6   :  { %6542 = vmatpush3.msra.mxu1 %v5346_v28  ;;  %6553 = vmatpush3.msra.mxu0 %v5374_v29  ;;  %v5379_v29 = vld [vmem:[%s8880_s7 + $0x5a0] sm:$0xff]  ;;  %v5378_v33 = vld [vmem:[%s8880_s7 + $0x598] sm:$0xff] }
 0x1f7   :  { %6543 = vmatprep.subr.mxu1 %v6894_v31  ;;  %6554 = vmatprep.subr.mxu0 %v6894_v31 }
 0x1f8   :  { %6544 = vmatpush3.msra.mxu1 %v5345_v34  ;;  %6555 = vmatpush3.msra.mxu0 %v5373_v35  ;;  %v2779_v40 = vpop.f32.mrf.mxu1  ;;  %v3013_v41 = vpop.f32.mrf.mxu0  ;;  %v5406_v34 = vld [vmem:[%s8880_s7 + $0x678] sm:$0xff] }
 0x1f9   :  { %6545 = vmatprep.subr.mxu1 %v6894_v31  ;;  %6556 = vmatprep.subr.mxu0 %v6894_v31  ;;  %v2783_v43 = vadd.f32 %v2779_v40, %v2705_v36  ;;  %v5376_v40 = vld [vmem:[%s8880_s7 + $0x588] sm:$0xff] }
 0x1fa   :  { %6546 = vmatpush3.msra.mxu1 %v5344_v38  ;;  %6557 = vmatpush3.msra.mxu0 %v5372_v39  ;;  %v6131_v45 = vpop.f32.mrf.mxu1  ;;  %v6152_v46 = vpop.f32.mrf.mxu0  ;;  %v5377_v38 = vld [vmem:[%s8880_s7 + $0x590] sm:$0xff] }
 0x1fb   :  { %6547 = vmatprep.subr.mxu1 %v6894_v31  ;;  %6558 = vmatprep.subr.mxu0 %v6894_v31  ;;  %v2861_v47 = vadd.f32 %v2857_v26, %v2783_v43  ;;  %v5405_v39 = vld [vmem:[%s8880_s7 + $0x670] sm:$0xff]  ;;  %v5403_v43 = vld [vmem:[%s8880_s7 + $0x660] sm:$0xff]  ;;  %v5402_v45 = vld [vmem:[%s8880_s7 + $0x658] sm:$0xff] }
 0x1fc   :  { %6548 = vmatpush3.msra.mxu1 %v5343_v42  ;;  %6549 = vmatprep.mubr.msk.f32.mxu1 %vm6895_vm3, %v6894_v31  ;;  %v5375_v42 = vld [vmem:[%s8880_s7 + $0x580] sm:$0xff]  ;;  %v5422_v46 = vld [vmem:[%s8880_s7 + $0x6f8] sm:$0xff] }
 0x1fd   :  { %6559 = vmatpush3.msra.mxu0 %v5371_v44  ;;  %6550 = vmatmul.mubr.f32.vlgmr.msra.gmra.mxu1 %v4364_v48  ;;  %v4542_v44 = vld [vmem:[%s8883_s10 + $0x16] sm:$0x3] }
 0x1fe   :  { %6560 = vmatprep.subr.mxu0 %v6894_v31  ;;  %6587 = vmatprep.subr.mxu1 %v6894_v31  ;;  %v2935_v53 = vpop.f32.mrf.mxu1  ;;  %v3169_v54 = vpop.f32.mrf.mxu0  ;;  %v5421_v48 = vld [vmem:[%s8880_s7 + $0x6f0] sm:$0xff] }
 0x1ff   :  { %6561 = vmatpush3.msra.mxu0 %v5370_v49  ;;  %6588 = vmatpush3.msra.mxu1 %v5390_v50  ;;  %v2939_v55 = vadd.f32 %v2935_v53, %v2861_v47  ;;  %v5401_v47 = vld [vmem:[%s8880_s7 + $0x650] sm:$0xff]  ;;  %v5400_v49 = vld [vmem:[%s8880_s7 + $0x648] sm:$0xff]  ;;  %v5398_v53 = vld [vmem:[%s8880_s7 + $0x638] sm:$0xff] }
 0x200   :  { %6562 = vmatprep.subr.mxu0 %v6894_v31  ;;  %6589 = vmatprep.subr.mxu1 %v6894_v31  ;;  %v6145_v58 = vpop.f32.mrf.mxu1  ;;  %v6166_v59 = vpop.f32.mrf.mxu0  ;;  %v5420_v50 = vld [vmem:[%s8880_s7 + $0x6e8] sm:$0xff] }
 0x201   :  { %6563 = vmatpush3.msra.mxu0 %v5369_v51  ;;  %6590 = vmatpush3.msra.mxu1 %v5389_v52  ;;  %v3017_v60 = vadd.f32 %v3013_v41, %v2939_v55  ;;  %v5404_v41 = vld [vmem:[%s8880_s7 + $0x668] sm:$0xff]  ;;  %v5399_v51 = vld [vmem:[%s8880_s7 + $0x640] sm:$0xff]  ;;  %v5397_v55 = vld [vmem:[%s8880_s7 + $0x630] sm:$0xff] }
 0x202   :  { %6564 = vmatprep.subr.mxu0 %v6894_v31  ;;  %6591 = vmatprep.subr.mxu1 %v6894_v31  ;;  %v5419_v52 = vld [vmem:[%s8880_s7 + $0x6e0] sm:$0xff]  ;;  %v5416_v58 = vld [vmem:[%s8880_s7 + $0x6c8] sm:$0xff] }
 0x203   :  { %6565 = vmatpush3.msra.mxu0 %v5368_v56  ;;  %6592 = vmatpush3.msra.mxu1 %v5388_v57  ;;  %v5417_v56 = vld [vmem:[%s8880_s7 + $0x6d0] sm:$0xff]  ;;  %v5396_v57 = vld [vmem:[%s8880_s7 + $0x628] sm:$0xff]  ;;  %v5395_v59 = vld [vmem:[%s8880_s7 + $0x620] sm:$0xff] }
 0x204   :  { %6566 = vmatprep.subr.mxu0 %v6894_v31  ;;  %6593 = vmatprep.subr.mxu1 %v6894_v31  ;;  %v3091_v0 = vpop.f32.mrf.mxu1  ;;  %v3325_v1 = vpop.f32.mrf.mxu0 }
 0x205   :  { %6567 = vmatpush3.msra.mxu0 %v5367_v61  ;;  %6594 = vmatpush3.msra.mxu1 %v5387_v62  ;;  %v3095_v2 = vadd.f32 %v3091_v0, %v3017_v60  ;;  %v5415_v60 = vld [vmem:[%s8880_s7 + $0x6c0] sm:$0xff] }
 0x206   :  { %6568 = vmatprep.subr.mxu0 %v6894_v31  ;;  %6595 = vmatprep.subr.mxu1 %v6894_v31  ;;  %v6159_v5 = vpop.f32.mrf.mxu1  ;;  %v6180_v6 = vpop.f32.mrf.mxu0 }
 0x207   :  { %6569 = vmatpush3.msra.mxu0 %v5366_v63  ;;  %6596 = vmatpush3.msra.mxu1 %v5386_v37  ;;  %v3173_v7 = vadd.f32 %v3169_v54, %v3095_v2  ;;  %v5418_v54 = vld [vmem:[%s8880_s7 + $0x6d8] sm:$0xff]  ;;  %v5413_v2 = vld [vmem:[%s8880_s7 + $0x6b0] sm:$0xff]  ;;  %v5391_v5 = vld [vmem:[%s8880_s7 + $0x600] sm:$0xff] }
 0x208   :  { %6570 = vmatprep.subr.mxu0 %v6894_v31  ;;  %6597 = vmatprep.subr.mxu1 %v6894_v31  ;;  %v5394_v63 = vld [vmem:[%s8880_s7 + $0x618] sm:$0xff]  ;;  %v5411_v6 = vld [vmem:[%s8880_s7 + $0x6a0] sm:$0xff] }
 0x209   :  { %6571 = vmatpush3.msra.mxu0 %v5365_v3  ;;  %6598 = vmatpush3.msra.mxu1 %v5385_v4  ;;  %v5414_v37 = vld [vmem:[%s8880_s7 + $0x6b8] sm:$0xff]  ;;  %v5392_v3 = vld [vmem:[%s8880_s7 + $0x608] sm:$0xff] }
 0x20a   :  { %6572 = vmatprep.subr.mxu0 %v6894_v31  ;;  %6599 = vmatprep.subr.mxu1 %v6894_v31  ;;  %v3247_v12 = vpop.f32.mrf.mxu1  ;;  %v3481_v13 = vpop.f32.mrf.mxu0  ;;  %v5412_v4 = vld [vmem:[%s8880_s7 + $0x6a8] sm:$0xff] }
 0x20b   :  { %6573 = vmatpush3.msra.mxu0 %v5364_v8  ;;  %6600 = vmatpush3.msra.mxu1 %v5384_v9  ;;  %v3251_v14 = vadd.f32 %v3247_v12, %v3173_v7  ;;  %v4631_v9 = vld [vmem:[%s8883_s10 + $0x18] sm:$0x3] }
 0x20c   :  { %6574 = vmatprep.subr.mxu0 %v6894_v31  ;;  %6601 = vmatprep.subr.mxu1 %v6894_v31  ;;  %v6173_v17 = vpop.f32.mrf.mxu1  ;;  %v6194_v18 = vpop.f32.mrf.mxu0 }
 0x20d   :  { %6575 = vmatpush3.msra.mxu0 %v5363_v10  ;;  %6602 = vmatpush3.msra.mxu1 %v5383_v11  ;;  %v3329_v19 = vadd.f32 %v3325_v1, %v3251_v14  ;;  %v5393_v1 = vld [vmem:[%s8880_s7 + $0x610] sm:$0xff]  ;;  %v5410_v10 = vld [vmem:[%s8880_s7 + $0x698] sm:$0xff]  ;;  %v5407_v17 = vld [vmem:[%s8880_s7 + $0x680] sm:$0xff] }
 0x20e   :  { %6576 = vmatprep.subr.mxu0 %v6894_v31  ;;  %6603 = vmatprep.subr.mxu1 %v6894_v31  ;;  %v5438_v11 = vld [vmem:[%s8880_s7 + $0x778] sm:$0xff]  ;;  %v5437_v14 = vld [vmem:[%s8880_s7 + $0x770] sm:$0xff]  ;;  %v5435_v18 = vld [vmem:[%s8880_s7 + $0x760] sm:$0xff] }
 0x20f   :  { %6577 = vmatpush3.msra.mxu0 %v5362_v15  ;;  %6604 = vmatpush3.msra.mxu1 %v5382_v16  ;;  %v3403_v22 = vpop.f32.mrf.mxu1  ;;  %v5408_v15 = vld [vmem:[%s8880_s7 + $0x688] sm:$0xff] }
 0x210   :  { %6578 = vmatprep.subr.mxu0 %v6894_v31  ;;  %6605 = vmatprep.subr.mxu1 %v6894_v31  ;;  %v3407_v25 = vadd.f32 %v3403_v22, %v3329_v19  ;;  %v5436_v16 = vld [vmem:[%s8880_s7 + $0x768] sm:$0xff]  ;;  %v4720_v19 = vld [vmem:[%s8883_s10 + $0x1a] sm:$0x3]  ;;  %v5433_v22 = vld [vmem:[%s8880_s7 + $0x750] sm:$0xff] }
 0x211   :  { %6579 = vmatpush3.msra.mxu0 %v5361_v20  ;;  %6606 = vmatpush3.msra.mxu1 %v5381_v21  ;;  %v6187_v26 = vpop.f32.mrf.mxu1  ;;  %v5434_v20 = vld [vmem:[%s8880_s7 + $0x758] sm:$0xff] }
 0x212   :  { %6580 = vmatprep.subr.mxu0 %v6894_v31  ;;  %6607 = vmatprep.subr.mxu1 %v6894_v31  ;;  %v3485_v28 = vadd.f32 %v3481_v13, %v3407_v25  ;;  %v5409_v13 = vld [vmem:[%s8880_s7 + $0x690] sm:$0xff]  ;;  %v5454_v21 = vld [vmem:[%s8880_s7 + $0x7f8] sm:$0xff]  ;;  %v5452_v25 = vld [vmem:[%s8880_s7 + $0x7e8] sm:$0xff] }
 0x213   :  { %6581 = vmatpush3.msra.mxu0 %v5360_v23  ;;  %6608 = vmatpush3.msra.mxu1 %v5380_v24  ;;  %v5453_v23 = vld [vmem:[%s8880_s7 + $0x7f0] sm:$0xff]  ;;  %v5432_v24 = vld [vmem:[%s8880_s7 + $0x748] sm:$0xff]  ;;  %v5431_v26 = vld [vmem:[%s8880_s7 + $0x740] sm:$0xff] }
 0x214   :  { %6582 = vmatprep.subr.mxu0 %v6894_v31  ;;  %6609 = vmatprep.subr.mxu1 %v6894_v31  ;;  %v3559_v30 = vpop.f32.mrf.mxu1 }
 0x215   :  { %6583 = vmatpush3.msra.mxu0 %v5359_v27  ;;  %6584 = vmatprep.mubr.msk.f32.mxu0 %vm6895_vm3, %v6894_v31  ;;  %v8570_v35 = vadd.f32 %v3559_v30, %v3485_v28  ;;  %v5451_v27 = vld [vmem:[%s8880_s7 + $0x7e0] sm:$0xff]  ;;  %v5430_v28 = vld [vmem:[%s8880_s7 + $0x738] sm:$0xff]  ;;  %v5429_v30 = vld [vmem:[%s8880_s7 + $0x730] sm:$0xff] }
 0x216   :  { %6610 = vmatpush3.msra.mxu1 %v5379_v29  ;;  %6585 = vmatmul.mubr.f32.vlgmr.msra.gmra.mxu0 %v4453_v32  ;;  %v6201_v36 = vpop.f32.mrf.mxu1  ;;  %v5450_v29 = vld [vmem:[%s8880_s7 + $0x7d8] sm:$0xff]  ;;  %v5449_v32 = vld [vmem:[%s8880_s7 + $0x7d0] sm:$0xff] }
 0x217   :  { %6611 = vmatprep.subr.mxu1 %v6894_v31  ;;  %6622 = vmatprep.subr.mxu0 %v6894_v31  ;;  %v5447_v36 = vld [vmem:[%s8880_s7 + $0x7c0] sm:$0xff] }
 0x218   :  { %6612 = vmatpush3.msra.mxu1 %v5378_v33  ;;  %6623 = vmatpush3.msra.mxu0 %v5406_v34  ;;  %v5428_v33 = vld [vmem:[%s8880_s7 + $0x728] sm:$0xff] }
 0x219   :  { %6613 = vmatprep.subr.mxu1 %v6894_v31  ;;  %6624 = vmatprep.subr.mxu0 %v6894_v31  ;;  %v5448_v34 = vld [vmem:[%s8880_s7 + $0x7c8] sm:$0xff] }
 0x21a   :  { %6614 = vmatpush3.msra.mxu1 %v5377_v38  ;;  %6625 = vmatpush3.msra.mxu0 %v5405_v39 }
 0x21b   :  { %6615 = vmatprep.subr.mxu1 %v6894_v31  ;;  %6626 = vmatprep.subr.mxu0 %v6894_v31 }
 0x21c   :  { %6616 = vmatpush3.msra.mxu1 %v5376_v40  ;;  %6627 = vmatpush3.msra.mxu0 %v5404_v41  ;;  %v5426_v40 = vld [vmem:[%s8880_s7 + $0x718] sm:$0xff] }
 0x21d   :  { %6617 = vmatprep.subr.mxu1 %v6894_v31  ;;  %6628 = vmatprep.subr.mxu0 %v6894_v31  ;;  %v5446_v41 = vld [vmem:[%s8880_s7 + $0x7b8] sm:$0xff] }
 0x21e   :  { %6618 = vmatpush3.msra.mxu1 %v5375_v42  ;;  %6619 = vmatprep.mubr.msk.f32.mxu1 %vm6895_vm3, %v6894_v31 }
 0x21f   :  { %6629 = vmatpush3.msra.mxu0 %v5403_v43  ;;  %6620 = vmatmul.mubr.f32.vlgmr.msra.gmra.mxu1 %v4542_v44  ;;  %v5425_v43 = vld [vmem:[%s8880_s7 + $0x710] sm:$0xff] }
 0x220   :  { %6630 = vmatprep.subr.mxu0 %v6894_v31  ;;  %6657 = vmatprep.subr.mxu1 %v6894_v31  ;;  %v5445_v44 = vld [vmem:[%s8880_s7 + $0x7b0] sm:$0xff] }
 0x221   :  { %6631 = vmatpush3.msra.mxu0 %v5402_v45  ;;  %6658 = vmatpush3.msra.mxu1 %v5422_v46  ;;  %v5424_v45 = vld [vmem:[%s8880_s7 + $0x708] sm:$0xff] }
 0x222   :  { %6632 = vmatprep.subr.mxu0 %v6894_v31  ;;  %6659 = vmatprep.subr.mxu1 %v6894_v31  ;;  %v5444_v46 = vld [vmem:[%s8880_s7 + $0x7a8] sm:$0xff] }
 0x223   :  { %6633 = vmatpush3.msra.mxu0 %v5401_v47  ;;  %6660 = vmatpush3.msra.mxu1 %v5421_v48  ;;  %v5423_v47 = vld [vmem:[%s8880_s7 + $0x700] sm:$0xff] }
 0x224   :  { %6634 = vmatprep.subr.mxu0 %v6894_v31  ;;  %6661 = vmatprep.subr.mxu1 %v6894_v31  ;;  %v5443_v48 = vld [vmem:[%s8880_s7 + $0x7a0] sm:$0xff] }
 0x225   :  { %6635 = vmatpush3.msra.mxu0 %v5400_v49  ;;  %6662 = vmatpush3.msra.mxu1 %v5420_v50 }
 0x226   :  { %6636 = vmatprep.subr.mxu0 %v6894_v31  ;;  %6663 = vmatprep.subr.mxu1 %v6894_v31 }
 0x227   :  { %6637 = vmatpush3.msra.mxu0 %v5399_v51  ;;  %6664 = vmatpush3.msra.mxu1 %v5419_v52  ;;  %v4809_v51 = vld [vmem:[%s8883_s10 + $0x1c] sm:$0x3] }
 0x228   :  { %6638 = vmatprep.subr.mxu0 %v6894_v31  ;;  %6665 = vmatprep.subr.mxu1 %v6894_v31  ;;  %v5442_v52 = vld [vmem:[%s8880_s7 + $0x798] sm:$0xff] }
 0x229   :  { %6639 = vmatpush3.msra.mxu0 %v5398_v53  ;;  %6666 = vmatpush3.msra.mxu1 %v5418_v54  ;;  %v5441_v54 = vld [vmem:[%s8880_s7 + $0x790] sm:$0xff] }
 0x22a   :  { %6640 = vmatprep.subr.mxu0 %v6894_v31  ;;  %6667 = vmatprep.subr.mxu1 %v6894_v31 }
 0x22b   :  { %6641 = vmatpush3.msra.mxu0 %v5397_v55  ;;  %6668 = vmatpush3.msra.mxu1 %v5417_v56  ;;  %v5440_v55 = vld [vmem:[%s8880_s7 + $0x788] sm:$0xff]  ;;  %v5439_v56 = vld [vmem:[%s8880_s7 + $0x780] sm:$0xff] }
 0x22c   :  { %6642 = vmatprep.subr.mxu0 %v6894_v31  ;;  %6669 = vmatprep.subr.mxu1 %v6894_v31  ;;  %v3647_v61 = vpop.f32.mrf.mxu0 }
 0x22d   :  { %6643 = vmatpush3.msra.mxu0 %v5396_v57  ;;  %6670 = vmatpush3.msra.mxu1 %v5416_v58  ;;  %v3651_v62 = vadd.f32 %v3647_v61, %v8570_v35  ;;  %v5427_v35 = vld [vmem:[%s8880_s7 + $0x720] sm:$0xff]  ;;  %v4898_v57 = vld [vmem:[%s8883_s10 + $0x1e] sm:$0x3] }
 0x22e   :  { %6644 = vmatprep.subr.mxu0 %v6894_v31  ;;  %6671 = vmatprep.subr.mxu1 %v6894_v31  ;;  %v6236_v0 = vpop.f32.mrf.mxu0 }
 0x22f   :  { %6645 = vmatpush3.msra.mxu0 %v5395_v59  ;;  %6672 = vmatpush3.msra.mxu1 %v5415_v60 }
 0x230   :  { %6646 = vmatprep.subr.mxu0 %v6894_v31  ;;  %6673 = vmatprep.subr.mxu1 %v6894_v31 }
 0x231   :  { %6647 = vmatpush3.msra.mxu0 %v5394_v63  ;;  %6674 = vmatpush3.msra.mxu1 %v5414_v37 }
 0x232   :  { %6648 = vmatprep.subr.mxu0 %v6894_v31  ;;  %6675 = vmatprep.subr.mxu1 %v6894_v31 }
 0x233   :  { %6649 = vmatpush3.msra.mxu0 %v5393_v1  ;;  %6676 = vmatpush3.msra.mxu1 %v5413_v2 }
 0x234   :  { %6650 = vmatprep.subr.mxu0 %v6894_v31  ;;  %6677 = vmatprep.subr.mxu1 %v6894_v31 }
 0x235   :  { %6651 = vmatpush3.msra.mxu0 %v5392_v3  ;;  %6678 = vmatpush3.msra.mxu1 %v5412_v4  ;;  %v3736_v7 = vpop.f32.mrf.mxu1 }
 0x236   :  { %6652 = vmatprep.subr.mxu0 %v6894_v31  ;;  %6679 = vmatprep.subr.mxu1 %v6894_v31  ;;  %v8700_v8 = vadd.f32 %v3736_v7, %v3651_v62 }
 0x237   :  { %6653 = vmatpush3.msra.mxu0 %v5391_v5  ;;  %6654 = vmatprep.mubr.msk.f32.mxu0 %vm6895_vm3, %v6894_v31  ;;  %v6271_v12 = vpop.f32.mrf.mxu1 }
 0x238   :  { %6680 = vmatpush3.msra.mxu1 %v5411_v6  ;;  %6655 = vmatmul.mubr.f32.vlgmr.msra.gmra.mxu0 %v4631_v9 }
 0x239   :  { %6681 = vmatprep.subr.mxu1 %v6894_v31  ;;  %6692 = vmatprep.subr.mxu0 %v6894_v31 }
 0x23a   :  { %6682 = vmatpush3.msra.mxu1 %v5410_v10  ;;  %6693 = vmatpush3.msra.mxu0 %v5438_v11 }
 0x23b   :  { %6683 = vmatprep.subr.mxu1 %v6894_v31  ;;  %6694 = vmatprep.subr.mxu0 %v6894_v31 }
 0x23c   :  { %6684 = vmatpush3.msra.mxu1 %v5409_v13  ;;  %6695 = vmatpush3.msra.mxu0 %v5437_v14 }
 0x23d   :  { %6685 = vmatprep.subr.mxu1 %v6894_v31  ;;  %6696 = vmatprep.subr.mxu0 %v6894_v31 }
 0x23e   :  { %6686 = vmatpush3.msra.mxu1 %v5408_v15  ;;  %6697 = vmatpush3.msra.mxu0 %v5436_v16 }
 0x23f   :  { %6687 = vmatprep.subr.mxu1 %v6894_v31  ;;  %6698 = vmatprep.subr.mxu0 %v6894_v31 }
 0x240   :  { %6688 = vmatpush3.msra.mxu1 %v5407_v17  ;;  %6689 = vmatprep.mubr.msk.f32.mxu1 %vm6895_vm3, %v6894_v31 }
 0x241   :  { %6699 = vmatpush3.msra.mxu0 %v5435_v18  ;;  %6690 = vmatmul.mubr.f32.vlgmr.msra.gmra.mxu1 %v4720_v19 }
 0x242   :  { %6700 = vmatprep.subr.mxu0 %v6894_v31  ;;  %6727 = vmatprep.subr.mxu1 %v6894_v31 }
 0x243   :  { %6701 = vmatpush3.msra.mxu0 %v5434_v20  ;;  %6728 = vmatpush3.msra.mxu1 %v5454_v21 }
 0x244   :  { %6702 = vmatprep.subr.mxu0 %v6894_v31  ;;  %6729 = vmatprep.subr.mxu1 %v6894_v31 }
 0x245   :  { %6703 = vmatpush3.msra.mxu0 %v5433_v22  ;;  %6730 = vmatpush3.msra.mxu1 %v5453_v23 }
 0x246   :  { %6704 = vmatprep.subr.mxu0 %v6894_v31  ;;  %6731 = vmatprep.subr.mxu1 %v6894_v31 }
 0x247   :  { %6705 = vmatpush3.msra.mxu0 %v5432_v24  ;;  %6732 = vmatpush3.msra.mxu1 %v5452_v25 }
 0x248   :  { %6706 = vmatprep.subr.mxu0 %v6894_v31  ;;  %6733 = vmatprep.subr.mxu1 %v6894_v31 }
 0x249   :  { %6707 = vmatpush3.msra.mxu0 %v5431_v26  ;;  %6734 = vmatpush3.msra.mxu1 %v5451_v27  ;;  %v5455_v26 = vld [vmem:[%s8881_s8] ss:$0 sm:$0xff] }
 0x24a   :  { %6708 = vmatprep.subr.mxu0 %v6894_v31  ;;  %6735 = vmatprep.subr.mxu1 %v6894_v31 }
 0x24b   :  { %6709 = vmatpush3.msra.mxu0 %v5430_v28  ;;  %6736 = vmatpush3.msra.mxu1 %v5450_v29 }
 0x24c   :  { %6710 = vmatprep.subr.mxu0 %v6894_v31  ;;  %6737 = vmatprep.subr.mxu1 %v6894_v31 }
 0x24d   :  { %6711 = vmatpush3.msra.mxu0 %v5429_v30  ;;  %6738 = vmatpush3.msra.mxu1 %v5449_v32 }
 0x24e   :  { %6712 = vmatprep.subr.mxu0 %v6894_v31  ;;  %6739 = vmatprep.subr.mxu1 %v6894_v31  ;;  %v3825_v38 = vpop.f32.mrf.mxu0 }
 0x24f   :  { %6713 = vmatpush3.msra.mxu0 %v5428_v33  ;;  %6740 = vmatpush3.msra.mxu1 %v5448_v34  ;;  %v3829_v39 = vadd.f32 %v3825_v38, %v8700_v8 }
 0x250   :  { %6714 = vmatprep.subr.mxu0 %v6894_v31  ;;  %6741 = vmatprep.subr.mxu1 %v6894_v31  ;;  %v6306_v42 = vpop.f32.mrf.mxu0 }
 0x251   :  { %6715 = vmatpush3.msra.mxu0 %v5427_v35  ;;  %6742 = vmatpush3.msra.mxu1 %v5447_v36 }
 0x252   :  { %6716 = vmatprep.subr.mxu0 %v6894_v31  ;;  %6743 = vmatprep.subr.mxu1 %v6894_v31 }
 0x253   :  { %6717 = vmatpush3.msra.mxu0 %v5426_v40  ;;  %6744 = vmatpush3.msra.mxu1 %v5446_v41 }
 0x254   :  { %6718 = vmatprep.subr.mxu0 %v6894_v31  ;;  %6745 = vmatprep.subr.mxu1 %v6894_v31 }
 0x255   :  { %6719 = vmatpush3.msra.mxu0 %v5425_v43  ;;  %6746 = vmatpush3.msra.mxu1 %v5445_v44 }
 0x256   :  { %6720 = vmatprep.subr.mxu0 %v6894_v31  ;;  %6747 = vmatprep.subr.mxu1 %v6894_v31 }
 0x257   :  { %6721 = vmatpush3.msra.mxu0 %v5424_v45  ;;  %6748 = vmatpush3.msra.mxu1 %v5444_v46  ;;  %v3914_v49 = vpop.f32.mrf.mxu1 }
 0x258   :  { %6722 = vmatprep.subr.mxu0 %v6894_v31  ;;  %6749 = vmatprep.subr.mxu1 %v6894_v31  ;;  %v3918_v50 = vadd.f32 %v3914_v49, %v3829_v39 }
 0x259   :  { %6723 = vmatpush3.msra.mxu0 %v5423_v47  ;;  %6724 = vmatprep.mubr.msk.f32.mxu0 %vm6895_vm3, %v6894_v31  ;;  %v6341_v53 = vpop.f32.mrf.mxu1 }
 0x25a   :  { %6750 = vmatpush3.msra.mxu1 %v5443_v48  ;;  %6725 = vmatmul.mubr.f32.vlgmr.msra.gmra.mxu0 %v4809_v51 }
 0x25b   :  { %6751 = vmatprep.subr.mxu1 %v6894_v31  ;;  %6759 = vmatprep.mubr.msk.f32.mxu1 %vm6895_vm3, %v6894_v31 }
 0x25c   :  { %6752 = vmatpush3.msra.mxu1 %v5442_v52 }
 0x25d   :  { %6753 = vmatprep.subr.mxu1 %v6894_v31 }
 0x25e   :  { %6754 = vmatpush3.msra.mxu1 %v5441_v54 }
 0x25f   :  { %6755 = vmatprep.subr.mxu1 %v6894_v31 }
 0x260   :  { %6756 = vmatpush3.msra.mxu1 %v5440_v55 }
 0x261   :  { %6757 = vmatprep.subr.mxu1 %v6894_v31 }
 0x262   :  { %6758 = vmatpush3.msra.mxu1 %v5439_v56 }
 0x263   :  { %6760 = vmatmul.mubr.f32.vlgmr.msra.gmra.mxu1 %v4898_v57 }
 0x270   :  { %v4003_v58 = vpop.f32.mrf.mxu0 }
 0x271   :  { %v4007_v59 = vadd.f32 %v4003_v58, %v3918_v50 }
 0x272   :  { %v6376_v60 = vpop.f32.mrf.mxu0 }
 0x279   :  { %v4092_v61 = vpop.f32.mrf.mxu1 }
 0x27a   :  { %v4096_v62 = vadd.f32 %v4092_v61, %v4007_v59 }
 0x27b   :  { %v6411_v63 = vpop.f32.mrf.mxu1 }
 0x292   :  { %v4181_v37 = vpop.f32.mrf.mxu0 }
 0x293   :  { %v4185_v0 = vadd.f32 %v4181_v37, %v4096_v62 }
 0x294   :  { %v6446_v1 = vpop.f32.mrf.mxu0 }
 0x29b   :  { %v4270_v2 = vpop.f32.mrf.mxu1 }
 0x29c   :  { %v4274_v3 = vadd.f32 %v4270_v2, %v4185_v0 }
 0x29d   :  { %v6481_v4 = vpop.f32.mrf.mxu1 }
 0x2b4   :  { %v4359_v5 = vpop.f32.mrf.mxu0 }
 0x2b5   :  { %v4363_v31 = vadd.f32 %v4359_v5, %v4274_v3 }
 0x2b6   :  { %v6516_v6 = vpop.f32.mrf.mxu0 }
 0x2bd   :  { %v4448_v7 = vpop.f32.mrf.mxu1 }
 0x2be   :  { %v4452_v8 = vadd.f32 %v4448_v7, %v4363_v31 }
 0x2bf   :  { %v6551_v9 = vpop.f32.mrf.mxu1 }
 0x2d6   :  { %v4537_v10 = vpop.f32.mrf.mxu0 }
 0x2d7   :  { %v4541_v11 = vadd.f32 %v4537_v10, %v4452_v8 }
 0x2d8   :  { %v6586_v12 = vpop.f32.mrf.mxu0 }
 0x2df   :  { %v4626_v13 = vpop.f32.mrf.mxu1 }
 0x2e0   :  { %v4630_v20 = vadd.f32 %v4626_v13, %v4541_v11 }
 0x2e1   :  { %v6621_v14 = vpop.f32.mrf.mxu1 }
 0x2f8   :  { %v4715_v15 = vpop.f32.mrf.mxu0 }
 0x2f9   :  { %v4719_v22 = vadd.f32 %v4715_v15, %v4630_v20 }
 0x2fa   :  { %v6656_v16 = vpop.f32.mrf.mxu0 }
 0x301   :  { %v4804_v17 = vpop.f32.mrf.mxu1 }
 0x302   :  { %v4808_v23 = vadd.f32 %v4804_v17, %v4719_v22 }
 0x303   :  { %v6691_v18 = vpop.f32.mrf.mxu1 }
 0x31a   :  { %v4893_v19 = vpop.f32.mrf.mxu0 }
 0x31b   :  { %v4897_v24 = vadd.f32 %v4893_v19, %v4808_v23 }
 0x31c   :  { %v6726_v21 = vpop.f32.mrf.mxu0 }
 0x323   :  { %v4982_v25 = vpop.f32.mrf.mxu1 }
 0x324   :  { %v4986_v27 = vadd.f32 %v4982_v25, %v4897_v24 }
 0x325   :  { %v6761_v28 = vpop.f32.mrf.mxu1 }
 0x326   :  { %v4994_v29 = vadd.f32 %v5455_v26, %v4986_v27 }
 0x328   :  { %4996 = vst.msk [vmem:[#allocation2] sm:$0x3] %vm4995_vm5, %v4994_v29 }
 0x329   :  { %6883 = shalt.err (!%p6880_p4)
}
 0x32a   :  { %5010 = dma.vmem_to_hbm [thread:$0]  %s5008_s5, 32, %s8884_s11, [#allocation3]  }
 0x32b   :  { %6892 = dma.done.wait [#allocation3], 32  }
 0x32c   :  { %6893 = vsyncadd [#allocation3], 4294967264 }
 0x32d   :  { %5018 = vsyncpa [#allocation3], 1 }

</bundles_post_ra>
